<compile_context>
chip_gen: v5e
topology: v5e:2x2
jax: 0.10.0
libtpu: 0.0.40
codegen_flags: <defaults>
</compile_context>

<pallas_src>
import functools
import math

import numpy as np
import jax
import jax.numpy as jnp
from jax import lax
from jax.experimental import pallas as pl
from jax.experimental.pallas import tpu as pltpu


# MXU input dtype (f32 accumulation everywhere).  bf16 feeds the MXU at full
# rate on v6e/v7x and halves weight DMA bytes; use jnp.float32 for strict
# numerical fidelity to the PyTorch f32 reference.
_MXU_DTYPE = jnp.bfloat16
_LN_EPS = 1e-5


def _round_up(x, m):
    return ((x + m - 1) // m) * m


def _const_spec(shape):
    """Full-array BlockSpec with a constant index map (weight / bias inputs)."""
    n = len(shape)
    return pl.BlockSpec(shape, lambda *_: (0,) * n)


def _pick_tk(k):
    for t in (1024, 512, 256, 128):
        if k % t == 0:
            return t
    return k


# --------------------------------------------------------------------------
# In-kernel building blocks (operate on loaded VMEM values)
# --------------------------------------------------------------------------

def _attention(xq, xkv, wq, bq, wk, bk, wv, bv, wo, bo, num_heads):
    """Head-batched MHA + output projection.

    xq: (Lq, Dp) f32, xkv: (Lk, Dp) f32 (padded lanes are zero).
    wq/wk/wv: (H, Dp, Dh) bf16, bq/bk/bv: (H, 1, Dh) f32,
    wo: (H, Dh, Dp) bf16, bo: (1, Dp) f32.
    The 1/sqrt(Dh) scale is pre-folded into wq/bq at init.
    """
    H = num_heads
    Lq, Dp = xq.shape
    Lk = xkv.shape[0]
    xq_h = jnp.broadcast_to(xq.astype(_MXU_DTYPE)[None], (H, Lq, Dp))
    xkv_h = jnp.broadcast_to(xkv.astype(_MXU_DTYPE)[None], (H, Lk, Dp))

    q = jnp.einsum("hld,hde->hle", xq_h, wq,
                   preferred_element_type=jnp.float32) + bq
    k = jnp.einsum("hld,hde->hle", xkv_h, wk,
                   preferred_element_type=jnp.float32) + bk
    v = jnp.einsum("hld,hde->hle", xkv_h, wv,
                   preferred_element_type=jnp.float32) + bv

    s = jnp.einsum("hqe,hke->hqk", q.astype(_MXU_DTYPE), k.astype(_MXU_DTYPE),
                   preferred_element_type=jnp.float32)
    s = s - jnp.max(s, axis=-1, keepdims=True)
    p = jnp.exp(s)
    p = p / jnp.sum(p, axis=-1, keepdims=True)   # exact reciprocal for parity

    o = jnp.einsum("hqk,hke->hqe", p.astype(_MXU_DTYPE), v.astype(_MXU_DTYPE),
                   preferred_element_type=jnp.float32)
    o = jnp.einsum("hqe,hed->hqd", o.astype(_MXU_DTYPE), wo,
                   preferred_element_type=jnp.float32)
    return jnp.sum(o, axis=0) + bo               # (Lq, Dp), lane dense


def _add_layernorm(x, y, ln, d_model):
    """LayerNorm(x + y) over the real feature width d_model.

    `ln` is (2, Dp): row 0 = gamma (zero in padded lanes), row 1 = beta.
    Padded lanes of x/y are zero, so sums over the full padded lane width are
    exact; gamma=0 in padded lanes keeps them zero on output.
    """
    h = x + y
    inv_d = 1.0 / float(d_model)
    mu = jnp.sum(h, axis=-1, keepdims=True) * inv_d
    var = jnp.sum(h * h, axis=-1, keepdims=True) * inv_d - mu * mu
    n = (h - mu) * lax.rsqrt(var + _LN_EPS)
    return n * ln[0:1, :] + ln[1:2, :]


def _ffn(x, w1, b1, w2, b2):
    h = jnp.dot(x.astype(_MXU_DTYPE), w1,
                preferred_element_type=jnp.float32) + b1
    h = jnp.maximum(h, 0.0)
    return jnp.dot(h.astype(_MXU_DTYPE), w2,
                   preferred_element_type=jnp.float32) + b2


# --------------------------------------------------------------------------
# Fused stem kernel: patch-embed (K-tiled) + ReLU + input_proj + pos-enc add
# --------------------------------------------------------------------------

def _stem_kernel(patch_ref, bw_ref, bb_ref, pw_ref, pb_ref, pe_ref, o_ref,
                 acc_ref):
    @pl.when(pl.program_id(0) == 0)
    def _():
        acc_ref[...] = jnp.zeros_like(acc_ref)

    acc_ref[...] += jnp.dot(patch_ref[...].astype(_MXU_DTYPE), bw_ref[...],
                            preferred_element_type=jnp.float32)

    @pl.when(pl.program_id(0) == pl.num_programs(0) - 1)
    def _():
        feat = jnp.maximum(acc_ref[...] + bb_ref[...], 0.0)
        src = jnp.dot(feat.astype(_MXU_DTYPE), pw_ref[...],
                      preferred_element_type=jnp.float32)
        o_ref[...] = (src + pb_ref[...] + pe_ref[...]).astype(o_ref.dtype)


def pallas_stem(patches, bw, bb, pw, pb, pe):
    """patches: (M, K) f32 -> (M, Dp) f32 (lane-dense, pos-enc already added)."""
    M, K = patches.shape
    Kp, Cbp = bw.shape
    Dp = pw.shape[1]
    if Kp != K:                               # no-op for the default config
        patches = jnp.pad(patches, ((0, 0), (0, Kp - K)))
    tk = _pick_tk(Kp)
    cost = pl.CostEstimate(
        flops=2 * M * Kp * Cbp + 2 * M * Cbp * Dp,
        transcendentals=0,
        bytes_accessed=M * Kp * 4 + Kp * Cbp * 2 + Cbp * Dp * 2 + M * Dp * 4)
    return pl.pallas_call(
        _stem_kernel,
        out_shape=jax.ShapeDtypeStruct((M, Dp), jnp.float32),
        grid=(Kp // tk,),
        in_specs=[
            pl.BlockSpec((M, tk), lambda k: (0, k)),
            pl.BlockSpec((tk, Cbp), lambda k: (k, 0)),
            _const_spec(bb.shape), _const_spec(pw.shape),
            _const_spec(pb.shape), _const_spec(pe.shape),
        ],
        out_specs=pl.BlockSpec((M, Dp), lambda k: (0, 0)),
        scratch_shapes=[pltpu.VMEM((M, Cbp), jnp.float32)],
        compiler_params=pltpu.CompilerParams(
            dimension_semantics=("arbitrary",)),
        cost_estimate=cost,
    )(patches, bw, bb, pw, pb, pe)


# --------------------------------------------------------------------------
# Fused encoder layer kernel (one grid step per batch element)
# --------------------------------------------------------------------------

def _encoder_layer_kernel(x_ref, wq, bq, wk, bk, wv, bv, wo, bo, ln1,
                          w1, b1, w2, b2, ln2, o_ref, *, num_heads, d_model):
    x = x_ref[0]                                               # (L, Dp)
    a = _attention(x, x, wq[...], bq[...], wk[...], bk[...], wv[...], bv[...],
                   wo[...], bo[...], num_heads)
    x = _add_layernorm(x, a, ln1[...], d_model)
    h = _ffn(x, w1[...], b1[...], w2[...], b2[...])
    x = _add_layernorm(x, h, ln2[...], d_model)
    o_ref[0] = x.astype(o_ref.dtype)


def encoder_layer(x, p, num_heads, d_model):
    B, L, Dp = x.shape
    sa = p["sa"]
    weights = [sa["wq"], sa["bq"], sa["wk"], sa["bk"], sa["wv"], sa["bv"],
               sa["wo"], sa["bo"], p["ln1"],
               p["w1"], p["b1"], p["w2"], p["b2"], p["ln2"]]
    in_specs = ([pl.BlockSpec((1, L, Dp), lambda b: (b, 0, 0))]
                + [_const_spec(w.shape) for w in weights])
    return pl.pallas_call(
        functools.partial(_encoder_layer_kernel, num_heads=num_heads,
                          d_model=d_model),
        out_shape=jax.ShapeDtypeStruct((B, L, Dp), jnp.float32),
        grid=(B,),
        in_specs=in_specs,
        out_specs=pl.BlockSpec((1, L, Dp), lambda b: (b, 0, 0)),
        compiler_params=pltpu.CompilerParams(dimension_semantics=("parallel",)),
    )(x, *weights)


# --------------------------------------------------------------------------
# Fused decoder layer kernel (self-attn + cross-attn + FFN, one call)
# --------------------------------------------------------------------------

def _decoder_layer_kernel(x_ref, m_ref,
                          swq, sbq, swk, sbk, swv, sbv, swo, sbo, ln1,
                          cwq, cbq, cwk, cbk, cwv, cbv, cwo, cbo, ln2,
                          w1, b1, w2, b2, ln3,
                          o_ref, *, num_heads, d_model):
    x = x_ref[0]                                               # (Q, Dp)
    m = m_ref[0]                                               # (Lm, Dp)
    a = _attention(x, x, swq[...], sbq[...], swk[...], sbk[...], swv[...],
                   sbv[...], swo[...], sbo[...], num_heads)
    x = _add_layernorm(x, a, ln1[...], d_model)
    c = _attention(x, m, cwq[...], cbq[...], cwk[...], cbk[...], cwv[...],
                   cbv[...], cwo[...], cbo[...], num_heads)
    x = _add_layernorm(x, c, ln2[...], d_model)
    h = _ffn(x, w1[...], b1[...], w2[...], b2[...])
    x = _add_layernorm(x, h, ln3[...], d_model)
    o_ref[0] = x.astype(o_ref.dtype)


def decoder_layer(x, mem, p, num_heads, d_model):
    B, Q, Dp = x.shape
    Lm = mem.shape[1]
    sa, ca = p["sa"], p["ca"]
    weights = [sa["wq"], sa["bq"], sa["wk"], sa["bk"], sa["wv"], sa["bv"],
               sa["wo"], sa["bo"], p["ln1"],
               ca["wq"], ca["bq"], ca["wk"], ca["bk"], ca["wv"], ca["bv"],
               ca["wo"], ca["bo"], p["ln2"],
               p["w1"], p["b1"], p["w2"], p["b2"], p["ln3"]]
    in_specs = ([pl.BlockSpec((1, Q, Dp), lambda b: (b, 0, 0)),
                 pl.BlockSpec((1, Lm, Dp), lambda b: (b, 0, 0))]
                + [_const_spec(w.shape) for w in weights])
    return pl.pallas_call(
        functools.partial(_decoder_layer_kernel, num_heads=num_heads,
                          d_model=d_model),
        out_shape=jax.ShapeDtypeStruct((B, Q, Dp), jnp.float32),
        grid=(B,),
        in_specs=in_specs,
        out_specs=pl.BlockSpec((1, Q, Dp), lambda b: (b, 0, 0)),
        compiler_params=pltpu.CompilerParams(dimension_semantics=("parallel",)),
    )(x, mem, *weights)


# --------------------------------------------------------------------------
# Fused heads kernel: class linear + bbox 3-layer MLP (+ sigmoid)
# --------------------------------------------------------------------------

def _heads_kernel(hs_ref, cw, cb, w1, b1, w2, b2, w3, b3, logit_ref, box_ref):
    x = hs_ref[...].astype(_MXU_DTYPE)
    logit_ref[...] = (jnp.dot(x, cw[...], preferred_element_type=jnp.float32)
                      + cb[...]).astype(logit_ref.dtype)
    h = jnp.maximum(jnp.dot(x, w1[...],
                            preferred_element_type=jnp.float32) + b1[...], 0.0)
    h = jnp.maximum(jnp.dot(h.astype(_MXU_DTYPE), w2[...],
                            preferred_element_type=jnp.float32) + b2[...], 0.0)
    bx = jnp.dot(h.astype(_MXU_DTYPE), w3[...],
                 preferred_element_type=jnp.float32) + b3[...]
    box_ref[...] = jax.nn.sigmoid(bx).astype(box_ref.dtype)


def pallas_heads(hs, params):
    M, Dp = hs.shape
    Ncls = params["class_w"].shape[1]
    Nbox = params["bbox_w3"].shape[1]
    tm = 8 if M % 8 == 0 else M
    weights = [params["class_w"], params["class_b"],
               params["bbox_w1"], params["bbox_b1"],
               params["bbox_w2"], params["bbox_b2"],
               params["bbox_w3"], params["bbox_b3"]]
    return pl.pallas_call(
        _heads_kernel,
        out_shape=(jax.ShapeDtypeStruct((M, Ncls), jnp.float32),
                   jax.ShapeDtypeStruct((M, Nbox), jnp.float32)),
        grid=(M // tm,),
        in_specs=([pl.BlockSpec((tm, Dp), lambda i: (i, 0))]
                  + [_const_spec(w.shape) for w in weights]),
        out_specs=(pl.BlockSpec((tm, Ncls), lambda i: (i, 0)),
                   pl.BlockSpec((tm, Nbox), lambda i: (i, 0))),
        compiler_params=pltpu.CompilerParams(dimension_semantics=("parallel",)),
    )(hs, *weights)


# --------------------------------------------------------------------------
# Positional encoding (numpy constant, padded to the lane-dense width)
# --------------------------------------------------------------------------

def sinusoidal_pe(length, d_model, d_pad):
    pos = np.arange(length, dtype=np.float32)[:, None]
    i = np.arange(d_model, dtype=np.float32)[None, :]
    rates = 1.0 / np.power(10000.0, (2.0 * np.floor(i / 2.0)) / float(d_model))
    ang = pos * rates
    pe = np.zeros((length, d_pad), dtype=np.float32)
    pe[:, 0:d_model:2] = np.sin(ang[:, 0::2])
    pe[:, 1:d_model:2] = np.cos(ang[:, 1::2])
    return jnp.asarray(pe)


# --------------------------------------------------------------------------
# DETR forward
# --------------------------------------------------------------------------

def detr_forward(params, x, cfg):
    B, C, H, W = x.shape
    P = cfg["patch"]
    D = cfg["hidden_dim"]
    Dp = params["proj_w"].shape[1]
    h, w = H // P, W // P
    L = h * w
    Q = cfg["num_queries"]

    # TODO(synk): the torchvision ResNet50 pretrained backbone (~53 convs + BN)
    # is replaced by a stride-32 patch-embedding linear stand-in with matching
    # output stride (H/32, W/32) and a configurable channel count.
    patches = (x.reshape(B, C, h, P, w, P)
                .transpose(0, 2, 4, 1, 3, 5)
                .reshape(B * L, C * P * P))

    # Stem fuses: patch-embed (K-tiled) + ReLU + 1x1-conv input_proj + pos-enc.
    pe_src = jnp.tile(sinusoidal_pe(L, D, Dp), (B, 1))         # constant
    src = pallas_stem(patches, params["backbone_w"], params["backbone_b"],
                      params["proj_w"], params["proj_b"], pe_src)
    mem = src.reshape(B, L, Dp)
    for lp in params["enc"]:
        mem = encoder_layer(mem, lp, cfg["nheads"], D)

    # query_embed.weight is only used for its shape in the reference forward
    # (tgt = zeros_like(query_embed)); tgt = zeros + query positional encoding.
    tgt = jnp.broadcast_to(sinusoidal_pe(Q, D, Dp)[None], (B, Q, Dp))
    out = tgt
    for lp in params["dec"]:
        out = decoder_layer(out, mem, lp, cfg["nheads"], D)

    hs = out.reshape(B * Q, Dp)
    logits_p, boxes_p = pallas_heads(hs, params)               # lane-dense
    n_cls = cfg["num_classes"] + 1
    logits = logits_p[:, :n_cls].reshape(B, Q, n_cls)
    boxes = boxes_p[:, :4].reshape(B, Q, 4)
    return {"pred_logits": logits, "pred_boxes": boxes}


# --------------------------------------------------------------------------
# Deterministic parameter construction (all padding / bf16 / head-major
# reorganization and the 1/sqrt(Dh) scale fold happen ONCE here).
# --------------------------------------------------------------------------

def init_params(key, cfg):
    D, F, H = cfg["hidden_dim"], cfg["ff_dim"], cfg["nheads"]
    Dh = D // H
    Cb, P = cfg["backbone_out_dim"], cfg["patch"]
    Dp = _round_up(D, 128)
    Fp = _round_up(F, 128)
    Cbp = _round_up(Cb, 128)
    Ncls = _round_up(cfg["num_classes"] + 1, 128)
    Nbox = 128
    Kp = _round_up(3 * P * P, 128)

    keys = iter(jax.random.split(key, 512))

    def dense(i, o):
        w = 0.02 * jax.random.normal(next(keys), (i, o), dtype=jnp.float32)
        return w, jnp.zeros((o,), jnp.float32)

    def pad_w(w, rows, cols):                    # matmul weights -> bf16
        r, c = w.shape
        return jnp.pad(w, ((0, rows - r), (0, cols - c))).astype(jnp.bfloat16)

    def pad_b(b, n):                             # biases stay f32, (1, n)
        return jnp.pad(b, (0, n - b.shape[0])).reshape(1, n).astype(jnp.float32)

    def head_proj(w, b, scale=1.0):              # (D_in, D) -> (H, Dp, Dh)
        d_in = w.shape[0]
        wh = (w * scale).reshape(d_in, H, Dh).transpose(1, 0, 2)
        wh = jnp.pad(wh, ((0, 0), (0, Dp - d_in), (0, 0))).astype(jnp.bfloat16)
        bh = (b * scale).reshape(H, 1, Dh).astype(jnp.float32)
        return wh, bh

    def head_out(w, b):                          # (D, D) -> (H, Dh, Dp)
        wh = jnp.pad(w.reshape(H, Dh, D), ((0, 0), (0, 0), (0, Dp - D)))
        return wh.astype(jnp.bfloat16), pad_b(b, Dp)

    def ln_pack():                               # gamma zero in padded lanes
        gb = jnp.zeros((2, Dp), jnp.float32)
        return gb.at[0, :D].set(1.0)

    def attn_params():
        wq, bq = dense(D, D)
        wk, bk = dense(D, D)
        wv, bv = dense(D, D)
        wo, bo = dense(D, D)
        scale = 1.0 / math.sqrt(Dh)
        p = {}
        p["wq"], p["bq"] = head_proj(wq, bq, scale)   # scale folded into Q
        p["wk"], p["bk"] = head_proj(wk, bk)
        p["wv"], p["bv"] = head_proj(wv, bv)
        p["wo"], p["bo"] = head_out(wo, bo)
        return p

    def ffn_params():
        w1, b1 = dense(D, F)
        w2, b2 = dense(F, D)
        return dict(w1=pad_w(w1, Dp, Fp), b1=pad_b(b1, Fp),
                    w2=pad_w(w2, Fp, Dp), b2=pad_b(b2, Dp))

    def enc_layer():
        p = dict(sa=attn_params(), ln1=ln_pack())
        p.update(ffn_params())
        p["ln2"] = ln_pack()
        return p

    def dec_layer():
        p = dict(sa=attn_params(), ln1=ln_pack(), ca=attn_params(),
                 ln2=ln_pack())
        p.update(ffn_params())
        p["ln3"] = ln_pack()
        return p

    params = {}
    bw, bb = dense(3 * P * P, Cb)
    params["backbone_w"], params["backbone_b"] = pad_w(bw, Kp, Cbp), pad_b(bb, Cbp)
    pw, pb = dense(Cb, D)
    params["proj_w"], params["proj_b"] = pad_w(pw, Cbp, Dp), pad_b(pb, Dp)
    params["enc"] = [enc_layer() for _ in range(cfg["enc_layers"])]
    params["dec"] = [dec_layer() for _ in range(cfg["dec_layers"])]
    cw, cb = dense(D, cfg["num_classes"] + 1)
    params["class_w"], params["class_b"] = pad_w(cw, Dp, Ncls), pad_b(cb, Ncls)
    w1, b1 = dense(D, D)
    w2, b2 = dense(D, D)
    w3, b3 = dense(D, 4)
    params["bbox_w1"], params["bbox_b1"] = pad_w(w1, Dp, Dp), pad_b(b1, Dp)
    params["bbox_w2"], params["bbox_b2"] = pad_w(w2, Dp, Dp), pad_b(b2, Dp)
    params["bbox_w3"], params["bbox_b3"] = pad_w(w3, Dp, Nbox), pad_b(b3, Nbox)
    # query_embed.weight exists in the reference module but only its shape is
    # used in forward (tgt = zeros_like), so it is not materialized here.
    return params


if __name__ == "__main__":
    cfg = dict(
        num_classes=5,
        num_queries=8,
        hidden_dim=32,
        nheads=4,
        ff_dim=64,
        enc_layers=2,
        dec_layers=2,
        backbone_out_dim=64,   # scaled-down stand-in for ResNet50's 2048
        patch=32,              # output stride 32, matching ResNet50
    )
    key = jax.random.PRNGKey(0)
    pkey, xkey = jax.random.split(key)
    params = init_params(pkey, cfg)
    x = jax.random.normal(xkey, (2, 3, 64, 64), dtype=jnp.float32)  # NCHW

    forward = jax.jit(lambda p, inp: detr_forward(p, inp, cfg))
    out = forward(params, x)
    out = jax.block_until_ready(out)

    assert out["pred_logits"].shape == (2, cfg["num_queries"], cfg["num_classes"] + 1)
    assert out["pred_boxes"].shape == (2, cfg["num_queries"], 4)
    assert bool(jnp.all(jnp.isfinite(out["pred_logits"])))
    assert bool(jnp.all((out["pred_boxes"] >= 0.0) & (out["pred_boxes"] <= 1.0)))
    print("KERNEL_OK")
</pallas_src>

<mosaic_0001>
module attributes {stable_mosaic.version = 11 : i64} {
  func.func @_stem_kernel(%arg0: i32, %arg1: memref<8x1024xf32, #tpu.memory_space<vmem>>, %arg2: memref<1024x128xbf16, #tpu.memory_space<vmem>>, %arg3: memref<1x128xf32, #tpu.memory_space<vmem>>, %arg4: memref<128x128xbf16, #tpu.memory_space<vmem>>, %arg5: memref<1x128xf32, #tpu.memory_space<vmem>>, %arg6: memref<8x128xf32, #tpu.memory_space<vmem>>, %arg7: memref<8x128xf32, #tpu.memory_space<vmem>>, %arg8: memref<8x128xf32, #tpu.memory_space<vmem>>) attributes {dimension_semantics = [#tpu.dimension_semantics<arbitrary>], iteration_bounds = array<i64: 3>, scalar_prefetch = 0 : i64, scratch_operands = 1 : i64, tpu.core_type = #tpu.core_type<tc>, window_params = [{transform_indices = @transform_0, window_bounds = array<i64: 8, 1024>}, {transform_indices = @transform_1, window_bounds = array<i64: 1024, 128>}, {pipeline_mode = #tpu.pipeline_mode<synchronous>, transform_indices = @transform_2, window_bounds = array<i64: 1, 128>}, {pipeline_mode = #tpu.pipeline_mode<synchronous>, transform_indices = @transform_3, window_bounds = array<i64: 128, 128>}, {pipeline_mode = #tpu.pipeline_mode<synchronous>, transform_indices = @transform_4, window_bounds = array<i64: 1, 128>}, {pipeline_mode = #tpu.pipeline_mode<synchronous>, transform_indices = @transform_5, window_bounds = array<i64: 8, 128>}, {pipeline_mode = #tpu.pipeline_mode<synchronous>, transform_indices = @transform_6, window_bounds = array<i64: 8, 128>}]} {
    %c0_i32 = arith.constant 0 : i32
    %0 = arith.cmpi eq, %arg0, %c0_i32 : i32
    %1 = arith.extui %0 : i1 to i32
    %c0_i32_0 = arith.constant 0 : i32
    %2 = arith.cmpi ne, %1, %c0_i32_0 : i32
    scf.if %2 {
      %cst_9 = arith.constant 0.000000e+00 : f32
      %13 = vector.broadcast %cst_9 : f32 to vector<8x128xf32>
      %c0_10 = arith.constant 0 : index
      %c0_11 = arith.constant 0 : index
      %14 = vector.load %arg8[%c0_10, %c0_11] : memref<8x128xf32, #tpu.memory_space<vmem>>, vector<8x128xf32>
      tpu.vector_store %arg8[%c0_10, %c0_11], %13 {strides = array<i32>} : memref<8x128xf32, #tpu.memory_space<vmem>>, vector<8x128xf32>,
    } else {
    }
    %c0 = arith.constant 0 : index
    %c0_1 = arith.constant 0 : index
    %3 = vector.load %arg8[%c0, %c0_1] : memref<8x128xf32, #tpu.memory_space<vmem>>, vector<8x128xf32>
    %c0_2 = arith.constant 0 : index
    %c0_3 = arith.constant 0 : index
    %4 = vector.load %arg1[%c0_2, %c0_3] : memref<8x1024xf32, #tpu.memory_space<vmem>>, vector<8x1024xf32>
    %5 = arith.truncf %4 : vector<8x1024xf32> to vector<8x1024xbf16>
    %c0_4 = arith.constant 0 : index
    %c0_5 = arith.constant 0 : index
    %6 = vector.load %arg2[%c0_4, %c0_5] : memref<1024x128xbf16, #tpu.memory_space<vmem>>, vector<1024x128xbf16>
    %cst = arith.constant dense<0.000000e+00> : vector<8x128xf32>
    %7 = tpu.matmul %5, %6, %cst {dimension_numbers = #tpu.dot_dimension_numbers<[1], [0], [0], [1], [0, 0, 1, 1], [], []>} : vector<8x1024xbf16>, vector<1024x128xbf16>, vector<8x128xf32> -> vector<8x128xf32>
    %8 = arith.addf %3, %7 : vector<8x128xf32>
    %c0_6 = arith.constant 0 : index
    %c0_7 = arith.constant 0 : index
    %9 = vector.load %arg8[%c0_6, %c0_7] : memref<8x128xf32, #tpu.memory_space<vmem>>, vector<8x128xf32>
    tpu.vector_store %arg8[%c0_6, %c0_7], %8 {strides = array<i32>} : memref<8x128xf32, #tpu.memory_space<vmem>>, vector<8x128xf32>,
    %c2_i32 = arith.constant 2 : i32
    %10 = arith.cmpi eq, %arg0, %c2_i32 : i32
    %11 = arith.extui %10 : i1 to i32
    %c0_i32_8 = arith.constant 0 : i32
    %12 = arith.cmpi ne, %11, %c0_i32_8 : i32
    scf.if %12 {
      %c0_9 = arith.constant 0 : index
      %c0_10 = arith.constant 0 : index
      %13 = vector.load %arg8[%c0_9, %c0_10] : memref<8x128xf32, #tpu.memory_space<vmem>>, vector<8x128xf32>
      %c0_11 = arith.constant 0 : index
      %c0_12 = arith.constant 0 : index
      %14 = vector.load %arg3[%c0_11, %c0_12] : memref<1x128xf32, #tpu.memory_space<vmem>>, vector<1x128xf32>
      %15 = vector.broadcast %14 : vector<1x128xf32> to vector<8x128xf32>
      %16 = arith.addf %13, %15 : vector<8x128xf32>
      %cst_13 = arith.constant 0.000000e+00 : f32
      %17 = vector.broadcast %cst_13 : f32 to vector<8x128xf32>
      %18 = arith.maximumf %16, %17 : vector<8x128xf32>
      %19 = arith.truncf %18 : vector<8x128xf32> to vector<8x128xbf16>
      %c0_14 = arith.constant 0 : index
      %c0_15 = arith.constant 0 : index
      %20 = vector.load %arg4[%c0_14, %c0_15] : memref<128x128xbf16, #tpu.memory_space<vmem>>, vector<128x128xbf16>
      %cst_16 = arith.constant dense<0.000000e+00> : vector<8x128xf32>
      %21 = tpu.matmul %19, %20, %cst_16 {dimension_numbers = #tpu.dot_dimension_numbers<[1], [0], [0], [1], [0, 0, 1, 1], [], []>} : vector<8x128xbf16>, vector<128x128xbf16>, vector<8x128xf32> -> vector<8x128xf32>
      %c0_17 = arith.constant 0 : index
      %c0_18 = arith.constant 0 : index
      %22 = vector.load %arg5[%c0_17, %c0_18] : memref<1x128xf32, #tpu.memory_space<vmem>>, vector<1x128xf32>
      %23 = vector.broadcast %22 : vector<1x128xf32> to vector<8x128xf32>
      %24 = arith.addf %21, %23 : vector<8x128xf32>
      %c0_19 = arith.constant 0 : index
      %c0_20 = arith.constant 0 : index
      %25 = vector.load %arg6[%c0_19, %c0_20] : memref<8x128xf32, #tpu.memory_space<vmem>>, vector<8x128xf32>
      %26 = arith.addf %24, %25 : vector<8x128xf32>
      %c0_21 = arith.constant 0 : index
      %c0_22 = arith.constant 0 : index
      %27 = vector.load %arg7[%c0_21, %c0_22] : memref<8x128xf32, #tpu.memory_space<vmem>>, vector<8x128xf32>
      tpu.vector_store %arg7[%c0_21, %c0_22], %26 {strides = array<i32>} : memref<8x128xf32, #tpu.memory_space<vmem>>, vector<8x128xf32>,
    } else {
    }
    return
  }
  func.func @transform_0(%arg0: i32) -> (i32, i32) {
    %c0_i32 = arith.constant 0 : i32
    %c0_i32_0 = arith.constant 0 : i32
    return %c0_i32, %arg0 : i32, i32
  }
  func.func @transform_1(%arg0: i32) -> (i32, i32) {
    %c0_i32 = arith.constant 0 : i32
    %c0_i32_0 = arith.constant 0 : i32
    return %arg0, %c0_i32 : i32, i32
  }
  func.func @transform_2(%arg0: i32) -> (i32, i32) {
    %c0_i32 = arith.constant 0 : i32
    %c0_i32_0 = arith.constant 0 : i32
    %c0_i32_1 = arith.constant 0 : i32
    return %c0_i32, %c0_i32_0 : i32, i32
  }
  func.func @transform_3(%arg0: i32) -> (i32, i32) {
    %c0_i32 = arith.constant 0 : i32
    %c0_i32_0 = arith.constant 0 : i32
    %c0_i32_1 = arith.constant 0 : i32
    return %c0_i32, %c0_i32_0 : i32, i32
  }
  func.func @transform_4(%arg0: i32) -> (i32, i32) {
    %c0_i32 = arith.constant 0 : i32
    %c0_i32_0 = arith.constant 0 : i32
    %c0_i32_1 = arith.constant 0 : i32
    return %c0_i32, %c0_i32_0 : i32, i32
  }
  func.func @transform_5(%arg0: i32) -> (i32, i32) {
    %c0_i32 = arith.constant 0 : i32
    %c0_i32_0 = arith.constant 0 : i32
    %c0_i32_1 = arith.constant 0 : i32
    return %c0_i32, %c0_i32_0 : i32, i32
  }
  func.func @transform_6(%arg0: i32) -> (i32, i32) {
    %c0_i32 = arith.constant 0 : i32
    %c0_i32_0 = arith.constant 0 : i32
    %c0_i32_1 = arith.constant 0 : i32
    return %c0_i32, %c0_i32_0 : i32, i32
  }
}

module attributes {stable_mosaic.version = 11 : i64} {
  func.func @_encoder_layer_kernel(%arg0: i32, %arg1: memref<1x4x128xf32, #tpu.memory_space<vmem>>, %arg2: memref<4x128x8xbf16, #tpu.memory_space<vmem>>, %arg3: memref<4x1x8xf32, #tpu.memory_space<vmem>>, %arg4: memref<4x128x8xbf16, #tpu.memory_space<vmem>>, %arg5: memref<4x1x8xf32, #tpu.memory_space<vmem>>, %arg6: memref<4x128x8xbf16, #tpu.memory_space<vmem>>, %arg7: memref<4x1x8xf32, #tpu.memory_space<vmem>>, %arg8: memref<4x8x128xbf16, #tpu.memory_space<vmem>>, %arg9: memref<1x128xf32, #tpu.memory_space<vmem>>, %arg10: memref<2x128xf32, #tpu.memory_space<vmem>>, %arg11: memref<128x128xbf16, #tpu.memory_space<vmem>>, %arg12: memref<1x128xf32, #tpu.memory_space<vmem>>, %arg13: memref<128x128xbf16, #tpu.memory_space<vmem>>, %arg14: memref<1x128xf32, #tpu.memory_space<vmem>>, %arg15: memref<2x128xf32, #tpu.memory_space<vmem>>, %arg16: memref<1x4x128xf32, #tpu.memory_space<vmem>>) attributes {dimension_semantics = [#tpu.dimension_semantics<parallel>], iteration_bounds = array<i64: 2>, scalar_prefetch = 0 : i64, scratch_operands = 0 : i64, tpu.core_type = #tpu.core_type<tc>, window_params = [{transform_indices = @transform_0, window_bounds = array<i64: 1, 4, 128>}, {pipeline_mode = #tpu.pipeline_mode<synchronous>, transform_indices = @transform_1, window_bounds = array<i64: 4, 128, 8>}, {pipeline_mode = #tpu.pipeline_mode<synchronous>, transform_indices = @transform_2, window_bounds = array<i64: 4, 1, 8>}, {pipeline_mode = #tpu.pipeline_mode<synchronous>, transform_indices = @transform_3, window_bounds = array<i64: 4, 128, 8>}, {pipeline_mode = #tpu.pipeline_mode<synchronous>, transform_indices = @transform_4, window_bounds = array<i64: 4, 1, 8>}, {pipeline_mode = #tpu.pipeline_mode<synchronous>, transform_indices = @transform_5, window_bounds = array<i64: 4, 128, 8>}, {pipeline_mode = #tpu.pipeline_mode<synchronous>, transform_indices = @transform_6, window_bounds = array<i64: 4, 1, 8>}, {pipeline_mode = #tpu.pipeline_mode<synchronous>, transform_indices = @transform_7, window_bounds = array<i64: 4, 8, 128>}, {pipeline_mode = #tpu.pipeline_mode<synchronous>, transform_indices = @transform_8, window_bounds = array<i64: 1, 128>}, {pipeline_mode = #tpu.pipeline_mode<synchronous>, transform_indices = @transform_9, window_bounds = array<i64: 2, 128>}, {pipeline_mode = #tpu.pipeline_mode<synchronous>, transform_indices = @transform_10, window_bounds = array<i64: 128, 128>}, {pipeline_mode = #tpu.pipeline_mode<synchronous>, transform_indices = @transform_11, window_bounds = array<i64: 1, 128>}, {pipeline_mode = #tpu.pipeline_mode<synchronous>, transform_indices = @transform_12, window_bounds = array<i64: 128, 128>}, {pipeline_mode = #tpu.pipeline_mode<synchronous>, transform_indices = @transform_13, window_bounds = array<i64: 1, 128>}, {pipeline_mode = #tpu.pipeline_mode<synchronous>, transform_indices = @transform_14, window_bounds = array<i64: 2, 128>}, {transform_indices = @transform_15, window_bounds = array<i64: 1, 4, 128>}]} {
    %c0 = arith.constant 0 : index
    %c0_0 = arith.constant 0 : index
    %c0_1 = arith.constant 0 : index
    %0 = vector.load %arg1[%c0, %c0_0, %c0_1] : memref<1x4x128xf32, #tpu.memory_space<vmem>>, vector<1x4x128xf32>
    %1 = vector.shape_cast %0 : vector<1x4x128xf32> to vector<4x128xf32>
    %c0_2 = arith.constant 0 : index
    %c0_3 = arith.constant 0 : index
    %c0_4 = arith.constant 0 : index
    %2 = vector.load %arg2[%c0_2, %c0_3, %c0_4] : memref<4x128x8xbf16, #tpu.memory_space<vmem>>, vector<4x128x8xbf16>
    %c0_5 = arith.constant 0 : index
    %c0_6 = arith.constant 0 : index
    %c0_7 = arith.constant 0 : index
    %3 = vector.load %arg3[%c0_5, %c0_6, %c0_7] : memref<4x1x8xf32, #tpu.memory_space<vmem>>, vector<4x1x8xf32>
    %c0_8 = arith.constant 0 : index
    %c0_9 = arith.constant 0 : index
    %c0_10 = arith.constant 0 : index
    %4 = vector.load %arg4[%c0_8, %c0_9, %c0_10] : memref<4x128x8xbf16, #tpu.memory_space<vmem>>, vector<4x128x8xbf16>
    %c0_11 = arith.constant 0 : index
    %c0_12 = arith.constant 0 : index
    %c0_13 = arith.constant 0 : index
    %5 = vector.load %arg5[%c0_11, %c0_12, %c0_13] : memref<4x1x8xf32, #tpu.memory_space<vmem>>, vector<4x1x8xf32>
    %c0_14 = arith.constant 0 : index
    %c0_15 = arith.constant 0 : index
    %c0_16 = arith.constant 0 : index
    %6 = vector.load %arg6[%c0_14, %c0_15, %c0_16] : memref<4x128x8xbf16, #tpu.memory_space<vmem>>, vector<4x128x8xbf16>
    %c0_17 = arith.constant 0 : index
    %c0_18 = arith.constant 0 : index
    %c0_19 = arith.constant 0 : index
    %7 = vector.load %arg7[%c0_17, %c0_18, %c0_19] : memref<4x1x8xf32, #tpu.memory_space<vmem>>, vector<4x1x8xf32>
    %c0_20 = arith.constant 0 : index
    %c0_21 = arith.constant 0 : index
    %c0_22 = arith.constant 0 : index
    %8 = vector.load %arg8[%c0_20, %c0_21, %c0_22] : memref<4x8x128xbf16, #tpu.memory_space<vmem>>, vector<4x8x128xbf16>
    %c0_23 = arith.constant 0 : index
    %c0_24 = arith.constant 0 : index
    %9 = vector.load %arg9[%c0_23, %c0_24] : memref<1x128xf32, #tpu.memory_space<vmem>>, vector<1x128xf32>
    %10 = arith.truncf %1 : vector<4x128xf32> to vector<4x128xbf16>
    %11 = vector.shape_cast %10 : vector<4x128xbf16> to vector<1x4x128xbf16>
    %12 = vector.shape_cast %11 : vector<1x4x128xbf16> to vector<1x4x128xbf16>
    %13 = vector.broadcast %12 : vector<1x4x128xbf16> to vector<4x4x128xbf16>
    %14 = arith.truncf %1 : vector<4x128xf32> to vector<4x128xbf16>
    %15 = vector.shape_cast %14 : vector<4x128xbf16> to vector<1x4x128xbf16>
    %16 = vector.shape_cast %15 : vector<1x4x128xbf16> to vector<1x4x128xbf16>
    %17 = vector.broadcast %16 : vector<1x4x128xbf16> to vector<4x4x128xbf16>
    "tpu.trace_start"() <{level = 10 : i32, message = "hld,hde->hle"}> : () -> ()
    %cst = arith.constant dense<0.000000e+00> : vector<4x4x8xf32>
    %18 = tpu.matmul %13, %2, %cst {dimension_numbers = #tpu.dot_dimension_numbers<[2], [1], [1], [2], [0, 0, 0, 1, 1, 2], [0], [0]>} : vector<4x4x128xbf16>, vector<4x128x8xbf16>, vector<4x4x8xf32> -> vector<4x4x8xf32>
    "tpu.trace_stop"() : () -> ()
    %19 = vector.broadcast %3 : vector<4x1x8xf32> to vector<4x4x8xf32>
    %20 = arith.addf %18, %19 : vector<4x4x8xf32>
    "tpu.trace_start"() <{level = 10 : i32, message = "hld,hde->hle"}> : () -> ()
    %cst_25 = arith.constant dense<0.000000e+00> : vector<4x4x8xf32>
    %21 = tpu.matmul %17, %4, %cst_25 {dimension_numbers = #tpu.dot_dimension_numbers<[2], [1], [1], [2], [0, 0, 0, 1, 1, 2], [0], [0]>} : vector<4x4x128xbf16>, vector<4x128x8xbf16>, vector<4x4x8xf32> -> vector<4x4x8xf32>
    "tpu.trace_stop"() : () -> ()
    %22 = vector.broadcast %5 : vector<4x1x8xf32> to vector<4x4x8xf32>
    %23 = arith.addf %21, %22 : vector<4x4x8xf32>
    "tpu.trace_start"() <{level = 10 : i32, message = "hld,hde->hle"}> : () -> ()
    %cst_26 = arith.constant dense<0.000000e+00> : vector<4x4x8xf32>
    %24 = tpu.matmul %17, %6, %cst_26 {dimension_numbers = #tpu.dot_dimension_numbers<[2], [1], [1], [2], [0, 0, 0, 1, 1, 2], [0], [0]>} : vector<4x4x128xbf16>, vector<4x128x8xbf16>, vector<4x4x8xf32> -> vector<4x4x8xf32>
    "tpu.trace_stop"() : () -> ()
    %25 = vector.broadcast %7 : vector<4x1x8xf32> to vector<4x4x8xf32>
    %26 = arith.addf %24, %25 : vector<4x4x8xf32>
    %27 = arith.truncf %20 : vector<4x4x8xf32> to vector<4x4x8xbf16>
    %28 = arith.truncf %23 : vector<4x4x8xf32> to vector<4x4x8xbf16>
    "tpu.trace_start"() <{level = 10 : i32, message = "hqe,hke->hqk"}> : () -> ()
    %cst_27 = arith.constant dense<0.000000e+00> : vector<4x4x4xf32>
    %29 = tpu.matmul %27, %28, %cst_27 {dimension_numbers = #tpu.dot_dimension_numbers<[2], [2], [1], [1], [0, 0, 0, 1, 1, 1], [0], [0]>} : vector<4x4x8xbf16>, vector<4x4x8xbf16>, vector<4x4x4xf32> -> vector<4x4x4xf32>
    "tpu.trace_stop"() : () -> ()
    %cst_28 = arith.constant dense<0xFF800000> : vector<4x4xf32>
    %30 = vector.multi_reduction <maximumf>, %29, %cst_28 [2] : vector<4x4x4xf32> to vector<4x4xf32>
    %31 = vector.shape_cast %30 : vector<4x4xf32> to vector<4x4x1xf32>
    %32 = vector.broadcast %31 : vector<4x4x1xf32> to vector<4x4x4xf32>
    %33 = arith.subf %29, %32 : vector<4x4x4xf32>
    %34 = math.exp %33 : vector<4x4x4xf32>
    %cst_29 = arith.constant dense<0.000000e+00> : vector<4x4xf32>
    %35 = vector.multi_reduction <add>, %34, %cst_29 [2] : vector<4x4x4xf32> to vector<4x4xf32>
    %36 = vector.shape_cast %35 : vector<4x4xf32> to vector<4x4x1xf32>
    %37 = vector.broadcast %36 : vector<4x4x1xf32> to vector<4x4x4xf32>
    %38 = arith.divf %34, %37 : vector<4x4x4xf32>
    %39 = arith.truncf %38 : vector<4x4x4xf32> to vector<4x4x4xbf16>
    %40 = arith.truncf %26 : vector<4x4x8xf32> to vector<4x4x8xbf16>
    "tpu.trace_start"() <{level = 10 : i32, message = "hqk,hke->hqe"}> : () -> ()
    %cst_30 = arith.constant dense<0.000000e+00> : vector<4x4x8xf32>
    %41 = tpu.matmul %39, %40, %cst_30 {dimension_numbers = #tpu.dot_dimension_numbers<[2], [1], [1], [2], [0, 0, 0, 1, 1, 2], [0], [0]>} : vector<4x4x4xbf16>, vector<4x4x8xbf16>, vector<4x4x8xf32> -> vector<4x4x8xf32>
    "tpu.trace_stop"() : () -> ()
    %42 = arith.truncf %41 : vector<4x4x8xf32> to vector<4x4x8xbf16>
    "tpu.trace_start"() <{level = 10 : i32, message = "hqe,hed->hqd"}> : () -> ()
    %cst_31 = arith.constant dense<0.000000e+00> : vector<4x4x128xf32>
    %43 = tpu.matmul %42, %8, %cst_31 {dimension_numbers = #tpu.dot_dimension_numbers<[2], [1], [1], [2], [0, 0, 0, 1, 1, 2], [0], [0]>} : vector<4x4x8xbf16>, vector<4x8x128xbf16>, vector<4x4x128xf32> -> vector<4x4x128xf32>
    "tpu.trace_stop"() : () -> ()
    %cst_32 = arith.constant dense<0.000000e+00> : vector<4x128xf32>
    %44 = vector.multi_reduction <add>, %43, %cst_32 [0] : vector<4x4x128xf32> to vector<4x128xf32>
    %45 = vector.broadcast %9 : vector<1x128xf32> to vector<4x128xf32>
    %46 = arith.addf %44, %45 : vector<4x128xf32>
    %c0_33 = arith.constant 0 : index
    %c0_34 = arith.constant 0 : index
    %47 = vector.load %arg10[%c0_33, %c0_34] : memref<2x128xf32, #tpu.memory_space<vmem>>, vector<2x128xf32>
    %48 = arith.addf %1, %46 : vector<4x128xf32>
    %cst_35 = arith.constant dense<0.000000e+00> : vector<4xf32>
    %49 = vector.multi_reduction <add>, %48, %cst_35 [1] : vector<4x128xf32> to vector<4xf32>
    %50 = vector.shape_cast %49 : vector<4xf32> to vector<4x1xf32>
    %cst_36 = arith.constant 3.125000e-02 : f32
    %51 = vector.broadcast %cst_36 : f32 to vector<4x1xf32>
    %52 = arith.mulf %50, %51 : vector<4x1xf32>
    %53 = arith.mulf %48, %48 : vector<4x128xf32>
    %cst_37 = arith.constant dense<0.000000e+00> : vector<4xf32>
    %54 = vector.multi_reduction <add>, %53, %cst_37 [1] : vector<4x128xf32> to vector<4xf32>
    %55 = vector.shape_cast %54 : vector<4xf32> to vector<4x1xf32>
    %cst_38 = arith.constant 3.125000e-02 : f32
    %56 = vector.broadcast %cst_38 : f32 to vector<4x1xf32>
    %57 = arith.mulf %55, %56 : vector<4x1xf32>
    %58 = arith.mulf %52, %52 : vector<4x1xf32>
    %59 = arith.subf %57, %58 : vector<4x1xf32>
    %60 = vector.broadcast %52 : vector<4x1xf32> to vector<4x128xf32>
    %61 = arith.subf %48, %60 : vector<4x128xf32>
    %cst_39 = arith.constant 9.99999974E-6 : f32
    %62 = vector.broadcast %cst_39 : f32 to vector<4x1xf32>
    %63 = arith.addf %59, %62 : vector<4x1xf32>
    %64 = math.rsqrt %63 : vector<4x1xf32>
    %65 = vector.broadcast %64 : vector<4x1xf32> to vector<4x128xf32>
    %66 = arith.mulf %61, %65 : vector<4x128xf32>
    %67 = vector.extract_strided_slice %47 {offsets = [0, 0], sizes = [1, 128], strides = [1, 1]} : vector<2x128xf32> to vector<1x128xf32>
    %68 = vector.broadcast %67 : vector<1x128xf32> to vector<4x128xf32>
    %69 = arith.mulf %66, %68 : vector<4x128xf32>
    %70 = vector.extract_strided_slice %47 {offsets = [1, 0], sizes = [1, 128], strides = [1, 1]} : vector<2x128xf32> to vector<1x128xf32>
    %71 = vector.broadcast %70 : vector<1x128xf32> to vector<4x128xf32>
    %72 = arith.addf %69, %71 : vector<4x128xf32>
    %c0_40 = arith.constant 0 : index
    %c0_41 = arith.constant 0 : index
    %73 = vector.load %arg11[%c0_40, %c0_41] : memref<128x128xbf16, #tpu.memory_space<vmem>>, vector<128x128xbf16>
    %c0_42 = arith.constant 0 : index
    %c0_43 = arith.constant 0 : index
    %74 = vector.load %arg12[%c0_42, %c0_43] : memref<1x128xf32, #tpu.memory_space<vmem>>, vector<1x128xf32>
    %c0_44 = arith.constant 0 : index
    %c0_45 = arith.constant 0 : index
    %75 = vector.load %arg13[%c0_44, %c0_45] : memref<128x128xbf16, #tpu.memory_space<vmem>>, vector<128x128xbf16>
    %c0_46 = arith.constant 0 : index
    %c0_47 = arith.constant 0 : index
    %76 = vector.load %arg14[%c0_46, %c0_47] : memref<1x128xf32, #tpu.memory_space<vmem>>, vector<1x128xf32>
    %77 = arith.truncf %72 : vector<4x128xf32> to vector<4x128xbf16>
    %cst_48 = arith.constant dense<0.000000e+00> : vector<4x128xf32>
    %78 = tpu.matmul %77, %73, %cst_48 {dimension_numbers = #tpu.dot_dimension_numbers<[1], [0], [0], [1], [0, 0, 1, 1], [], []>} : vector<4x128xbf16>, vector<128x128xbf16>, vector<4x128xf32> -> vector<4x128xf32>
    %79 = vector.broadcast %74 : vector<1x128xf32> to vector<4x128xf32>
    %80 = arith.addf %78, %79 : vector<4x128xf32>
    %cst_49 = arith.constant 0.000000e+00 : f32
    %81 = vector.broadcast %cst_49 : f32 to vector<4x128xf32>
    %82 = arith.maximumf %80, %81 : vector<4x128xf32>
    %83 = arith.truncf %82 : vector<4x128xf32> to vector<4x128xbf16>
    %cst_50 = arith.constant dense<0.000000e+00> : vector<4x128xf32>
    %84 = tpu.matmul %83, %75, %cst_50 {dimension_numbers = #tpu.dot_dimension_numbers<[1], [0], [0], [1], [0, 0, 1, 1], [], []>} : vector<4x128xbf16>, vector<128x128xbf16>, vector<4x128xf32> -> vector<4x128xf32>
    %85 = vector.broadcast %76 : vector<1x128xf32> to vector<4x128xf32>
    %86 = arith.addf %84, %85 : vector<4x128xf32>
    %c0_51 = arith.constant 0 : index
    %c0_52 = arith.constant 0 : index
    %87 = vector.load %arg15[%c0_51, %c0_52] : memref<2x128xf32, #tpu.memory_space<vmem>>, vector<2x128xf32>
    %88 = arith.addf %72, %86 : vector<4x128xf32>
    %cst_53 = arith.constant dense<0.000000e+00> : vector<4xf32>
    %89 = vector.multi_reduction <add>, %88, %cst_53 [1] : vector<4x128xf32> to vector<4xf32>
    %90 = vector.shape_cast %89 : vector<4xf32> to vector<4x1xf32>
    %cst_54 = arith.constant 3.125000e-02 : f32
    %91 = vector.broadcast %cst_54 : f32 to vector<4x1xf32>
    %92 = arith.mulf %90, %91 : vector<4x1xf32>
    %93 = arith.mulf %88, %88 : vector<4x128xf32>
    %cst_55 = arith.constant dense<0.000000e+00> : vector<4xf32>
    %94 = vector.multi_reduction <add>, %93, %cst_55 [1] : vector<4x128xf32> to vector<4xf32>
    %95 = vector.shape_cast %94 : vector<4xf32> to vector<4x1xf32>
    %cst_56 = arith.constant 3.125000e-02 : f32
    %96 = vector.broadcast %cst_56 : f32 to vector<4x1xf32>
    %97 = arith.mulf %95, %96 : vector<4x1xf32>
    %98 = arith.mulf %92, %92 : vector<4x1xf32>
    %99 = arith.subf %97, %98 : vector<4x1xf32>
    %100 = vector.broadcast %92 : vector<4x1xf32> to vector<4x128xf32>
    %101 = arith.subf %88, %100 : vector<4x128xf32>
    %cst_57 = arith.constant 9.99999974E-6 : f32
    %102 = vector.broadcast %cst_57 : f32 to vector<4x1xf32>
    %103 = arith.addf %99, %102 : vector<4x1xf32>
    %104 = math.rsqrt %103 : vector<4x1xf32>
    %105 = vector.broadcast %104 : vector<4x1xf32> to vector<4x128xf32>
    %106 = arith.mulf %101, %105 : vector<4x128xf32>
    %107 = vector.extract_strided_slice %87 {offsets = [0, 0], sizes = [1, 128], strides = [1, 1]} : vector<2x128xf32> to vector<1x128xf32>
    %108 = vector.broadcast %107 : vector<1x128xf32> to vector<4x128xf32>
    %109 = arith.mulf %106, %108 : vector<4x128xf32>
    %110 = vector.extract_strided_slice %87 {offsets = [1, 0], sizes = [1, 128], strides = [1, 1]} : vector<2x128xf32> to vector<1x128xf32>
    %111 = vector.broadcast %110 : vector<1x128xf32> to vector<4x128xf32>
    %112 = arith.addf %109, %111 : vector<4x128xf32>
    %c0_58 = arith.constant 0 : index
    %c0_59 = arith.constant 0 : index
    %c0_60 = arith.constant 0 : index
    %113 = vector.load %arg16[%c0_58, %c0_59, %c0_60] : memref<1x4x128xf32, #tpu.memory_space<vmem>>, vector<1x4x128xf32>
    %114 = vector.shape_cast %113 : vector<1x4x128xf32> to vector<4x128xf32>
    %115 = vector.shape_cast %112 : vector<4x128xf32> to vector<1x4x128xf32>
    tpu.vector_store %arg16[%c0_58, %c0_59, %c0_60], %115 {strides = array<i32>} : memref<1x4x128xf32, #tpu.memory_space<vmem>>, vector<1x4x128xf32>,
    return
  }
  func.func @transform_0(%arg0: i32) -> (i32, i32, i32) {
    %c0_i32 = arith.constant 0 : i32
    %c0_i32_0 = arith.constant 0 : i32
    %c0_i32_1 = arith.constant 0 : i32
    return %arg0, %c0_i32, %c0_i32_0 : i32, i32, i32
  }
  func.func @transform_1(%arg0: i32) -> (i32, i32, i32) {
    %c0_i32 = arith.constant 0 : i32
    %c0_i32_0 = arith.constant 0 : i32
    %c0_i32_1 = arith.constant 0 : i32
    %c0_i32_2 = arith.constant 0 : i32
    return %c0_i32, %c0_i32_0, %c0_i32_1 : i32, i32, i32
  }
  func.func @transform_2(%arg0: i32) -> (i32, i32, i32) {
    %c0_i32 = arith.constant 0 : i32
    %c0_i32_0 = arith.constant 0 : i32
    %c0_i32_1 = arith.constant 0 : i32
    %c0_i32_2 = arith.constant 0 : i32
    return %c0_i32, %c0_i32_0, %c0_i32_1 : i32, i32, i32
  }
  func.func @transform_3(%arg0: i32) -> (i32, i32, i32) {
    %c0_i32 = arith.constant 0 : i32
    %c0_i32_0 = arith.constant 0 : i32
    %c0_i32_1 = arith.constant 0 : i32
    %c0_i32_2 = arith.constant 0 : i32
    return %c0_i32, %c0_i32_0, %c0_i32_1 : i32, i32, i32
  }
  func.func @transform_4(%arg0: i32) -> (i32, i32, i32) {
    %c0_i32 = arith.constant 0 : i32
    %c0_i32_0 = arith.constant 0 : i32
    %c0_i32_1 = arith.constant 0 : i32
    %c0_i32_2 = arith.constant 0 : i32
    return %c0_i32, %c0_i32_0, %c0_i32_1 : i32, i32, i32
  }
  func.func @transform_5(%arg0: i32) -> (i32, i32, i32) {
    %c0_i32 = arith.constant 0 : i32
    %c0_i32_0 = arith.constant 0 : i32
    %c0_i32_1 = arith.constant 0 : i32
    %c0_i32_2 = arith.constant 0 : i32
    return %c0_i32, %c0_i32_0, %c0_i32_1 : i32, i32, i32
  }
  func.func @transform_6(%arg0: i32) -> (i32, i32, i32) {
    %c0_i32 = arith.constant 0 : i32
    %c0_i32_0 = arith.constant 0 : i32
    %c0_i32_1 = arith.constant 0 : i32
    %c0_i32_2 = arith.constant 0 : i32
    return %c0_i32, %c0_i32_0, %c0_i32_1 : i32, i32, i32
  }
  func.func @transform_7(%arg0: i32) -> (i32, i32, i32) {
    %c0_i32 = arith.constant 0 : i32
    %c0_i32_0 = arith.constant 0 : i32
    %c0_i32_1 = arith.constant 0 : i32
    %c0_i32_2 = arith.constant 0 : i32
    return %c0_i32, %c0_i32_0, %c0_i32_1 : i32, i32, i32
  }
  func.func @transform_8(%arg0: i32) -> (i32, i32) {
    %c0_i32 = arith.constant 0 : i32
    %c0_i32_0 = arith.constant 0 : i32
    %c0_i32_1 = arith.constant 0 : i32
    return %c0_i32, %c0_i32_0 : i32, i32
  }
  func.func @transform_9(%arg0: i32) -> (i32, i32) {
    %c0_i32 = arith.constant 0 : i32
    %c0_i32_0 = arith.constant 0 : i32
    %c0_i32_1 = arith.constant 0 : i32
    return %c0_i32, %c0_i32_0 : i32, i32
  }
  func.func @transform_10(%arg0: i32) -> (i32, i32) {
    %c0_i32 = arith.constant 0 : i32
    %c0_i32_0 = arith.constant 0 : i32
    %c0_i32_1 = arith.constant 0 : i32
    return %c0_i32, %c0_i32_0 : i32, i32
  }
  func.func @transform_11(%arg0: i32) -> (i32, i32) {
    %c0_i32 = arith.constant 0 : i32
    %c0_i32_0 = arith.constant 0 : i32
    %c0_i32_1 = arith.constant 0 : i32
    return %c0_i32, %c0_i32_0 : i32, i32
  }
  func.func @transform_12(%arg0: i32) -> (i32, i32) {
    %c0_i32 = arith.constant 0 : i32
    %c0_i32_0 = arith.constant 0 : i32
    %c0_i32_1 = arith.constant 0 : i32
    return %c0_i32, %c0_i32_0 : i32, i32
  }
  func.func @transform_13(%arg0: i32) -> (i32, i32) {
    %c0_i32 = arith.constant 0 : i32
    %c0_i32_0 = arith.constant 0 : i32
    %c0_i32_1 = arith.constant 0 : i32
    return %c0_i32, %c0_i32_0 : i32, i32
  }
  func.func @transform_14(%arg0: i32) -> (i32, i32) {
    %c0_i32 = arith.constant 0 : i32
    %c0_i32_0 = arith.constant 0 : i32
    %c0_i32_1 = arith.constant 0 : i32
    return %c0_i32, %c0_i32_0 : i32, i32
  }
  func.func @transform_15(%arg0: i32) -> (i32, i32, i32) {
    %c0_i32 = arith.constant 0 : i32
    %c0_i32_0 = arith.constant 0 : i32
    %c0_i32_1 = arith.constant 0 : i32
    return %arg0, %c0_i32, %c0_i32_0 : i32, i32, i32
  }
}

module attributes {stable_mosaic.version = 11 : i64} {
  func.func @_decoder_layer_kernel(%arg0: i32, %arg1: memref<1x8x128xf32, #tpu.memory_space<vmem>>, %arg2: memref<1x4x128xf32, #tpu.memory_space<vmem>>, %arg3: memref<4x128x8xbf16, #tpu.memory_space<vmem>>, %arg4: memref<4x1x8xf32, #tpu.memory_space<vmem>>, %arg5: memref<4x128x8xbf16, #tpu.memory_space<vmem>>, %arg6: memref<4x1x8xf32, #tpu.memory_space<vmem>>, %arg7: memref<4x128x8xbf16, #tpu.memory_space<vmem>>, %arg8: memref<4x1x8xf32, #tpu.memory_space<vmem>>, %arg9: memref<4x8x128xbf16, #tpu.memory_space<vmem>>, %arg10: memref<1x128xf32, #tpu.memory_space<vmem>>, %arg11: memref<2x128xf32, #tpu.memory_space<vmem>>, %arg12: memref<4x128x8xbf16, #tpu.memory_space<vmem>>, %arg13: memref<4x1x8xf32, #tpu.memory_space<vmem>>, %arg14: memref<4x128x8xbf16, #tpu.memory_space<vmem>>, %arg15: memref<4x1x8xf32, #tpu.memory_space<vmem>>, %arg16: memref<4x128x8xbf16, #tpu.memory_space<vmem>>, %arg17: memref<4x1x8xf32, #tpu.memory_space<vmem>>, %arg18: memref<4x8x128xbf16, #tpu.memory_space<vmem>>, %arg19: memref<1x128xf32, #tpu.memory_space<vmem>>, %arg20: memref<2x128xf32, #tpu.memory_space<vmem>>, %arg21: memref<128x128xbf16, #tpu.memory_space<vmem>>, %arg22: memref<1x128xf32, #tpu.memory_space<vmem>>, %arg23: memref<128x128xbf16, #tpu.memory_space<vmem>>, %arg24: memref<1x128xf32, #tpu.memory_space<vmem>>, %arg25: memref<2x128xf32, #tpu.memory_space<vmem>>, %arg26: memref<1x8x128xf32, #tpu.memory_space<vmem>>) attributes {dimension_semantics = [#tpu.dimension_semantics<parallel>], iteration_bounds = array<i64: 2>, scalar_prefetch = 0 : i64, scratch_operands = 0 : i64, tpu.core_type = #tpu.core_type<tc>, window_params = [{transform_indices = @transform_0, window_bounds = array<i64: 1, 8, 128>}, {transform_indices = @transform_1, window_bounds = array<i64: 1, 4, 128>}, {pipeline_mode = #tpu.pipeline_mode<synchronous>, transform_indices = @transform_2, window_bounds = array<i64: 4, 128, 8>}, {pipeline_mode = #tpu.pipeline_mode<synchronous>, transform_indices = @transform_3, window_bounds = array<i64: 4, 1, 8>}, {pipeline_mode = #tpu.pipeline_mode<synchronous>, transform_indices = @transform_4, window_bounds = array<i64: 4, 128, 8>}, {pipeline_mode = #tpu.pipeline_mode<synchronous>, transform_indices = @transform_5, window_bounds = array<i64: 4, 1, 8>}, {pipeline_mode = #tpu.pipeline_mode<synchronous>, transform_indices = @transform_6, window_bounds = array<i64: 4, 128, 8>}, {pipeline_mode = #tpu.pipeline_mode<synchronous>, transform_indices = @transform_7, window_bounds = array<i64: 4, 1, 8>}, {pipeline_mode = #tpu.pipeline_mode<synchronous>, transform_indices = @transform_8, window_bounds = array<i64: 4, 8, 128>}, {pipeline_mode = #tpu.pipeline_mode<synchronous>, transform_indices = @transform_9, window_bounds = array<i64: 1, 128>}, {pipeline_mode = #tpu.pipeline_mode<synchronous>, transform_indices = @transform_10, window_bounds = array<i64: 2, 128>}, {pipeline_mode = #tpu.pipeline_mode<synchronous>, transform_indices = @transform_11, window_bounds = array<i64: 4, 128, 8>}, {pipeline_mode = #tpu.pipeline_mode<synchronous>, transform_indices = @transform_12, window_bounds = array<i64: 4, 1, 8>}, {pipeline_mode = #tpu.pipeline_mode<synchronous>, transform_indices = @transform_13, window_bounds = array<i64: 4, 128, 8>}, {pipeline_mode = #tpu.pipeline_mode<synchronous>, transform_indices = @transform_14, window_bounds = array<i64: 4, 1, 8>}, {pipeline_mode = #tpu.pipeline_mode<synchronous>, transform_indices = @transform_15, window_bounds = array<i64: 4, 128, 8>}, {pipeline_mode = #tpu.pipeline_mode<synchronous>, transform_indices = @transform_16, window_bounds = array<i64: 4, 1, 8>}, {pipeline_mode = #tpu.pipeline_mode<synchronous>, transform_indices = @transform_17, window_bounds = array<i64: 4, 8, 128>}, {pipeline_mode = #tpu.pipeline_mode<synchronous>, transform_indices = @transform_18, window_bounds = array<i64: 1, 128>}, {pipeline_mode = #tpu.pipeline_mode<synchronous>, transform_indices = @transform_19, window_bounds = array<i64: 2, 128>}, {pipeline_mode = #tpu.pipeline_mode<synchronous>, transform_indices = @transform_20, window_bounds = array<i64: 128, 128>}, {pipeline_mode = #tpu.pipeline_mode<synchronous>, transform_indices = @transform_21, window_bounds = array<i64: 1, 128>}, {pipeline_mode = #tpu.pipeline_mode<synchronous>, transform_indices = @transform_22, window_bounds = array<i64: 128, 128>}, {pipeline_mode = #tpu.pipeline_mode<synchronous>, transform_indices = @transform_23, window_bounds = array<i64: 1, 128>}, {pipeline_mode = #tpu.pipeline_mode<synchronous>, transform_indices = @transform_24, window_bounds = array<i64: 2, 128>}, {transform_indices = @transform_25, window_bounds = array<i64: 1, 8, 128>}]} {
    %c0 = arith.constant 0 : index
    %c0_0 = arith.constant 0 : index
    %c0_1 = arith.constant 0 : index
    %0 = vector.load %arg1[%c0, %c0_0, %c0_1] : memref<1x8x128xf32, #tpu.memory_space<vmem>>, vector<1x8x128xf32>
    %1 = vector.shape_cast %0 : vector<1x8x128xf32> to vector<8x128xf32>
    %c0_2 = arith.constant 0 : index
    %c0_3 = arith.constant 0 : index
    %c0_4 = arith.constant 0 : index
    %2 = vector.load %arg2[%c0_2, %c0_3, %c0_4] : memref<1x4x128xf32, #tpu.memory_space<vmem>>, vector<1x4x128xf32>
    %3 = vector.shape_cast %2 : vector<1x4x128xf32> to vector<4x128xf32>
    %c0_5 = arith.constant 0 : index
    %c0_6 = arith.constant 0 : index
    %c0_7 = arith.constant 0 : index
    %4 = vector.load %arg3[%c0_5, %c0_6, %c0_7] : memref<4x128x8xbf16, #tpu.memory_space<vmem>>, vector<4x128x8xbf16>
    %c0_8 = arith.constant 0 : index
    %c0_9 = arith.constant 0 : index
    %c0_10 = arith.constant 0 : index
    %5 = vector.load %arg4[%c0_8, %c0_9, %c0_10] : memref<4x1x8xf32, #tpu.memory_space<vmem>>, vector<4x1x8xf32>
    %c0_11 = arith.constant 0 : index
    %c0_12 = arith.constant 0 : index
    %c0_13 = arith.constant 0 : index
    %6 = vector.load %arg5[%c0_11, %c0_12, %c0_13] : memref<4x128x8xbf16, #tpu.memory_space<vmem>>, vector<4x128x8xbf16>
    %c0_14 = arith.constant 0 : index
    %c0_15 = arith.constant 0 : index
    %c0_16 = arith.constant 0 : index
    %7 = vector.load %arg6[%c0_14, %c0_15, %c0_16] : memref<4x1x8xf32, #tpu.memory_space<vmem>>, vector<4x1x8xf32>
    %c0_17 = arith.constant 0 : index
    %c0_18 = arith.constant 0 : index
    %c0_19 = arith.constant 0 : index
    %8 = vector.load %arg7[%c0_17, %c0_18, %c0_19] : memref<4x128x8xbf16, #tpu.memory_space<vmem>>, vector<4x128x8xbf16>
    %c0_20 = arith.constant 0 : index
    %c0_21 = arith.constant 0 : index
    %c0_22 = arith.constant 0 : index
    %9 = vector.load %arg8[%c0_20, %c0_21, %c0_22] : memref<4x1x8xf32, #tpu.memory_space<vmem>>, vector<4x1x8xf32>
    %c0_23 = arith.constant 0 : index
    %c0_24 = arith.constant 0 : index
    %c0_25 = arith.constant 0 : index
    %10 = vector.load %arg9[%c0_23, %c0_24, %c0_25] : memref<4x8x128xbf16, #tpu.memory_space<vmem>>, vector<4x8x128xbf16>
    %c0_26 = arith.constant 0 : index
    %c0_27 = arith.constant 0 : index
    %11 = vector.load %arg10[%c0_26, %c0_27] : memref<1x128xf32, #tpu.memory_space<vmem>>, vector<1x128xf32>
    %12 = arith.truncf %1 : vector<8x128xf32> to vector<8x128xbf16>
    %13 = vector.shape_cast %12 : vector<8x128xbf16> to vector<1x8x128xbf16>
    %14 = vector.shape_cast %13 : vector<1x8x128xbf16> to vector<1x8x128xbf16>
    %15 = vector.broadcast %14 : vector<1x8x128xbf16> to vector<4x8x128xbf16>
    %16 = arith.truncf %1 : vector<8x128xf32> to vector<8x128xbf16>
    %17 = vector.shape_cast %16 : vector<8x128xbf16> to vector<1x8x128xbf16>
    %18 = vector.shape_cast %17 : vector<1x8x128xbf16> to vector<1x8x128xbf16>
    %19 = vector.broadcast %18 : vector<1x8x128xbf16> to vector<4x8x128xbf16>
    "tpu.trace_start"() <{level = 10 : i32, message = "hld,hde->hle"}> : () -> ()
    %cst = arith.constant dense<0.000000e+00> : vector<4x8x8xf32>
    %20 = tpu.matmul %15, %4, %cst {dimension_numbers = #tpu.dot_dimension_numbers<[2], [1], [1], [2], [0, 0, 0, 1, 1, 2], [0], [0]>} : vector<4x8x128xbf16>, vector<4x128x8xbf16>, vector<4x8x8xf32> -> vector<4x8x8xf32>
    "tpu.trace_stop"() : () -> ()
    %21 = vector.broadcast %5 : vector<4x1x8xf32> to vector<4x8x8xf32>
    %22 = arith.addf %20, %21 : vector<4x8x8xf32>
    "tpu.trace_start"() <{level = 10 : i32, message = "hld,hde->hle"}> : () -> ()
    %cst_28 = arith.constant dense<0.000000e+00> : vector<4x8x8xf32>
    %23 = tpu.matmul %19, %6, %cst_28 {dimension_numbers = #tpu.dot_dimension_numbers<[2], [1], [1], [2], [0, 0, 0, 1, 1, 2], [0], [0]>} : vector<4x8x128xbf16>, vector<4x128x8xbf16>, vector<4x8x8xf32> -> vector<4x8x8xf32>
    "tpu.trace_stop"() : () -> ()
    %24 = vector.broadcast %7 : vector<4x1x8xf32> to vector<4x8x8xf32>
    %25 = arith.addf %23, %24 : vector<4x8x8xf32>
    "tpu.trace_start"() <{level = 10 : i32, message = "hld,hde->hle"}> : () -> ()
    %cst_29 = arith.constant dense<0.000000e+00> : vector<4x8x8xf32>
    %26 = tpu.matmul %19, %8, %cst_29 {dimension_numbers = #tpu.dot_dimension_numbers<[2], [1], [1], [2], [0, 0, 0, 1, 1, 2], [0], [0]>} : vector<4x8x128xbf16>, vector<4x128x8xbf16>, vector<4x8x8xf32> -> vector<4x8x8xf32>
    "tpu.trace_stop"() : () -> ()
    %27 = vector.broadcast %9 : vector<4x1x8xf32> to vector<4x8x8xf32>
    %28 = arith.addf %26, %27 : vector<4x8x8xf32>
    %29 = arith.truncf %22 : vector<4x8x8xf32> to vector<4x8x8xbf16>
    %30 = arith.truncf %25 : vector<4x8x8xf32> to vector<4x8x8xbf16>
    "tpu.trace_start"() <{level = 10 : i32, message = "hqe,hke->hqk"}> : () -> ()
    %cst_30 = arith.constant dense<0.000000e+00> : vector<4x8x8xf32>
    %31 = tpu.matmul %29, %30, %cst_30 {dimension_numbers = #tpu.dot_dimension_numbers<[2], [2], [1], [1], [0, 0, 0, 1, 1, 1], [0], [0]>} : vector<4x8x8xbf16>, vector<4x8x8xbf16>, vector<4x8x8xf32> -> vector<4x8x8xf32>
    "tpu.trace_stop"() : () -> ()
    %cst_31 = arith.constant dense<0xFF800000> : vector<4x8xf32>
    %32 = vector.multi_reduction <maximumf>, %31, %cst_31 [2] : vector<4x8x8xf32> to vector<4x8xf32>
    %33 = vector.shape_cast %32 : vector<4x8xf32> to vector<4x8x1xf32>
    %34 = vector.broadcast %33 : vector<4x8x1xf32> to vector<4x8x8xf32>
    %35 = arith.subf %31, %34 : vector<4x8x8xf32>
    %36 = math.exp %35 : vector<4x8x8xf32>
    %cst_32 = arith.constant dense<0.000000e+00> : vector<4x8xf32>
    %37 = vector.multi_reduction <add>, %36, %cst_32 [2] : vector<4x8x8xf32> to vector<4x8xf32>
    %38 = vector.shape_cast %37 : vector<4x8xf32> to vector<4x8x1xf32>
    %39 = vector.broadcast %38 : vector<4x8x1xf32> to vector<4x8x8xf32>
    %40 = arith.divf %36, %39 : vector<4x8x8xf32>
    %41 = arith.truncf %40 : vector<4x8x8xf32> to vector<4x8x8xbf16>
    %42 = arith.truncf %28 : vector<4x8x8xf32> to vector<4x8x8xbf16>
    "tpu.trace_start"() <{level = 10 : i32, message = "hqk,hke->hqe"}> : () -> ()
    %cst_33 = arith.constant dense<0.000000e+00> : vector<4x8x8xf32>
    %43 = tpu.matmul %41, %42, %cst_33 {dimension_numbers = #tpu.dot_dimension_numbers<[2], [1], [1], [2], [0, 0, 0, 1, 1, 2], [0], [0]>} : vector<4x8x8xbf16>, vector<4x8x8xbf16>, vector<4x8x8xf32> -> vector<4x8x8xf32>
    "tpu.trace_stop"() : () -> ()
    %44 = arith.truncf %43 : vector<4x8x8xf32> to vector<4x8x8xbf16>
    "tpu.trace_start"() <{level = 10 : i32, message = "hqe,hed->hqd"}> : () -> ()
    %cst_34 = arith.constant dense<0.000000e+00> : vector<4x8x128xf32>
    %45 = tpu.matmul %44, %10, %cst_34 {dimension_numbers = #tpu.dot_dimension_numbers<[2], [1], [1], [2], [0, 0, 0, 1, 1, 2], [0], [0]>} : vector<4x8x8xbf16>, vector<4x8x128xbf16>, vector<4x8x128xf32> -> vector<4x8x128xf32>
    "tpu.trace_stop"() : () -> ()
    %cst_35 = arith.constant dense<0.000000e+00> : vector<8x128xf32>
    %46 = vector.multi_reduction <add>, %45, %cst_35 [0] : vector<4x8x128xf32> to vector<8x128xf32>
    %47 = vector.broadcast %11 : vector<1x128xf32> to vector<8x128xf32>
    %48 = arith.addf %46, %47 : vector<8x128xf32>
    %c0_36 = arith.constant 0 : index
    %c0_37 = arith.constant 0 : index
    %49 = vector.load %arg11[%c0_36, %c0_37] : memref<2x128xf32, #tpu.memory_space<vmem>>, vector<2x128xf32>
    %50 = arith.addf %1, %48 : vector<8x128xf32>
    %cst_38 = arith.constant dense<0.000000e+00> : vector<8xf32>
    %51 = vector.multi_reduction <add>, %50, %cst_38 [1] : vector<8x128xf32> to vector<8xf32>
    %52 = vector.shape_cast %51 : vector<8xf32> to vector<8x1xf32>
    %cst_39 = arith.constant 3.125000e-02 : f32
    %53 = vector.broadcast %cst_39 : f32 to vector<8x1xf32>
    %54 = arith.mulf %52, %53 : vector<8x1xf32>
    %55 = arith.mulf %50, %50 : vector<8x128xf32>
    %cst_40 = arith.constant dense<0.000000e+00> : vector<8xf32>
    %56 = vector.multi_reduction <add>, %55, %cst_40 [1] : vector<8x128xf32> to vector<8xf32>
    %57 = vector.shape_cast %56 : vector<8xf32> to vector<8x1xf32>
    %cst_41 = arith.constant 3.125000e-02 : f32
    %58 = vector.broadcast %cst_41 : f32 to vector<8x1xf32>
    %59 = arith.mulf %57, %58 : vector<8x1xf32>
    %60 = arith.mulf %54, %54 : vector<8x1xf32>
    %61 = arith.subf %59, %60 : vector<8x1xf32>
    %62 = vector.broadcast %54 : vector<8x1xf32> to vector<8x128xf32>
    %63 = arith.subf %50, %62 : vector<8x128xf32>
    %cst_42 = arith.constant 9.99999974E-6 : f32
    %64 = vector.broadcast %cst_42 : f32 to vector<8x1xf32>
    %65 = arith.addf %61, %64 : vector<8x1xf32>
    %66 = math.rsqrt %65 : vector<8x1xf32>
    %67 = vector.broadcast %66 : vector<8x1xf32> to vector<8x128xf32>
    %68 = arith.mulf %63, %67 : vector<8x128xf32>
    %69 = vector.extract_strided_slice %49 {offsets = [0, 0], sizes = [1, 128], strides = [1, 1]} : vector<2x128xf32> to vector<1x128xf32>
    %70 = vector.broadcast %69 : vector<1x128xf32> to vector<8x128xf32>
    %71 = arith.mulf %68, %70 : vector<8x128xf32>
    %72 = vector.extract_strided_slice %49 {offsets = [1, 0], sizes = [1, 128], strides = [1, 1]} : vector<2x128xf32> to vector<1x128xf32>
    %73 = vector.broadcast %72 : vector<1x128xf32> to vector<8x128xf32>
    %74 = arith.addf %71, %73 : vector<8x128xf32>
    %c0_43 = arith.constant 0 : index
    %c0_44 = arith.constant 0 : index
    %c0_45 = arith.constant 0 : index
    %75 = vector.load %arg12[%c0_43, %c0_44, %c0_45] : memref<4x128x8xbf16, #tpu.memory_space<vmem>>, vector<4x128x8xbf16>
    %c0_46 = arith.constant 0 : index
    %c0_47 = arith.constant 0 : index
    %c0_48 = arith.constant 0 : index
    %76 = vector.load %arg13[%c0_46, %c0_47, %c0_48] : memref<4x1x8xf32, #tpu.memory_space<vmem>>, vector<4x1x8xf32>
    %c0_49 = arith.constant 0 : index
    %c0_50 = arith.constant 0 : index
    %c0_51 = arith.constant 0 : index
    %77 = vector.load %arg14[%c0_49, %c0_50, %c0_51] : memref<4x128x8xbf16, #tpu.memory_space<vmem>>, vector<4x128x8xbf16>
    %c0_52 = arith.constant 0 : index
    %c0_53 = arith.constant 0 : index
    %c0_54 = arith.constant 0 : index
    %78 = vector.load %arg15[%c0_52, %c0_53, %c0_54] : memref<4x1x8xf32, #tpu.memory_space<vmem>>, vector<4x1x8xf32>
    %c0_55 = arith.constant 0 : index
    %c0_56 = arith.constant 0 : index
    %c0_57 = arith.constant 0 : index
    %79 = vector.load %arg16[%c0_55, %c0_56, %c0_57] : memref<4x128x8xbf16, #tpu.memory_space<vmem>>, vector<4x128x8xbf16>
    %c0_58 = arith.constant 0 : index
    %c0_59 = arith.constant 0 : index
    %c0_60 = arith.constant 0 : index
    %80 = vector.load %arg17[%c0_58, %c0_59, %c0_60] : memref<4x1x8xf32, #tpu.memory_space<vmem>>, vector<4x1x8xf32>
    %c0_61 = arith.constant 0 : index
    %c0_62 = arith.constant 0 : index
    %c0_63 = arith.constant 0 : index
    %81 = vector.load %arg18[%c0_61, %c0_62, %c0_63] : memref<4x8x128xbf16, #tpu.memory_space<vmem>>, vector<4x8x128xbf16>
    %c0_64 = arith.constant 0 : index
    %c0_65 = arith.constant 0 : index
    %82 = vector.load %arg19[%c0_64, %c0_65] : memref<1x128xf32, #tpu.memory_space<vmem>>, vector<1x128xf32>
    %83 = arith.truncf %74 : vector<8x128xf32> to vector<8x128xbf16>
    %84 = vector.shape_cast %83 : vector<8x128xbf16> to vector<1x8x128xbf16>
    %85 = vector.shape_cast %84 : vector<1x8x128xbf16> to vector<1x8x128xbf16>
    %86 = vector.broadcast %85 : vector<1x8x128xbf16> to vector<4x8x128xbf16>
    %87 = arith.truncf %3 : vector<4x128xf32> to vector<4x128xbf16>
    %88 = vector.shape_cast %87 : vector<4x128xbf16> to vector<1x4x128xbf16>
    %89 = vector.shape_cast %88 : vector<1x4x128xbf16> to vector<1x4x128xbf16>
    %90 = vector.broadcast %89 : vector<1x4x128xbf16> to vector<4x4x128xbf16>
    "tpu.trace_start"() <{level = 10 : i32, message = "hld,hde->hle"}> : () -> ()
    %cst_66 = arith.constant dense<0.000000e+00> : vector<4x8x8xf32>
    %91 = tpu.matmul %86, %75, %cst_66 {dimension_numbers = #tpu.dot_dimension_numbers<[2], [1], [1], [2], [0, 0, 0, 1, 1, 2], [0], [0]>} : vector<4x8x128xbf16>, vector<4x128x8xbf16>, vector<4x8x8xf32> -> vector<4x8x8xf32>
    "tpu.trace_stop"() : () -> ()
    %92 = vector.broadcast %76 : vector<4x1x8xf32> to vector<4x8x8xf32>
    %93 = arith.addf %91, %92 : vector<4x8x8xf32>
    "tpu.trace_start"() <{level = 10 : i32, message = "hld,hde->hle"}> : () -> ()
    %cst_67 = arith.constant dense<0.000000e+00> : vector<4x4x8xf32>
    %94 = tpu.matmul %90, %77, %cst_67 {dimension_numbers = #tpu.dot_dimension_numbers<[2], [1], [1], [2], [0, 0, 0, 1, 1, 2], [0], [0]>} : vector<4x4x128xbf16>, vector<4x128x8xbf16>, vector<4x4x8xf32> -> vector<4x4x8xf32>
    "tpu.trace_stop"() : () -> ()
    %95 = vector.broadcast %78 : vector<4x1x8xf32> to vector<4x4x8xf32>
    %96 = arith.addf %94, %95 : vector<4x4x8xf32>
    "tpu.trace_start"() <{level = 10 : i32, message = "hld,hde->hle"}> : () -> ()
    %cst_68 = arith.constant dense<0.000000e+00> : vector<4x4x8xf32>
    %97 = tpu.matmul %90, %79, %cst_68 {dimension_numbers = #tpu.dot_dimension_numbers<[2], [1], [1], [2], [0, 0, 0, 1, 1, 2], [0], [0]>} : vector<4x4x128xbf16>, vector<4x128x8xbf16>, vector<4x4x8xf32> -> vector<4x4x8xf32>
    "tpu.trace_stop"() : () -> ()
    %98 = vector.broadcast %80 : vector<4x1x8xf32> to vector<4x4x8xf32>
    %99 = arith.addf %97, %98 : vector<4x4x8xf32>
    %100 = arith.truncf %93 : vector<4x8x8xf32> to vector<4x8x8xbf16>
    %101 = arith.truncf %96 : vector<4x4x8xf32> to vector<4x4x8xbf16>
    "tpu.trace_start"() <{level = 10 : i32, message = "hqe,hke->hqk"}> : () -> ()
    %cst_69 = arith.constant dense<0.000000e+00> : vector<4x8x4xf32>
    %102 = tpu.matmul %100, %101, %cst_69 {dimension_numbers = #tpu.dot_dimension_numbers<[2], [2], [1], [1], [0, 0, 0, 1, 1, 1], [0], [0]>} : vector<4x8x8xbf16>, vector<4x4x8xbf16>, vector<4x8x4xf32> -> vector<4x8x4xf32>
    "tpu.trace_stop"() : () -> ()
    %cst_70 = arith.constant dense<0xFF800000> : vector<4x8xf32>
    %103 = vector.multi_reduction <maximumf>, %102, %cst_70 [2] : vector<4x8x4xf32> to vector<4x8xf32>
    %104 = vector.shape_cast %103 : vector<4x8xf32> to vector<4x8x1xf32>
    %105 = vector.broadcast %104 : vector<4x8x1xf32> to vector<4x8x4xf32>
    %106 = arith.subf %102, %105 : vector<4x8x4xf32>
    %107 = math.exp %106 : vector<4x8x4xf32>
    %cst_71 = arith.constant dense<0.000000e+00> : vector<4x8xf32>
    %108 = vector.multi_reduction <add>, %107, %cst_71 [2] : vector<4x8x4xf32> to vector<4x8xf32>
    %109 = vector.shape_cast %108 : vector<4x8xf32> to vector<4x8x1xf32>
    %110 = vector.broadcast %109 : vector<4x8x1xf32> to vector<4x8x4xf32>
    %111 = arith.divf %107, %110 : vector<4x8x4xf32>
    %112 = arith.truncf %111 : vector<4x8x4xf32> to vector<4x8x4xbf16>
    %113 = arith.truncf %99 : vector<4x4x8xf32> to vector<4x4x8xbf16>
    "tpu.trace_start"() <{level = 10 : i32, message = "hqk,hke->hqe"}> : () -> ()
    %cst_72 = arith.constant dense<0.000000e+00> : vector<4x8x8xf32>
    %114 = tpu.matmul %112, %113, %cst_72 {dimension_numbers = #tpu.dot_dimension_numbers<[2], [1], [1], [2], [0, 0, 0, 1, 1, 2], [0], [0]>} : vector<4x8x4xbf16>, vector<4x4x8xbf16>, vector<4x8x8xf32> -> vector<4x8x8xf32>
    "tpu.trace_stop"() : () -> ()
    %115 = arith.truncf %114 : vector<4x8x8xf32> to vector<4x8x8xbf16>
    "tpu.trace_start"() <{level = 10 : i32, message = "hqe,hed->hqd"}> : () -> ()
    %cst_73 = arith.constant dense<0.000000e+00> : vector<4x8x128xf32>
    %116 = tpu.matmul %115, %81, %cst_73 {dimension_numbers = #tpu.dot_dimension_numbers<[2], [1], [1], [2], [0, 0, 0, 1, 1, 2], [0], [0]>} : vector<4x8x8xbf16>, vector<4x8x128xbf16>, vector<4x8x128xf32> -> vector<4x8x128xf32>
    "tpu.trace_stop"() : () -> ()
    %cst_74 = arith.constant dense<0.000000e+00> : vector<8x128xf32>
    %117 = vector.multi_reduction <add>, %116, %cst_74 [0] : vector<4x8x128xf32> to vector<8x128xf32>
    %118 = vector.broadcast %82 : vector<1x128xf32> to vector<8x128xf32>
    %119 = arith.addf %117, %118 : vector<8x128xf32>
    %c0_75 = arith.constant 0 : index
    %c0_76 = arith.constant 0 : index
    %120 = vector.load %arg20[%c0_75, %c0_76] : memref<2x128xf32, #tpu.memory_space<vmem>>, vector<2x128xf32>
    %121 = arith.addf %74, %119 : vector<8x128xf32>
    %cst_77 = arith.constant dense<0.000000e+00> : vector<8xf32>
    %122 = vector.multi_reduction <add>, %121, %cst_77 [1] : vector<8x128xf32> to vector<8xf32>
    %123 = vector.shape_cast %122 : vector<8xf32> to vector<8x1xf32>
    %cst_78 = arith.constant 3.125000e-02 : f32
    %124 = vector.broadcast %cst_78 : f32 to vector<8x1xf32>
    %125 = arith.mulf %123, %124 : vector<8x1xf32>
    %126 = arith.mulf %121, %121 : vector<8x128xf32>
    %cst_79 = arith.constant dense<0.000000e+00> : vector<8xf32>
    %127 = vector.multi_reduction <add>, %126, %cst_79 [1] : vector<8x128xf32> to vector<8xf32>
    %128 = vector.shape_cast %127 : vector<8xf32> to vector<8x1xf32>
    %cst_80 = arith.constant 3.125000e-02 : f32
    %129 = vector.broadcast %cst_80 : f32 to vector<8x1xf32>
    %130 = arith.mulf %128, %129 : vector<8x1xf32>
    %131 = arith.mulf %125, %125 : vector<8x1xf32>
    %132 = arith.subf %130, %131 : vector<8x1xf32>
    %133 = vector.broadcast %125 : vector<8x1xf32> to vector<8x128xf32>
    %134 = arith.subf %121, %133 : vector<8x128xf32>
    %cst_81 = arith.constant 9.99999974E-6 : f32
    %135 = vector.broadcast %cst_81 : f32 to vector<8x1xf32>
    %136 = arith.addf %132, %135 : vector<8x1xf32>
    %137 = math.rsqrt %136 : vector<8x1xf32>
    %138 = vector.broadcast %137 : vector<8x1xf32> to vector<8x128xf32>
    %139 = arith.mulf %134, %138 : vector<8x128xf32>
    %140 = vector.extract_strided_slice %120 {offsets = [0, 0], sizes = [1, 128], strides = [1, 1]} : vector<2x128xf32> to vector<1x128xf32>
    %141 = vector.broadcast %140 : vector<1x128xf32> to vector<8x128xf32>
    %142 = arith.mulf %139, %141 : vector<8x128xf32>
    %143 = vector.extract_strided_slice %120 {offsets = [1, 0], sizes = [1, 128], strides = [1, 1]} : vector<2x128xf32> to vector<1x128xf32>
    %144 = vector.broadcast %143 : vector<1x128xf32> to vector<8x128xf32>
    %145 = arith.addf %142, %144 : vector<8x128xf32>
    %c0_82 = arith.constant 0 : index
    %c0_83 = arith.constant 0 : index
    %146 = vector.load %arg21[%c0_82, %c0_83] : memref<128x128xbf16, #tpu.memory_space<vmem>>, vector<128x128xbf16>
    %c0_84 = arith.constant 0 : index
    %c0_85 = arith.constant 0 : index
    %147 = vector.load %arg22[%c0_84, %c0_85] : memref<1x128xf32, #tpu.memory_space<vmem>>, vector<1x128xf32>
    %c0_86 = arith.constant 0 : index
    %c0_87 = arith.constant 0 : index
    %148 = vector.load %arg23[%c0_86, %c0_87] : memref<128x128xbf16, #tpu.memory_space<vmem>>, vector<128x128xbf16>
    %c0_88 = arith.constant 0 : index
    %c0_89 = arith.constant 0 : index
    %149 = vector.load %arg24[%c0_88, %c0_89] : memref<1x128xf32, #tpu.memory_space<vmem>>, vector<1x128xf32>
    %150 = arith.truncf %145 : vector<8x128xf32> to vector<8x128xbf16>
    %cst_90 = arith.constant dense<0.000000e+00> : vector<8x128xf32>
    %151 = tpu.matmul %150, %146, %cst_90 {dimension_numbers = #tpu.dot_dimension_numbers<[1], [0], [0], [1], [0, 0, 1, 1], [], []>} : vector<8x128xbf16>, vector<128x128xbf16>, vector<8x128xf32> -> vector<8x128xf32>
    %152 = vector.broadcast %147 : vector<1x128xf32> to vector<8x128xf32>
    %153 = arith.addf %151, %152 : vector<8x128xf32>
    %cst_91 = arith.constant 0.000000e+00 : f32
    %154 = vector.broadcast %cst_91 : f32 to vector<8x128xf32>
    %155 = arith.maximumf %153, %154 : vector<8x128xf32>
    %156 = arith.truncf %155 : vector<8x128xf32> to vector<8x128xbf16>
    %cst_92 = arith.constant dense<0.000000e+00> : vector<8x128xf32>
    %157 = tpu.matmul %156, %148, %cst_92 {dimension_numbers = #tpu.dot_dimension_numbers<[1], [0], [0], [1], [0, 0, 1, 1], [], []>} : vector<8x128xbf16>, vector<128x128xbf16>, vector<8x128xf32> -> vector<8x128xf32>
    %158 = vector.broadcast %149 : vector<1x128xf32> to vector<8x128xf32>
    %159 = arith.addf %157, %158 : vector<8x128xf32>
    %c0_93 = arith.constant 0 : index
    %c0_94 = arith.constant 0 : index
    %160 = vector.load %arg25[%c0_93, %c0_94] : memref<2x128xf32, #tpu.memory_space<vmem>>, vector<2x128xf32>
    %161 = arith.addf %145, %159 : vector<8x128xf32>
    %cst_95 = arith.constant dense<0.000000e+00> : vector<8xf32>
    %162 = vector.multi_reduction <add>, %161, %cst_95 [1] : vector<8x128xf32> to vector<8xf32>
    %163 = vector.shape_cast %162 : vector<8xf32> to vector<8x1xf32>
    %cst_96 = arith.constant 3.125000e-02 : f32
    %164 = vector.broadcast %cst_96 : f32 to vector<8x1xf32>
    %165 = arith.mulf %163, %164 : vector<8x1xf32>
    %166 = arith.mulf %161, %161 : vector<8x128xf32>
    %cst_97 = arith.constant dense<0.000000e+00> : vector<8xf32>
    %167 = vector.multi_reduction <add>, %166, %cst_97 [1] : vector<8x128xf32> to vector<8xf32>
    %168 = vector.shape_cast %167 : vector<8xf32> to vector<8x1xf32>
    %cst_98 = arith.constant 3.125000e-02 : f32
    %169 = vector.broadcast %cst_98 : f32 to vector<8x1xf32>
    %170 = arith.mulf %168, %169 : vector<8x1xf32>
    %171 = arith.mulf %165, %165 : vector<8x1xf32>
    %172 = arith.subf %170, %171 : vector<8x1xf32>
    %173 = vector.broadcast %165 : vector<8x1xf32> to vector<8x128xf32>
    %174 = arith.subf %161, %173 : vector<8x128xf32>
    %cst_99 = arith.constant 9.99999974E-6 : f32
    %175 = vector.broadcast %cst_99 : f32 to vector<8x1xf32>
    %176 = arith.addf %172, %175 : vector<8x1xf32>
    %177 = math.rsqrt %176 : vector<8x1xf32>
    %178 = vector.broadcast %177 : vector<8x1xf32> to vector<8x128xf32>
    %179 = arith.mulf %174, %178 : vector<8x128xf32>
    %180 = vector.extract_strided_slice %160 {offsets = [0, 0], sizes = [1, 128], strides = [1, 1]} : vector<2x128xf32> to vector<1x128xf32>
    %181 = vector.broadcast %180 : vector<1x128xf32> to vector<8x128xf32>
    %182 = arith.mulf %179, %181 : vector<8x128xf32>
    %183 = vector.extract_strided_slice %160 {offsets = [1, 0], sizes = [1, 128], strides = [1, 1]} : vector<2x128xf32> to vector<1x128xf32>
    %184 = vector.broadcast %183 : vector<1x128xf32> to vector<8x128xf32>
    %185 = arith.addf %182, %184 : vector<8x128xf32>
    %c0_100 = arith.constant 0 : index
    %c0_101 = arith.constant 0 : index
    %c0_102 = arith.constant 0 : index
    %186 = vector.load %arg26[%c0_100, %c0_101, %c0_102] : memref<1x8x128xf32, #tpu.memory_space<vmem>>, vector<1x8x128xf32>
    %187 = vector.shape_cast %186 : vector<1x8x128xf32> to vector<8x128xf32>
    %188 = vector.shape_cast %185 : vector<8x128xf32> to vector<1x8x128xf32>
    tpu.vector_store %arg26[%c0_100, %c0_101, %c0_102], %188 {strides = array<i32>} : memref<1x8x128xf32, #tpu.memory_space<vmem>>, vector<1x8x128xf32>,
    return
  }
  func.func @transform_0(%arg0: i32) -> (i32, i32, i32) {
    %c0_i32 = arith.constant 0 : i32
    %c0_i32_0 = arith.constant 0 : i32
    %c0_i32_1 = arith.constant 0 : i32
    return %arg0, %c0_i32, %c0_i32_0 : i32, i32, i32
  }
  func.func @transform_1(%arg0: i32) -> (i32, i32, i32) {
    %c0_i32 = arith.constant 0 : i32
    %c0_i32_0 = arith.constant 0 : i32
    %c0_i32_1 = arith.constant 0 : i32
    return %arg0, %c0_i32, %c0_i32_0 : i32, i32, i32
  }
  func.func @transform_2(%arg0: i32) -> (i32, i32, i32) {
    %c0_i32 = arith.constant 0 : i32
    %c0_i32_0 = arith.constant 0 : i32
    %c0_i32_1 = arith.constant 0 : i32
    %c0_i32_2 = arith.constant 0 : i32
    return %c0_i32, %c0_i32_0, %c0_i32_1 : i32, i32, i32
  }
  func.func @transform_3(%arg0: i32) -> (i32, i32, i32) {
    %c0_i32 = arith.constant 0 : i32
    %c0_i32_0 = arith.constant 0 : i32
    %c0_i32_1 = arith.constant 0 : i32
    %c0_i32_2 = arith.constant 0 : i32
    return %c0_i32, %c0_i32_0, %c0_i32_1 : i32, i32, i32
  }
  func.func @transform_4(%arg0: i32) -> (i32, i32, i32) {
    %c0_i32 = arith.constant 0 : i32
    %c0_i32_0 = arith.constant 0 : i32
    %c0_i32_1 = arith.constant 0 : i32
    %c0_i32_2 = arith.constant 0 : i32
    return %c0_i32, %c0_i32_0, %c0_i32_1 : i32, i32, i32
  }
  func.func @transform_5(%arg0: i32) -> (i32, i32, i32) {
    %c0_i32 = arith.constant 0 : i32
    %c0_i32_0 = arith.constant 0 : i32
    %c0_i32_1 = arith.constant 0 : i32
    %c0_i32_2 = arith.constant 0 : i32
    return %c0_i32, %c0_i32_0, %c0_i32_1 : i32, i32, i32
  }
  func.func @transform_6(%arg0: i32) -> (i32, i32, i32) {
    %c0_i32 = arith.constant 0 : i32
    %c0_i32_0 = arith.constant 0 : i32
    %c0_i32_1 = arith.constant 0 : i32
    %c0_i32_2 = arith.constant 0 : i32
    return %c0_i32, %c0_i32_0, %c0_i32_1 : i32, i32, i32
  }
  func.func @transform_7(%arg0: i32) -> (i32, i32, i32) {
    %c0_i32 = arith.constant 0 : i32
    %c0_i32_0 = arith.constant 0 : i32
    %c0_i32_1 = arith.constant 0 : i32
    %c0_i32_2 = arith.constant 0 : i32
    return %c0_i32, %c0_i32_0, %c0_i32_1 : i32, i32, i32
  }
  func.func @transform_8(%arg0: i32) -> (i32, i32, i32) {
    %c0_i32 = arith.constant 0 : i32
    %c0_i32_0 = arith.constant 0 : i32
    %c0_i32_1 = arith.constant 0 : i32
    %c0_i32_2 = arith.constant 0 : i32
    return %c0_i32, %c0_i32_0, %c0_i32_1 : i32, i32, i32
  }
  func.func @transform_9(%arg0: i32) -> (i32, i32) {
    %c0_i32 = arith.constant 0 : i32
    %c0_i32_0 = arith.constant 0 : i32
    %c0_i32_1 = arith.constant 0 : i32
    return %c0_i32, %c0_i32_0 : i32, i32
  }
  func.func @transform_10(%arg0: i32) -> (i32, i32) {
    %c0_i32 = arith.constant 0 : i32
    %c0_i32_0 = arith.constant 0 : i32
    %c0_i32_1 = arith.constant 0 : i32
    return %c0_i32, %c0_i32_0 : i32, i32
  }
  func.func @transform_11(%arg0: i32) -> (i32, i32, i32) {
    %c0_i32 = arith.constant 0 : i32
    %c0_i32_0 = arith.constant 0 : i32
    %c0_i32_1 = arith.constant 0 : i32
    %c0_i32_2 = arith.constant 0 : i32
    return %c0_i32, %c0_i32_0, %c0_i32_1 : i32, i32, i32
  }
  func.func @transform_12(%arg0: i32) -> (i32, i32, i32) {
    %c0_i32 = arith.constant 0 : i32
    %c0_i32_0 = arith.constant 0 : i32
    %c0_i32_1 = arith.constant 0 : i32
    %c0_i32_2 = arith.constant 0 : i32
    return %c0_i32, %c0_i32_0, %c0_i32_1 : i32, i32, i32
  }
  func.func @transform_13(%arg0: i32) -> (i32, i32, i32) {
    %c0_i32 = arith.constant 0 : i32
    %c0_i32_0 = arith.constant 0 : i32
    %c0_i32_1 = arith.constant 0 : i32
    %c0_i32_2 = arith.constant 0 : i32
    return %c0_i32, %c0_i32_0, %c0_i32_1 : i32, i32, i32
  }
  func.func @transform_14(%arg0: i32) -> (i32, i32, i32) {
    %c0_i32 = arith.constant 0 : i32
    %c0_i32_0 = arith.constant 0 : i32
    %c0_i32_1 = arith.constant 0 : i32
    %c0_i32_2 = arith.constant 0 : i32
    return %c0_i32, %c0_i32_0, %c0_i32_1 : i32, i32, i32
  }
  func.func @transform_15(%arg0: i32) -> (i32, i32, i32) {
    %c0_i32 = arith.constant 0 : i32
    %c0_i32_0 = arith.constant 0 : i32
    %c0_i32_1 = arith.constant 0 : i32
    %c0_i32_2 = arith.constant 0 : i32
    return %c0_i32, %c0_i32_0, %c0_i32_1 : i32, i32, i32
  }
  func.func @transform_16(%arg0: i32) -> (i32, i32, i32) {
    %c0_i32 = arith.constant 0 : i32
    %c0_i32_0 = arith.constant 0 : i32
    %c0_i32_1 = arith.constant 0 : i32
    %c0_i32_2 = arith.constant 0 : i32
    return %c0_i32, %c0_i32_0, %c0_i32_1 : i32, i32, i32
  }
  func.func @transform_17(%arg0: i32) -> (i32, i32, i32) {
    %c0_i32 = arith.constant 0 : i32
    %c0_i32_0 = arith.constant 0 : i32
    %c0_i32_1 = arith.constant 0 : i32
    %c0_i32_2 = arith.constant 0 : i32
    return %c0_i32, %c0_i32_0, %c0_i32_1 : i32, i32, i32
  }
  func.func @transform_18(%arg0: i32) -> (i32, i32) {
    %c0_i32 = arith.constant 0 : i32
    %c0_i32_0 = arith.constant 0 : i32
    %c0_i32_1 = arith.constant 0 : i32
    return %c0_i32, %c0_i32_0 : i32, i32
  }
  func.func @transform_19(%arg0: i32) -> (i32, i32) {
    %c0_i32 = arith.constant 0 : i32
    %c0_i32_0 = arith.constant 0 : i32
    %c0_i32_1 = arith.constant 0 : i32
    return %c0_i32, %c0_i32_0 : i32, i32
  }
  func.func @transform_20(%arg0: i32) -> (i32, i32) {
    %c0_i32 = arith.constant 0 : i32
    %c0_i32_0 = arith.constant 0 : i32
    %c0_i32_1 = arith.constant 0 : i32
    return %c0_i32, %c0_i32_0 : i32, i32
  }
  func.func @transform_21(%arg0: i32) -> (i32, i32) {
    %c0_i32 = arith.constant 0 : i32
    %c0_i32_0 = arith.constant 0 : i32
    %c0_i32_1 = arith.constant 0 : i32
    return %c0_i32, %c0_i32_0 : i32, i32
  }
  func.func @transform_22(%arg0: i32) -> (i32, i32) {
    %c0_i32 = arith.constant 0 : i32
    %c0_i32_0 = arith.constant 0 : i32
    %c0_i32_1 = arith.constant 0 : i32
    return %c0_i32, %c0_i32_0 : i32, i32
  }
  func.func @transform_23(%arg0: i32) -> (i32, i32) {
    %c0_i32 = arith.constant 0 : i32
    %c0_i32_0 = arith.constant 0 : i32
    %c0_i32_1 = arith.constant 0 : i32
    return %c0_i32, %c0_i32_0 : i32, i32
  }
  func.func @transform_24(%arg0: i32) -> (i32, i32) {
    %c0_i32 = arith.constant 0 : i32
    %c0_i32_0 = arith.constant 0 : i32
    %c0_i32_1 = arith.constant 0 : i32
    return %c0_i32, %c0_i32_0 : i32, i32
  }
  func.func @transform_25(%arg0: i32) -> (i32, i32, i32) {
    %c0_i32 = arith.constant 0 : i32
    %c0_i32_0 = arith.constant 0 : i32
    %c0_i32_1 = arith.constant 0 : i32
    return %arg0, %c0_i32, %c0_i32_0 : i32, i32, i32
  }
}

module attributes {stable_mosaic.version = 11 : i64} {
  func.func @_heads_kernel(%arg0: i32, %arg1: memref<8x128xf32, #tpu.memory_space<vmem>>, %arg2: memref<128x128xbf16, #tpu.memory_space<vmem>>, %arg3: memref<1x128xf32, #tpu.memory_space<vmem>>, %arg4: memref<128x128xbf16, #tpu.memory_space<vmem>>, %arg5: memref<1x128xf32, #tpu.memory_space<vmem>>, %arg6: memref<128x128xbf16, #tpu.memory_space<vmem>>, %arg7: memref<1x128xf32, #tpu.memory_space<vmem>>, %arg8: memref<128x128xbf16, #tpu.memory_space<vmem>>, %arg9: memref<1x128xf32, #tpu.memory_space<vmem>>, %arg10: memref<8x128xf32, #tpu.memory_space<vmem>>, %arg11: memref<8x128xf32, #tpu.memory_space<vmem>>) attributes {dimension_semantics = [#tpu.dimension_semantics<parallel>], iteration_bounds = array<i64: 2>, scalar_prefetch = 0 : i64, scratch_operands = 0 : i64, tpu.core_type = #tpu.core_type<tc>, window_params = [{transform_indices = @transform_0, window_bounds = array<i64: 8, 128>}, {pipeline_mode = #tpu.pipeline_mode<synchronous>, transform_indices = @transform_1, window_bounds = array<i64: 128, 128>}, {pipeline_mode = #tpu.pipeline_mode<synchronous>, transform_indices = @transform_2, window_bounds = array<i64: 1, 128>}, {pipeline_mode = #tpu.pipeline_mode<synchronous>, transform_indices = @transform_3, window_bounds = array<i64: 128, 128>}, {pipeline_mode = #tpu.pipeline_mode<synchronous>, transform_indices = @transform_4, window_bounds = array<i64: 1, 128>}, {pipeline_mode = #tpu.pipeline_mode<synchronous>, transform_indices = @transform_5, window_bounds = array<i64: 128, 128>}, {pipeline_mode = #tpu.pipeline_mode<synchronous>, transform_indices = @transform_6, window_bounds = array<i64: 1, 128>}, {pipeline_mode = #tpu.pipeline_mode<synchronous>, transform_indices = @transform_7, window_bounds = array<i64: 128, 128>}, {pipeline_mode = #tpu.pipeline_mode<synchronous>, transform_indices = @transform_8, window_bounds = array<i64: 1, 128>}, {transform_indices = @transform_9, window_bounds = array<i64: 8, 128>}, {transform_indices = @transform_10, window_bounds = array<i64: 8, 128>}]} {
    %c0 = arith.constant 0 : index
    %c0_0 = arith.constant 0 : index
    %0 = vector.load %arg1[%c0, %c0_0] : memref<8x128xf32, #tpu.memory_space<vmem>>, vector<8x128xf32>
    %1 = arith.truncf %0 : vector<8x128xf32> to vector<8x128xbf16>
    %c0_1 = arith.constant 0 : index
    %c0_2 = arith.constant 0 : index
    %2 = vector.load %arg2[%c0_1, %c0_2] : memref<128x128xbf16, #tpu.memory_space<vmem>>, vector<128x128xbf16>
    %cst = arith.constant dense<0.000000e+00> : vector<8x128xf32>
    %3 = tpu.matmul %1, %2, %cst {dimension_numbers = #tpu.dot_dimension_numbers<[1], [0], [0], [1], [0, 0, 1, 1], [], []>} : vector<8x128xbf16>, vector<128x128xbf16>, vector<8x128xf32> -> vector<8x128xf32>
    %c0_3 = arith.constant 0 : index
    %c0_4 = arith.constant 0 : index
    %4 = vector.load %arg3[%c0_3, %c0_4] : memref<1x128xf32, #tpu.memory_space<vmem>>, vector<1x128xf32>
    %5 = vector.broadcast %4 : vector<1x128xf32> to vector<8x128xf32>
    %6 = arith.addf %3, %5 : vector<8x128xf32>
    %c0_5 = arith.constant 0 : index
    %c0_6 = arith.constant 0 : index
    %7 = vector.load %arg10[%c0_5, %c0_6] : memref<8x128xf32, #tpu.memory_space<vmem>>, vector<8x128xf32>
    tpu.vector_store %arg10[%c0_5, %c0_6], %6 {strides = array<i32>} : memref<8x128xf32, #tpu.memory_space<vmem>>, vector<8x128xf32>,
    %c0_7 = arith.constant 0 : index
    %c0_8 = arith.constant 0 : index
    %8 = vector.load %arg4[%c0_7, %c0_8] : memref<128x128xbf16, #tpu.memory_space<vmem>>, vector<128x128xbf16>
    %cst_9 = arith.constant dense<0.000000e+00> : vector<8x128xf32>
    %9 = tpu.matmul %1, %8, %cst_9 {dimension_numbers = #tpu.dot_dimension_numbers<[1], [0], [0], [1], [0, 0, 1, 1], [], []>} : vector<8x128xbf16>, vector<128x128xbf16>, vector<8x128xf32> -> vector<8x128xf32>
    %c0_10 = arith.constant 0 : index
    %c0_11 = arith.constant 0 : index
    %10 = vector.load %arg5[%c0_10, %c0_11] : memref<1x128xf32, #tpu.memory_space<vmem>>, vector<1x128xf32>
    %11 = vector.broadcast %10 : vector<1x128xf32> to vector<8x128xf32>
    %12 = arith.addf %9, %11 : vector<8x128xf32>
    %cst_12 = arith.constant 0.000000e+00 : f32
    %13 = vector.broadcast %cst_12 : f32 to vector<8x128xf32>
    %14 = arith.maximumf %12, %13 : vector<8x128xf32>
    %15 = arith.truncf %14 : vector<8x128xf32> to vector<8x128xbf16>
    %c0_13 = arith.constant 0 : index
    %c0_14 = arith.constant 0 : index
    %16 = vector.load %arg6[%c0_13, %c0_14] : memref<128x128xbf16, #tpu.memory_space<vmem>>, vector<128x128xbf16>
    %cst_15 = arith.constant dense<0.000000e+00> : vector<8x128xf32>
    %17 = tpu.matmul %15, %16, %cst_15 {dimension_numbers = #tpu.dot_dimension_numbers<[1], [0], [0], [1], [0, 0, 1, 1], [], []>} : vector<8x128xbf16>, vector<128x128xbf16>, vector<8x128xf32> -> vector<8x128xf32>
    %c0_16 = arith.constant 0 : index
    %c0_17 = arith.constant 0 : index
    %18 = vector.load %arg7[%c0_16, %c0_17] : memref<1x128xf32, #tpu.memory_space<vmem>>, vector<1x128xf32>
    %19 = vector.broadcast %18 : vector<1x128xf32> to vector<8x128xf32>
    %20 = arith.addf %17, %19 : vector<8x128xf32>
    %cst_18 = arith.constant 0.000000e+00 : f32
    %21 = vector.broadcast %cst_18 : f32 to vector<8x128xf32>
    %22 = arith.maximumf %20, %21 : vector<8x128xf32>
    %23 = arith.truncf %22 : vector<8x128xf32> to vector<8x128xbf16>
    %c0_19 = arith.constant 0 : index
    %c0_20 = arith.constant 0 : index
    %24 = vector.load %arg8[%c0_19, %c0_20] : memref<128x128xbf16, #tpu.memory_space<vmem>>, vector<128x128xbf16>
    %cst_21 = arith.constant dense<0.000000e+00> : vector<8x128xf32>
    %25 = tpu.matmul %23, %24, %cst_21 {dimension_numbers = #tpu.dot_dimension_numbers<[1], [0], [0], [1], [0, 0, 1, 1], [], []>} : vector<8x128xbf16>, vector<128x128xbf16>, vector<8x128xf32> -> vector<8x128xf32>
    %c0_22 = arith.constant 0 : index
    %c0_23 = arith.constant 0 : index
    %26 = vector.load %arg9[%c0_22, %c0_23] : memref<1x128xf32, #tpu.memory_space<vmem>>, vector<1x128xf32>
    %27 = vector.broadcast %26 : vector<1x128xf32> to vector<8x128xf32>
    %28 = arith.addf %25, %27 : vector<8x128xf32>
    %29 = arith.negf %28 : vector<8x128xf32>
    %30 = math.exp %29 : vector<8x128xf32>
    %cst_24 = arith.constant 1.000000e+00 : f32
    %31 = vector.broadcast %cst_24 : f32 to vector<8x128xf32>
    %32 = arith.addf %31, %30 : vector<8x128xf32>
    %33 = arith.divf %31, %32 : vector<8x128xf32>
    %c0_25 = arith.constant 0 : index
    %c0_26 = arith.constant 0 : index
    %34 = vector.load %arg11[%c0_25, %c0_26] : memref<8x128xf32, #tpu.memory_space<vmem>>, vector<8x128xf32>
    tpu.vector_store %arg11[%c0_25, %c0_26], %33 {strides = array<i32>} : memref<8x128xf32, #tpu.memory_space<vmem>>, vector<8x128xf32>,
    return
  }
  func.func @transform_0(%arg0: i32) -> (i32, i32) {
    %c0_i32 = arith.constant 0 : i32
    %c0_i32_0 = arith.constant 0 : i32
    return %arg0, %c0_i32 : i32, i32
  }
  func.func @transform_1(%arg0: i32) -> (i32, i32) {
    %c0_i32 = arith.constant 0 : i32
    %c0_i32_0 = arith.constant 0 : i32
    %c0_i32_1 = arith.constant 0 : i32
    return %c0_i32, %c0_i32_0 : i32, i32
  }
  func.func @transform_2(%arg0: i32) -> (i32, i32) {
    %c0_i32 = arith.constant 0 : i32
    %c0_i32_0 = arith.constant 0 : i32
    %c0_i32_1 = arith.constant 0 : i32
    return %c0_i32, %c0_i32_0 : i32, i32
  }
  func.func @transform_3(%arg0: i32) -> (i32, i32) {
    %c0_i32 = arith.constant 0 : i32
    %c0_i32_0 = arith.constant 0 : i32
    %c0_i32_1 = arith.constant 0 : i32
    return %c0_i32, %c0_i32_0 : i32, i32
  }
  func.func @transform_4(%arg0: i32) -> (i32, i32) {
    %c0_i32 = arith.constant 0 : i32
    %c0_i32_0 = arith.constant 0 : i32
    %c0_i32_1 = arith.constant 0 : i32
    return %c0_i32, %c0_i32_0 : i32, i32
  }
  func.func @transform_5(%arg0: i32) -> (i32, i32) {
    %c0_i32 = arith.constant 0 : i32
    %c0_i32_0 = arith.constant 0 : i32
    %c0_i32_1 = arith.constant 0 : i32
    return %c0_i32, %c0_i32_0 : i32, i32
  }
  func.func @transform_6(%arg0: i32) -> (i32, i32) {
    %c0_i32 = arith.constant 0 : i32
    %c0_i32_0 = arith.constant 0 : i32
    %c0_i32_1 = arith.constant 0 : i32
    return %c0_i32, %c0_i32_0 : i32, i32
  }
  func.func @transform_7(%arg0: i32) -> (i32, i32) {
    %c0_i32 = arith.constant 0 : i32
    %c0_i32_0 = arith.constant 0 : i32
    %c0_i32_1 = arith.constant 0 : i32
    return %c0_i32, %c0_i32_0 : i32, i32
  }
  func.func @transform_8(%arg0: i32) -> (i32, i32) {
    %c0_i32 = arith.constant 0 : i32
    %c0_i32_0 = arith.constant 0 : i32
    %c0_i32_1 = arith.constant 0 : i32
    return %c0_i32, %c0_i32_0 : i32, i32
  }
  func.func @transform_9(%arg0: i32) -> (i32, i32) {
    %c0_i32 = arith.constant 0 : i32
    %c0_i32_0 = arith.constant 0 : i32
    return %arg0, %c0_i32 : i32, i32
  }
  func.func @transform_10(%arg0: i32) -> (i32, i32) {
    %c0_i32 = arith.constant 0 : i32
    %c0_i32_0 = arith.constant 0 : i32
    return %arg0, %c0_i32 : i32, i32
  }
}

</mosaic_0001>

<bundles_post_ra>
// kernel: _lambda_.6
= control target key start
LH: loop header
LB: loop body
LE: loop exit
PB: predicated region body
PF: predicated region fallthrough
CT: control target
= control target key end

     0   :  { %s1464_s21 = smov 0   ;;  %s1599_s0 = inlined_call_operand.vmem [shape: f32[8,3072], index: 0, kind: input, shape index: {}]   ;;  %s1600_s1 = inlined_call_operand.vmem [shape: bf16[3072,128], index: 1, kind: input, shape index: {}]   ;;  %s1601_s2 = inlined_call_operand.vmem [shape: f32[1,128], index: 2, kind: input, shape index: {}]   ;;  %s1602_s3 = inlined_call_operand.vmem [shape: bf16[128,128], index: 3, kind: input, shape index: {}]   ;;  %s1603_s4 = inlined_call_operand.vmem [shape: f32[1,128], index: 4, kind: input, shape index: {}]   ;;  %s1604_s5 = inlined_call_operand.vmem [shape: f32[8,128], index: 5, kind: input, shape index: {}]   ;;  %s1605_s6 = inlined_call_operand.vmem [shape: f32[8,128], index: 6, kind: output, shape index: {}]  }
   0x1 LB: > { %s1470_s22 = sadd.s32 4294967295, %s1426_s21   ;;  %p1040_p0 = scmp.ge.s32.totalorder %s1426_s21, 1  ;;  %s1426_s21 = sphi %s1464_s21, %s16_s21  }
   0x2   : > { %p219_p1 = scmp.lt.s32.totalorder %s1426_s21, 4 }
   0x4   : > { %p220_p2 = pnand %p1040_p0, %p219_p1 }
   0x5   : > { %s1041_s23 = sshll.u32 (!%p220_p2), %s1470_s22, 3  ;;  %s1043_s24 = sshll.u32 (!%p220_p2), %s1470_s22, 7 }
   0x6   : > { %223 = sbr.rel (%p220_p2) target bundleno = 394 (0x18a), region = 44  ;;  %p250_p3 = scmp.lt.s32.totalorder (!%p220_p2), %s1041_s23, 23 }
   0x7   : > { %p256_p4 = scmp.lt.s32.totalorder (!%p220_p2), %s1043_s24, 383  ;;  %p1045_p5 = scmp.ne.s32.totalorder (!%p220_p2), %s1470_s22, 0 }
   0xb   : > { %s1607_s23 = smov (!%p250_p3, %s1041_s23), 23  ;;  %s1609_s24 = smov (!%p256_p4, %s1043_s24), 383 }
   0xc   : > { %s1042_s25 = sshll.u32 %s1607_s23, 3  ;;  %s1044_s29 = sshll.u32 %s1609_s24, 2 }
   0xd   : > { %s1479_s28 = scalar_lea.vmem %s1599_s0, %s1042_s25  ;;  %s1484_s8 = scalar_lea.vmem %s1600_s1, %s1044_s29 }
   0xe   : > { %264 = sbr.rel (%p1045_p5) target bundleno = 21 (0x15), region = 48 }
  0x13   : > { %v1428_v0 = vmov 0.0  }
  0x14   : > { %265 = vst [vmem:[#allocation2] sm:$0xff] %v1428_v0 }
  0x15 PF: > { %v1344_v1 = vld [vmem:[%s1484_s8 + $0x38] sm:$0xff]  ;;  %v1343_v5 = vld [vmem:[%s1484_s8 + $0x30] sm:$0xff]  ;;  %v1342_v9 = vld [vmem:[%s1484_s8 + $0x28] sm:$0xff]  ;;  %p1302_p6 = scmp.ne.s32.totalorder %s1470_s22, 2 }
  0x16   : > { %v1352_v2 = vld [vmem:[%s1484_s8 + $0x78] sm:$0xff]  ;;  %795 = vmatpush.bf16.msra.mxu0 %v1344_v1  ;;  %v1351_v6 = vld [vmem:[%s1484_s8 + $0x70] sm:$0xff]  ;;  %v1350_v10 = vld [vmem:[%s1484_s8 + $0x68] sm:$0xff] }
  0x17   : > { %v1360_v3 = vld [vmem:[%s1484_s8 + $0xb8] sm:$0xff]  ;;  %808 = vmatpush.bf16.msra.mxu1 %v1352_v2  ;;  %v1359_v7 = vld [vmem:[%s1484_s8 + $0xb0] sm:$0xff]  ;;  %v1358_v11 = vld [vmem:[%s1484_s8 + $0xa8] sm:$0xff] }
  0x18   : > { %v1368_v4 = vld [vmem:[%s1484_s8 + $0xf8] sm:$0xff]  ;;  %821 = vmatpush.bf16.msra.mxu2 %v1360_v3  ;;  %v1367_v8 = vld [vmem:[%s1484_s8 + $0xf0] sm:$0xff]  ;;  %v1366_v12 = vld [vmem:[%s1484_s8 + $0xe8] sm:$0xff] }
  0x19   : > { %834 = vmatpush.bf16.msra.mxu3 %v1368_v4  ;;  %v1341_v13 = vld [vmem:[%s1484_s8 + $0x20] sm:$0xff]  ;;  %v1340_v17 = vld [vmem:[%s1484_s8 + $0x18] sm:$0xff]  ;;  %v1339_v21 = vld [vmem:[%s1484_s8 + $0x10] sm:$0xff] }
  0x1a   : > { %796 = vmatpush.bf16.msra.mxu0 %v1343_v5  ;;  %v1349_v14 = vld [vmem:[%s1484_s8 + $0x60] sm:$0xff]  ;;  %v1348_v18 = vld [vmem:[%s1484_s8 + $0x58] sm:$0xff]  ;;  %v1347_v22 = vld [vmem:[%s1484_s8 + $0x50] sm:$0xff] }
  0x1b   : > { %809 = vmatpush.bf16.msra.mxu1 %v1351_v6  ;;  %v1357_v15 = vld [vmem:[%s1484_s8 + $0xa0] sm:$0xff]  ;;  %v1356_v19 = vld [vmem:[%s1484_s8 + $0x98] sm:$0xff]  ;;  %v1355_v23 = vld [vmem:[%s1484_s8 + $0x90] sm:$0xff] }
  0x1c   : > { %822 = vmatpush.bf16.msra.mxu2 %v1359_v7  ;;  %v1365_v16 = vld [vmem:[%s1484_s8 + $0xe0] sm:$0xff]  ;;  %v1364_v20 = vld [vmem:[%s1484_s8 + $0xd8] sm:$0xff]  ;;  %v1363_v24 = vld [vmem:[%s1484_s8 + $0xd0] sm:$0xff] }
  0x1d   : > { %835 = vmatpush.bf16.msra.mxu3 %v1367_v8  ;;  %v1338_v25 = vld [vmem:[%s1484_s8 + $0x8] sm:$0xff]  ;;  %v1337_v29 = vld [vmem:[%s1484_s8] sm:$0xff]  ;;  %v1376_v33 = vld [vmem:[%s1484_s8 + $0x138] sm:$0xff] }
  0x1e   : > { %797 = vmatpush.bf16.msra.mxu0 %v1342_v9  ;;  %v1346_v26 = vld [vmem:[%s1484_s8 + $0x48] sm:$0xff]  ;;  %v1345_v30 = vld [vmem:[%s1484_s8 + $0x40] sm:$0xff]  ;;  %v269_v34 = vld [vmem:[%s1479_s28 + $0x10] sm:$0xff] }
  0x1f   : > { %810 = vmatpush.bf16.msra.mxu1 %v1350_v10  ;;  %v1354_v27 = vld [vmem:[%s1484_s8 + $0x88] sm:$0xff]  ;;  %v1353_v31 = vld [vmem:[%s1484_s8 + $0x80] sm:$0xff]  ;;  %v270_v35 = vld [vmem:[%s1479_s28 + $0x18] sm:$0xff]  ;;  %v277_v41 = vpack.c.bf16 %v269_v34, %v269_v34 }
  0x20   : > { %823 = vmatpush.bf16.msra.mxu2 %v1358_v11  ;;  %v1362_v28 = vld [vmem:[%s1484_s8 + $0xc8] sm:$0xff]  ;;  %v1361_v32 = vld [vmem:[%s1484_s8 + $0xc0] sm:$0xff]  ;;  %v1384_v36 = vld [vmem:[%s1484_s8 + $0x178] sm:$0xff]  ;;  %v278_v42 = vpack.c.bf16 %v270_v35, %v270_v35 }
  0x21   : > { %836 = vmatpush.bf16.msra.mxu3 %v1366_v12  ;;  %v267_v37 = vld [vmem:[%s1479_s28] sm:$0xff]  ;;  %v268_v38 = vld [vmem:[%s1479_s28 + $0x8] sm:$0xff]  ;;  %v1392_v39 = vld [vmem:[%s1484_s8 + $0x1b8] sm:$0xff] }
  0x22   : > { %798 = vmatpush.bf16.msra.mxu0 %v1341_v13  ;;  %v1400_v40 = vld [vmem:[%s1484_s8 + $0x1f8] sm:$0xff]  ;;  %v275_v43 = vpack.c.bf16 %v267_v37, %v267_v37  ;;  %v276_v44 = vpack.c.bf16 %v268_v38, %v268_v38  ;;  %v1375_v45 = vld [vmem:[%s1484_s8 + $0x130] sm:$0xff]  ;;  %v1374_v49 = vld [vmem:[%s1484_s8 + $0x128] sm:$0xff] }
  0x23   : > { %811 = vmatpush.bf16.msra.mxu1 %v1349_v14  ;;  %v1383_v46 = vld [vmem:[%s1484_s8 + $0x170] sm:$0xff]  ;;  %v1382_v50 = vld [vmem:[%s1484_s8 + $0x168] sm:$0xff]  ;;  %v1373_v53 = vld [vmem:[%s1484_s8 + $0x120] sm:$0xff] }
  0x24   : > { %824 = vmatpush.bf16.msra.mxu2 %v1357_v15  ;;  %v1391_v47 = vld [vmem:[%s1484_s8 + $0x1b0] sm:$0xff]  ;;  %v1390_v51 = vld [vmem:[%s1484_s8 + $0x1a8] sm:$0xff]  ;;  %v1381_v54 = vld [vmem:[%s1484_s8 + $0x160] sm:$0xff] }
  0x25   : > { %837 = vmatpush.bf16.msra.mxu3 %v1365_v16  ;;  %v1399_v48 = vld [vmem:[%s1484_s8 + $0x1f0] sm:$0xff]  ;;  %v1398_v52 = vld [vmem:[%s1484_s8 + $0x1e8] sm:$0xff]  ;;  %v1389_v55 = vld [vmem:[%s1484_s8 + $0x1a0] sm:$0xff] }
  0x26   : > { %799 = vmatpush.bf16.msra.mxu0 %v1340_v17  ;;  %v1397_v56 = vld [vmem:[%s1484_s8 + $0x1e0] sm:$0xff]  ;;  %v1372_v57 = vld [vmem:[%s1484_s8 + $0x118] sm:$0xff]  ;;  %v1371_v61 = vld [vmem:[%s1484_s8 + $0x110] sm:$0xff] }
  0x27   : > { %812 = vmatpush.bf16.msra.mxu1 %v1348_v18  ;;  %v1380_v58 = vld [vmem:[%s1484_s8 + $0x158] sm:$0xff]  ;;  %v1379_v62 = vld [vmem:[%s1484_s8 + $0x150] sm:$0xff]  ;;  %v1370_v1 = vld [vmem:[%s1484_s8 + $0x108] sm:$0xff] }
  0x28   : > { %825 = vmatpush.bf16.msra.mxu2 %v1356_v19  ;;  %v1388_v59 = vld [vmem:[%s1484_s8 + $0x198] sm:$0xff]  ;;  %v1387_v63 = vld [vmem:[%s1484_s8 + $0x190] sm:$0xff]  ;;  %v1378_v2 = vld [vmem:[%s1484_s8 + $0x148] sm:$0xff] }
  0x29   : > { %838 = vmatpush.bf16.msra.mxu3 %v1364_v20  ;;  %v1396_v60 = vld [vmem:[%s1484_s8 + $0x1d8] sm:$0xff]  ;;  %v1395_v0 = vld [vmem:[%s1484_s8 + $0x1d0] sm:$0xff]  ;;  %v1386_v3 = vld [vmem:[%s1484_s8 + $0x188] sm:$0xff] }
  0x2a   : > { %800 = vmatpush.bf16.msra.mxu0 %v1339_v21  ;;  %v1394_v4 = vld [vmem:[%s1484_s8 + $0x1c8] sm:$0xff]  ;;  %v1369_v5 = vld [vmem:[%s1484_s8 + $0x100] sm:$0xff]  ;;  %v273_v11 = vld [vmem:[%s1479_s28 + $0x30] sm:$0xff] }
  0x2b   : > { %813 = vmatpush.bf16.msra.mxu1 %v1347_v22  ;;  %v1377_v6 = vld [vmem:[%s1484_s8 + $0x140] sm:$0xff]  ;;  %v272_v9 = vld [vmem:[%s1479_s28 + $0x28] sm:$0xff]  ;;  %v274_v12 = vld [vmem:[%s1479_s28 + $0x38] sm:$0xff]  ;;  %v281_v15 = vpack.c.bf16 %v273_v11, %v273_v11 }
  0x2c   : > { %826 = vmatpush.bf16.msra.mxu2 %v1355_v23  ;;  %v1385_v7 = vld [vmem:[%s1484_s8 + $0x180] sm:$0xff]  ;;  %v280_v14 = vpack.c.bf16 %v272_v9, %v272_v9  ;;  %v282_v16 = vpack.c.bf16 %v274_v12, %v274_v12 }
  0x2d   : > { %839 = vmatpush.bf16.msra.mxu3 %v1363_v24  ;;  %v271_v8 = vld [vmem:[%s1479_s28 + $0x20] sm:$0xff] }
  0x2e   : > { %801 = vmatpush.bf16.msra.mxu0 %v1338_v25  ;;  %v1393_v10 = vld [vmem:[%s1484_s8 + $0x1c0] sm:$0xff]  ;;  %v279_v13 = vpack.c.bf16 %v271_v8, %v271_v8 }
  0x2f   : > { %814 = vmatpush.bf16.msra.mxu1 %v1346_v26  ;;  %v266_v37 = vld [vmem:[#allocation2] sm:$0xff] }
  0x30   : > { %827 = vmatpush.bf16.msra.mxu2 %v1354_v27 }
  0x31   : > { %840 = vmatpush.bf16.msra.mxu3 %v1362_v28 }
  0x32   : > { %802 = vmatpush.bf16.msra.mxu0 %v1337_v29 }
  0x33   : > { %815 = vmatpush.bf16.msra.mxu1 %v1345_v30 }
  0x34   : > { %828 = vmatpush.bf16.msra.mxu2 %v1353_v31 }
  0x35   : > { %841 = vmatpush.bf16.msra.mxu3 %v1361_v32  ;;  %803 = vmatmul.bf16.vlgmr.msra.gmra.mxu0 %v275_v43 }
  0x36   : > { %847 = vmatpush.bf16.msrb.mxu0 %v1376_v33  ;;  %816 = vmatmul.bf16.vlgmr.msra.gmra.mxu1 %v276_v44 }
  0x37   : > { %860 = vmatpush.bf16.msrb.mxu1 %v1384_v36  ;;  %829 = vmatmul.bf16.vlgmr.msra.gmra.mxu2 %v277_v41 }
  0x38   : > { %873 = vmatpush.bf16.msrb.mxu2 %v1392_v39  ;;  %842 = vmatmul.bf16.vlgmr.msra.gmra.mxu3 %v278_v42 }
  0x39   : > { %886 = vmatpush.bf16.msrb.mxu3 %v1400_v40 }
  0x3a   : > { %848 = vmatpush.bf16.msrb.mxu0 %v1375_v45 }
  0x3b   : > { %861 = vmatpush.bf16.msrb.mxu1 %v1383_v46 }
  0x3c   : > { %874 = vmatpush.bf16.msrb.mxu2 %v1391_v47 }
  0x3d   : > { %887 = vmatpush.bf16.msrb.mxu3 %v1399_v48 }
  0x3e   : > { %849 = vmatpush.bf16.msrb.mxu0 %v1374_v49 }
  0x3f   : > { %862 = vmatpush.bf16.msrb.mxu1 %v1382_v50 }
  0x40   : > { %875 = vmatpush.bf16.msrb.mxu2 %v1390_v51 }
  0x41   : > { %888 = vmatpush.bf16.msrb.mxu3 %v1398_v52 }
  0x42   : > { %850 = vmatpush.bf16.msrb.mxu0 %v1373_v53 }
  0x43   : > { %863 = vmatpush.bf16.msrb.mxu1 %v1381_v54 }
  0x44   : > { %876 = vmatpush.bf16.msrb.mxu2 %v1389_v55 }
  0x45   : > { %889 = vmatpush.bf16.msrb.mxu3 %v1397_v56 }
  0x46   : > { %851 = vmatpush.bf16.msrb.mxu0 %v1372_v57 }
  0x47   : > { %864 = vmatpush.bf16.msrb.mxu1 %v1380_v58 }
  0x48   : > { %877 = vmatpush.bf16.msrb.mxu2 %v1388_v59 }
  0x49   : > { %890 = vmatpush.bf16.msrb.mxu3 %v1396_v60 }
  0x4a   : > { %852 = vmatpush.bf16.msrb.mxu0 %v1371_v61 }
  0x4b   : > { %865 = vmatpush.bf16.msrb.mxu1 %v1379_v62 }
  0x4c   : > { %878 = vmatpush.bf16.msrb.mxu2 %v1387_v63 }
  0x4d   : > { %891 = vmatpush.bf16.msrb.mxu3 %v1395_v0 }
  0x4e   : > { %853 = vmatpush.bf16.msrb.mxu0 %v1370_v1 }
  0x4f   : > { %866 = vmatpush.bf16.msrb.mxu1 %v1378_v2 }
  0x50   : > { %879 = vmatpush.bf16.msrb.mxu2 %v1386_v3 }
  0x51   : > { %892 = vmatpush.bf16.msrb.mxu3 %v1394_v4 }
  0x52   : > { %854 = vmatpush.bf16.msrb.mxu0 %v1369_v5 }
  0x53   : > { %867 = vmatpush.bf16.msrb.mxu1 %v1377_v6 }
  0x54   : > { %880 = vmatpush.bf16.msrb.mxu2 %v1385_v7 }
  0x55   : > { %893 = vmatpush.bf16.msrb.mxu3 %v1393_v10  ;;  %855 = vmatmul.bf16.vlgmr.msrb.gmra.mxu0 %v279_v13 }
  0x56   : > { %868 = vmatmul.bf16.vlgmr.msrb.gmra.mxu1 %v280_v14 }
  0x57   : > { %881 = vmatmul.bf16.vlgmr.msrb.gmra.mxu2 %v281_v15 }
  0x58   : > { %894 = vmatmul.bf16.vlgmr.msrb.gmra.mxu3 %v282_v16 }
  0xb2   : > { %v804_v17 = vpop.f32.mrf.mxu0 }
  0xb3   : > { %v817_v18 = vpop.f32.mrf.mxu1 }
  0xb4   : > { %v818_v25 = vadd.f32 %v817_v18, %v804_v17 }
  0xba   : > { %v830_v19 = vpop.f32.mrf.mxu2  ;;  %v806_v21 = vpop.f32.mrf.mxu0 }
  0xbb   : > { %v843_v20 = vpop.f32.mrf.mxu3  ;;  %v819_v22 = vpop.f32.mrf.mxu1  ;;  %v831_v26 = vadd.f32 %v830_v19, %v818_v25 }
  0xbd   : > { %v844_v27 = vadd.f32 %v843_v20, %v831_v26 }
  0xc2   : > { %v832_v23 = vpop.f32.mrf.mxu2 }
  0xc3   : > { %v845_v24 = vpop.f32.mrf.mxu3 }
  0xd2   : > { %v856_v28 = vpop.f32.mrf.mxu0 }
  0xd3   : > { %v869_v29 = vpop.f32.mrf.mxu1  ;;  %v857_v30 = vadd.f32 %v856_v28, %v844_v27 }
  0xd5   : > { %v870_v31 = vadd.f32 %v869_v29, %v857_v30 }
  0xda   : > { %v882_v32 = vpop.f32.mrf.mxu2  ;;  %v858_v35 = vpop.f32.mrf.mxu0 }
  0xdb   : > { %v895_v33 = vpop.f32.mrf.mxu3  ;;  %v883_v34 = vadd.f32 %v882_v32, %v870_v31  ;;  %v871_v36 = vpop.f32.mrf.mxu1 }
  0xdd   : > { %v896_v38 = vadd.f32 %v895_v33, %v883_v34 }
  0xdf   : > { %v899_v39 = vadd.f32 %v896_v38, %v266_v37  ;;  %904 = sbr.rel (%p1302_p6) target bundleno = 394 (0x18a), region = 52 }
  0xe1   : > { %900 = vst [vmem:[#allocation2] sm:$0xff] %v899_v39 }
  0xe2   : > { %v884_v40 = vpop.f32.mrf.mxu2 }
  0xe3   : > { %v897_v41 = vpop.f32.mrf.mxu3 }
  0xe4   : > { %v1408_v42 = vld [vmem:[%s1602_s3 + $0x38] sm:$0xff]  ;;  %v1407_v43 = vld [vmem:[%s1602_s3 + $0x30] sm:$0xff]  ;;  %v1406_v44 = vld [vmem:[%s1602_s3 + $0x28] sm:$0xff] }
  0xe5   : > { %981 = vmatpush.bf16.msra.mxu0 %v1408_v42  ;;  %v1405_v45 = vld [vmem:[%s1602_s3 + $0x20] sm:$0xff]  ;;  %v1404_v46 = vld [vmem:[%s1602_s3 + $0x18] sm:$0xff]  ;;  %v1403_v48 = vld [vmem:[%s1602_s3 + $0x10] sm:$0xff] }
  0xe6   : > { %v1418_v47 = vld [vmem:[%s1601_s2] ss:$0 sm:$0xff]  ;;  %v1402_v51 = vld [vmem:[%s1602_s3 + $0x8] sm:$0xff] }
  0xe7   : > { %v1401_v53 = vld [vmem:[%s1602_s3] sm:$0xff] }
  0xe8   : > { %v905_v49 = vld [vmem:[#allocation2] sm:$0xff] }
  0xe9   : > { %982 = vmatpush.bf16.msra.mxu0 %v1407_v43  ;;  %v910_v50 = vadd.f32 %v1418_v47, %v905_v49  ;;  %v1419_v55 = vld [vmem:[%s1603_s4] ss:$0 sm:$0xff] }
  0xea   : > { %v994_v57 = vld [vmem:[%s1604_s5] sm:$0xff] }
  0xeb   : > { %v911_v52 = vmax.f32 %v910_v50, 0.0 }
  0xed   : > { %983 = vmatpush.bf16.msra.mxu0 %v1406_v44  ;;  %v912_v54 = vpack.c.bf16 %v911_v52, %v911_v52 }
  0xf1   : > { %984 = vmatpush.bf16.msra.mxu0 %v1405_v45 }
  0xf5   : > { %985 = vmatpush.bf16.msra.mxu0 %v1404_v46 }
  0xf9   : > { %986 = vmatpush.bf16.msra.mxu0 %v1403_v48 }
  0xfd   : > { %987 = vmatpush.bf16.msra.mxu0 %v1402_v51 }
 0x101   : > { %988 = vmatpush.bf16.msra.mxu0 %v1401_v53 }
 0x104   : > { %989 = vmatmul.bf16.vlgmr.msra.gmra.mxu0 %v912_v54 }
 0x181   : > { %v990_v56 = vpop.f32.mrf.mxu0 }
 0x182   : > { %v991_v58 = vadd.f32 %v1419_v55, %v990_v56 }
 0x184   : > { %v995_v59 = vadd.f32 %v994_v57, %v991_v58 }
 0x186   : > { %996 = vst [vmem:[%s1605_s6] sm:$0xff] %v995_v59 }
 0x189   : > { %v992_v60 = vpop.f32.mrf.mxu0 }
 0x18a PF: > { %s16_s21 = sadd.s32 1, %s1426_s21  }
 0x18b   : > { %p13_p7 = scmp.ge.s32.totalorder %s16_s21, 5  }
 0x18d   :  { %15 = sbr.rel (!%p13_p7) target bundleno = 1 (0x1), region = 81 }

// kernel: _lambda_.11
= control target key start
LH: loop header
LB: loop body
LE: loop exit
PB: predicated region body
PF: predicated region fallthrough
CT: control target
= control target key end

     0   :  { %s1051_s13 = smov 0   ;;  %s1184_s0 = inlined_call_operand.vmem [shape: f32[16,128], index: 0, kind: input, shape index: {}]   ;;  %s1185_s1 = inlined_call_operand.vmem [shape: bf16[128,128], index: 1, kind: input, shape index: {}]   ;;  %s1186_s2 = inlined_call_operand.vmem [shape: f32[1,128], index: 2, kind: input, shape index: {}]   ;;  %s1187_s3 = inlined_call_operand.vmem [shape: bf16[128,128], index: 3, kind: input, shape index: {}]   ;;  %s1188_s4 = inlined_call_operand.vmem [shape: f32[1,128], index: 4, kind: input, shape index: {}]   ;;  %s1189_s5 = inlined_call_operand.vmem [shape: bf16[128,128], index: 5, kind: input, shape index: {}]   ;;  %s1190_s6 = inlined_call_operand.vmem [shape: f32[1,128], index: 6, kind: input, shape index: {}]   ;;  %s1191_s7 = inlined_call_operand.vmem [shape: bf16[128,128], index: 7, kind: input, shape index: {}]   ;;  %s1192_s8 = inlined_call_operand.vmem [shape: f32[1,128], index: 8, kind: input, shape index: {}]   ;;  %s1193_s9 = inlined_call_operand.vmem [shape: f32[16,128], index: 9, kind: output, shape index: {0}]   ;;  %s1194_s10 = inlined_call_operand.vmem [shape: f32[16,128], index: 10, kind: output, shape index: {1}]  }
   0x1 LB: > { %s801_s14 = sadd.s32 4294967295, %s994_s13   ;;  %p805_p0 = scmp.ge.s32.totalorder %s994_s13, 1  ;;  %s994_s13 = sphi %s1051_s13, %s21_s13  }
   0x2   : > { %p314_p1 = scmp.lt.s32.totalorder %s994_s13, 3 }
   0x4   : > { %p315_p2 = pnand %p805_p0, %p314_p1 }
   0x5   : > { %p354_p3 = scmp.lt.s32.totalorder (!%p315_p2), %s801_s14, 1 }
   0x6   : > { %318 = sbr.rel (%p315_p2) target bundleno = 476 (0x1dc), region = 56 }
   0xb   : > { %v955_v0 = vld [vmem:[%s1187_s3 + $0x38] sm:$0xff]  ;;  %v954_v1 = vld [vmem:[%s1187_s3 + $0x30] sm:$0xff]  ;;  %v953_v4 = vld [vmem:[%s1187_s3 + $0x28] sm:$0xff]  ;;  %s1196_s14 = smov (!%p354_p3, %s801_s14), 1 }
   0xc   : > { %518 = vmatpush.bf16.msra.mxu1 %v955_v0  ;;  %v963_v2 = vld [vmem:[%s1189_s5 + $0x38] sm:$0xff]  ;;  %v962_v3 = vld [vmem:[%s1189_s5 + $0x30] sm:$0xff]  ;;  %v961_v5 = vld [vmem:[%s1189_s5 + $0x28] sm:$0xff]  ;;  %s1092_s19 = sshll.u32 %s1196_s14, 3 }
   0xd   : > { %601 = vmatpush.bf16.msra.mxu2 %v963_v2  ;;  %v952_v6 = vld [vmem:[%s1187_s3 + $0x20] sm:$0xff]  ;;  %v951_v8 = vld [vmem:[%s1187_s3 + $0x18] sm:$0xff]  ;;  %v950_v10 = vld [vmem:[%s1187_s3 + $0x10] sm:$0xff]  ;;  %s357_s26 = scalar_lea.vmem %s1184_s0, %s1092_s19  ;;  %s361_s18 = scalar_lea.vmem %s1193_s9, %s1092_s19 }
   0xe   : > { %v960_v7 = vld [vmem:[%s1189_s5 + $0x20] sm:$0xff]  ;;  %v959_v9 = vld [vmem:[%s1189_s5 + $0x18] sm:$0xff]  ;;  %v958_v11 = vld [vmem:[%s1189_s5 + $0x10] sm:$0xff]  ;;  %s365_s24 = scalar_lea.vmem %s1194_s10, %s1092_s19 }
   0xf   : > { %v949_v12 = vld [vmem:[%s1187_s3 + $0x8] sm:$0xff]  ;;  %v948_v13 = vld [vmem:[%s1187_s3] sm:$0xff]  ;;  %v971_v18 = vld [vmem:[%s1191_s7 + $0x38] sm:$0xff] }
  0x10   : > { %519 = vmatpush.bf16.msra.mxu1 %v954_v1  ;;  %v366_v14 = vld [vmem:[%s357_s26] sm:$0xff]  ;;  %v957_v16 = vld [vmem:[%s1189_s5 + $0x8] sm:$0xff]  ;;  %684 = vmatpush.bf16.msra.mxu3 %v971_v18  ;;  %v970_v19 = vld [vmem:[%s1191_s7 + $0x30] sm:$0xff] }
  0x11   : > { %602 = vmatpush.bf16.msra.mxu2 %v962_v3  ;;  %v367_v15 = vpack.c.bf16 %v366_v14, %v366_v14  ;;  %v956_v17 = vld [vmem:[%s1189_s5] sm:$0xff]  ;;  %v947_v20 = vld [vmem:[%s1185_s1 + $0x38] sm:$0xff]  ;;  %v969_v21 = vld [vmem:[%s1191_s7 + $0x28] sm:$0xff] }
  0x12   : > { %436 = vmatpush.bf16.msra.mxu0 %v947_v20  ;;  %v968_v22 = vld [vmem:[%s1191_s7 + $0x20] sm:$0xff]  ;;  %v967_v23 = vld [vmem:[%s1191_s7 + $0x18] sm:$0xff]  ;;  %v966_v24 = vld [vmem:[%s1191_s7 + $0x10] sm:$0xff] }
  0x13   : > { %v980_v25 = vld [vmem:[%s1188_s4] ss:$0 sm:$0xff]  ;;  %v965_v31 = vld [vmem:[%s1191_s7 + $0x8] sm:$0xff]  ;;  %v946_v32 = vld [vmem:[%s1185_s1 + $0x30] sm:$0xff] }
  0x14   : > { %520 = vmatpush.bf16.msra.mxu1 %v953_v4  ;;  %685 = vmatpush.bf16.msra.mxu3 %v970_v19  ;;  %v964_v33 = vld [vmem:[%s1191_s7] sm:$0xff]  ;;  %v945_v34 = vld [vmem:[%s1185_s1 + $0x28] sm:$0xff]  ;;  %v943_v36 = vld [vmem:[%s1185_s1 + $0x18] sm:$0xff] }
  0x15   : > { %603 = vmatpush.bf16.msra.mxu2 %v961_v5  ;;  %v944_v35 = vld [vmem:[%s1185_s1 + $0x20] sm:$0xff]  ;;  %v942_v37 = vld [vmem:[%s1185_s1 + $0x10] sm:$0xff]  ;;  %v941_v38 = vld [vmem:[%s1185_s1 + $0x8] sm:$0xff] }
  0x16   : > { %437 = vmatpush.bf16.msra.mxu0 %v946_v32  ;;  %v940_v39 = vld [vmem:[%s1185_s1] sm:$0xff] }
  0x17   : > { %v981_v40 = vld [vmem:[%s1190_s6] ss:$0 sm:$0xff] }
  0x18   : > { %521 = vmatpush.bf16.msra.mxu1 %v952_v6  ;;  %686 = vmatpush.bf16.msra.mxu3 %v969_v21  ;;  %v983_v47 = vld [vmem:[%s1186_s2] ss:$0 sm:$0xff] }
  0x19   : > { %604 = vmatpush.bf16.msra.mxu2 %v960_v7  ;;  %v982_v50 = vld [vmem:[%s1192_s8] ss:$0 sm:$0xff] }
  0x1a   : > { %438 = vmatpush.bf16.msra.mxu0 %v945_v34 }
  0x1c   : > { %522 = vmatpush.bf16.msra.mxu1 %v951_v8  ;;  %687 = vmatpush.bf16.msra.mxu3 %v968_v22 }
  0x1d   : > { %605 = vmatpush.bf16.msra.mxu2 %v959_v9 }
  0x1e   : > { %439 = vmatpush.bf16.msra.mxu0 %v944_v35 }
  0x20   : > { %523 = vmatpush.bf16.msra.mxu1 %v950_v10  ;;  %688 = vmatpush.bf16.msra.mxu3 %v967_v23 }
  0x21   : > { %606 = vmatpush.bf16.msra.mxu2 %v958_v11 }
  0x22   : > { %440 = vmatpush.bf16.msra.mxu0 %v943_v36 }
  0x24   : > { %524 = vmatpush.bf16.msra.mxu1 %v949_v12  ;;  %689 = vmatpush.bf16.msra.mxu3 %v966_v24 }
  0x25   : > { %607 = vmatpush.bf16.msra.mxu2 %v957_v16 }
  0x26   : > { %441 = vmatpush.bf16.msra.mxu0 %v942_v37 }
  0x28   : > { %525 = vmatpush.bf16.msra.mxu1 %v948_v13  ;;  %690 = vmatpush.bf16.msra.mxu3 %v965_v31 }
  0x29   : > { %608 = vmatpush.bf16.msra.mxu2 %v956_v17 }
  0x2a   : > { %442 = vmatpush.bf16.msra.mxu0 %v941_v38 }
  0x2b   : > { %526 = vmatmul.bf16.vlgmr.msra.gmra.mxu1 %v367_v15 }
  0x2c   : > { %691 = vmatpush.bf16.msra.mxu3 %v964_v33 }
  0x2e   : > { %443 = vmatpush.bf16.msra.mxu0 %v940_v39 }
  0x31   : > { %444 = vmatmul.bf16.vlgmr.msra.gmra.mxu0 %v367_v15 }
  0xa8   : > { %v527_v26 = vpop.f32.mrf.mxu1 }
  0xa9   : > { %v528_v27 = vadd.f32 %v980_v25, %v527_v26 }
  0xab   : > { %v531_v28 = vmax.f32 %v528_v27, 0.0 }
  0xad   : > { %v532_v29 = vpack.c.bf16 %v531_v28, %v531_v28 }
  0xae   : > { %v445_v46 = vpop.f32.mrf.mxu0 }
  0xaf   : > { %609 = vmatmul.bf16.vlgmr.msra.gmra.mxu2 %v532_v29  ;;  %v446_v49 = vadd.f32 %v983_v47, %v445_v46 }
  0xb0   : > { %v529_v30 = vpop.f32.mrf.mxu1 }
  0xb1   : > { %449 = vst [vmem:[%s361_s18] sm:$0xff] %v446_v49 }
  0xb6   : > { %v447_v48 = vpop.f32.mrf.mxu0 }
 0x132   : > { %v610_v41 = vpop.f32.mrf.mxu2 }
 0x133   : > { %v611_v42 = vadd.f32 %v981_v40, %v610_v41 }
 0x135   : > { %v614_v43 = vmax.f32 %v611_v42, 0.0 }
 0x137   : > { %v615_v44 = vpack.c.bf16 %v614_v43, %v614_v43 }
 0x139   : > { %692 = vmatmul.bf16.vlgmr.msra.gmra.mxu3 %v615_v44 }
 0x13a   : > { %v612_v45 = vpop.f32.mrf.mxu2 }
 0x1bc   : > { %v693_v51 = vpop.f32.mrf.mxu3 }
 0x1bd   : > { %v694_v52 = vadd.f32 %v982_v50, %v693_v51 }
 0x1bf   : > { %v937_v53 = vmul.f32 -1.442695, %v694_v52 }
 0x1c1   : > { %984 = vpow2.f32 %v937_v53 }
 0x1c4   : > { %v695_v54 = vpop.f32.mrf.mxu3 }
 0x1c7   : > { %v985_v55 = vpop.eup %984 }
 0x1c8   : > { %v700_v56 = vadd.f32 1.0, %v985_v55 }
 0x1ca   : > { %986 = vrcp.f32 %v700_v56  ;;  %v712_v60 = vand.u32 2147483648, %v700_v56  ;;  %v710_v62 = vand.u32 2147483647, %v700_v56  ;;  %vm706_vm1 = vweird.f32 %v700_v56 }
 0x1cc   : > { %v713_v0 = vor.u32 1.1754944e-38, %v712_v60  ;;  %vm711_vm3 = vcmp.eq.f32.partialorder %v710_v62, 8.507059e+37 }
 0x1d0   : > { %v987_v57 = vpop.eup %986 }
 0x1d1   : > { %v702_v58 = vmul.f32 %v987_v57, %v700_v56  ;;  %vm707_vm0 = vweird.f32 %v987_v57 }
 0x1d2   : > { %vm708_vm2 = vmor %vm706_vm1, %vm707_vm0 }
 0x1d3   : > { %v703_v59 = vsub.f32 1.0, %v702_v58 }
 0x1d5   : > { %v704_v61 = vmul.f32 %v987_v57, %v703_v59 }
 0x1d7   : > { %v705_v63 = vadd.f32 %v987_v57, %v704_v61 }
 0x1d9   : > { %v709_v1 = vsel %vm708_vm2, %v987_v57, %v705_v63 }
 0x1da   : > { %v714_v2 = vsel %vm711_vm3, %v713_v0, %v709_v1 }
 0x1db   : > { %716 = vst [vmem:[%s365_s24] sm:$0xff] %v714_v2 }
 0x1dc PF: > { %s21_s13 = sadd.s32 1, %s994_s13  }
 0x1dd   : > { %p18_p4 = scmp.ge.s32.totalorder %s21_s13, 4  }
 0x1df   :  { %20 = sbr.rel (!%p18_p4) target bundleno = 1 (0x1), region = 98 }

// kernel: _lambda_.7
= control target key start
LH: loop header
LB: loop body
LE: loop exit
PB: predicated region body
PF: predicated region fallthrough
CT: control target
= control target key end

     0   :  { %s2821_s18 = smov 0   ;;  %s3319_s0 = inlined_call_operand.vmem [shape: f32[2,4,128], index: 0, kind: input, shape index: {}]   ;;  %s3320_s1 = inlined_call_operand.vmem [shape: bf16[4,128,8], index: 1, kind: input, shape index: {}]   ;;  %s3321_s2 = inlined_call_operand.vmem [shape: f32[4,1,8], index: 2, kind: input, shape index: {}]   ;;  %s3322_s3 = inlined_call_operand.vmem [shape: bf16[4,128,8], index: 3, kind: input, shape index: {}]   ;;  %s3323_s4 = inlined_call_operand.vmem [shape: f32[4,1,8], index: 4, kind: input, shape index: {}]   ;;  %s3324_s5 = inlined_call_operand.vmem [shape: bf16[4,128,8], index: 5, kind: input, shape index: {}]   ;;  %s3325_s6 = inlined_call_operand.vmem [shape: f32[4,1,8], index: 6, kind: input, shape index: {}]   ;;  %s3326_s7 = inlined_call_operand.vmem [shape: bf16[4,8,128], index: 7, kind: input, shape index: {}]   ;;  %s3327_s8 = inlined_call_operand.vmem [shape: f32[1,128], index: 8, kind: input, shape index: {}]   ;;  %s3328_s9 = inlined_call_operand.vmem [shape: f32[2,128], index: 9, kind: input, shape index: {}]   ;;  %s3329_s10 = inlined_call_operand.vmem [shape: bf16[128,128], index: 10, kind: input, shape index: {}]   ;;  %s3330_s11 = inlined_call_operand.vmem [shape: f32[1,128], index: 11, kind: input, shape index: {}]   ;;  %s3331_s12 = inlined_call_operand.vmem [shape: bf16[128,128], index: 12, kind: input, shape index: {}]   ;;  %s3332_s13 = inlined_call_operand.vmem [shape: f32[1,128], index: 13, kind: input, shape index: {}]   ;;  %s3333_s14 = inlined_call_operand.vmem [shape: f32[2,128], index: 14, kind: input, shape index: {}]   ;;  %s3334_s15 = inlined_call_operand.vmem [shape: f32[2,4,128], index: 15, kind: output, shape index: {}]  }
   0x1 LB: > { %s2109_s19 = sadd.s32 4294967295, %s2739_s18   ;;  %p2113_p0 = scmp.ge.s32.totalorder %s2739_s18, 1  ;;  %s2739_s18 = sphi %s2821_s18, %s25_s18  }
   0x2   : > { %p436_p1 = scmp.lt.s32.totalorder %s2739_s18, 3 }
   0x4   : > { %p437_p2 = pnand %p2113_p0, %p436_p1 }
   0x5   : > { %p482_p3 = scmp.lt.s32.totalorder (!%p437_p2), %s2109_s19, 1 }
   0x6   : > { %440 = sbr.rel (%p437_p2) target bundleno = 1471 (0x5bf), region = 80 }
   0xb   : > { %v2585_v0 = vld [vmem:[%s3320_s1 + $0x38] sm:$0xff]  ;;  %v2584_v3 = vld [vmem:[%s3320_s1 + $0x30] sm:$0xff]  ;;  %v2583_v8 = vld [vmem:[%s3320_s1 + $0x28] sm:$0xff]  ;;  %s3336_s19 = smov (!%p482_p3, %s2109_s19), 1  ;;  %vm1478_vm0 = vcmask 64512   ;;  %vm1664_vm1 = vcmask 1041408  }
   0xc   : > { %v2593_v1 = vld [vmem:[%s3320_s1 + $0x78] sm:$0xff]  ;;  %762 = vmatpush.bf16.msra.mxu0 %v2585_v0  ;;  %v2592_v4 = vld [vmem:[%s3320_s1 + $0x70] sm:$0xff]  ;;  %v2591_v9 = vld [vmem:[%s3320_s1 + $0x68] sm:$0xff]  ;;  %s2114_s27 = sshll.u32 %s3336_s19, 2  ;;  %vm1555_vm2 = vcmask 27648   ;;  %vm1660_vm7 = vcmask 31744  }
   0xd   : > { %v2601_v2 = vld [vmem:[%s3320_s1 + $0xb8] sm:$0xff]  ;;  %823 = vmatpush.bf16.msra.mxu1 %v2593_v1  ;;  %v2600_v5 = vld [vmem:[%s3320_s1 + $0xb0] sm:$0xff]  ;;  %v2599_v10 = vld [vmem:[%s3320_s1 + $0xa8] sm:$0xff]  ;;  %s485_s25 = scalar_lea.vmem %s3319_s0, %s2114_s27  ;;  %s489_s24 = scalar_lea.vmem %s3334_s15, %s2114_s27 }
   0xe   : > { %884 = vmatpush.bf16.msra.mxu2 %v2601_v2  ;;  %v2609_v6 = vld [vmem:[%s3320_s1 + $0xf8] sm:$0xff]  ;;  %v2608_v7 = vld [vmem:[%s3320_s1 + $0xf0] sm:$0xff]  ;;  %v2607_v11 = vld [vmem:[%s3320_s1 + $0xe8] sm:$0xff] }
   0xf   : > { %945 = vmatpush.bf16.msra.mxu3 %v2609_v6  ;;  %v2582_v12 = vld [vmem:[%s3320_s1 + $0x20] sm:$0xff]  ;;  %v2581_v16 = vld [vmem:[%s3320_s1 + $0x18] sm:$0xff]  ;;  %v2580_v19 = vld [vmem:[%s3320_s1 + $0x10] sm:$0xff] }
  0x10   : > { %763 = vmatpush.bf16.msra.mxu0 %v2584_v3  ;;  %v2590_v13 = vld [vmem:[%s3320_s1 + $0x60] sm:$0xff]  ;;  %v2589_v17 = vld [vmem:[%s3320_s1 + $0x58] sm:$0xff]  ;;  %v2588_v20 = vld [vmem:[%s3320_s1 + $0x50] sm:$0xff] }
  0x11   : > { %824 = vmatpush.bf16.msra.mxu1 %v2592_v4  ;;  %v2598_v14 = vld [vmem:[%s3320_s1 + $0xa0] sm:$0xff]  ;;  %v2597_v18 = vld [vmem:[%s3320_s1 + $0x98] sm:$0xff]  ;;  %v2596_v22 = vld [vmem:[%s3320_s1 + $0x90] sm:$0xff] }
  0x12   : > { %885 = vmatpush.bf16.msra.mxu2 %v2600_v5  ;;  %v2606_v15 = vld [vmem:[%s3320_s1 + $0xe0] sm:$0xff]  ;;  %v2605_v21 = vld [vmem:[%s3320_s1 + $0xd8] sm:$0xff]  ;;  %v2579_v23 = vld [vmem:[%s3320_s1 + $0x8] sm:$0xff] }
  0x13   : > { %946 = vmatpush.bf16.msra.mxu3 %v2608_v7  ;;  %v2587_v24 = vld [vmem:[%s3320_s1 + $0x48] sm:$0xff]  ;;  %v2604_v25 = vld [vmem:[%s3320_s1 + $0xd0] sm:$0xff]  ;;  %v2578_v28 = vld [vmem:[%s3320_s1] sm:$0xff] }
  0x14   : > { %764 = vmatpush.bf16.msra.mxu0 %v2583_v8  ;;  %v2595_v26 = vld [vmem:[%s3320_s1 + $0x88] sm:$0xff]  ;;  %v2586_v29 = vld [vmem:[%s3320_s1 + $0x40] sm:$0xff]  ;;  %v2617_v31 = vld [vmem:[%s3322_s3 + $0x38] sm:$0xff] }
  0x15   : > { %825 = vmatpush.bf16.msra.mxu1 %v2591_v9  ;;  %v2603_v27 = vld [vmem:[%s3320_s1 + $0xc8] sm:$0xff]  ;;  %v2931_v30 = vld [vmem:[%s485_s25] sm:$0xf]  ;;  %v2625_v32 = vld [vmem:[%s3322_s3 + $0x78] sm:$0xff] }
  0x16   : > { %886 = vmatpush.bf16.msra.mxu2 %v2599_v10  ;;  %v2594_v33 = vld [vmem:[%s3320_s1 + $0x80] sm:$0xff]  ;;  %v2633_v34 = vld [vmem:[%s3322_s3 + $0xb8] sm:$0xff]  ;;  %v2947_v35 = vpack.c.bf16 %v2931_v30, %v2931_v30  ;;  %v2616_v37 = vld [vmem:[%s3322_s3 + $0x30] sm:$0xff] }
  0x17   : > { %947 = vmatpush.bf16.msra.mxu3 %v2607_v11  ;;  %v2602_v36 = vld [vmem:[%s3320_s1 + $0xc0] sm:$0xff]  ;;  %v2624_v38 = vld [vmem:[%s3322_s3 + $0x70] sm:$0xff]  ;;  %v2641_v39 = vld [vmem:[%s3322_s3 + $0xf8] sm:$0xff] }
  0x18   : > { %765 = vmatpush.bf16.msra.mxu0 %v2582_v12  ;;  %v2632_v40 = vld [vmem:[%s3322_s3 + $0xb0] sm:$0xff]  ;;  %v2615_v41 = vld [vmem:[%s3322_s3 + $0x28] sm:$0xff]  ;;  %v2614_v45 = vld [vmem:[%s3322_s3 + $0x20] sm:$0xff] }
  0x19   : > { %826 = vmatpush.bf16.msra.mxu1 %v2590_v13  ;;  %v2623_v42 = vld [vmem:[%s3322_s3 + $0x68] sm:$0xff]  ;;  %v2640_v43 = vld [vmem:[%s3322_s3 + $0xf0] sm:$0xff]  ;;  %v2622_v46 = vld [vmem:[%s3322_s3 + $0x60] sm:$0xff] }
  0x1a   : > { %887 = vmatpush.bf16.msra.mxu2 %v2598_v14  ;;  %v2631_v44 = vld [vmem:[%s3322_s3 + $0xa8] sm:$0xff]  ;;  %v2630_v48 = vld [vmem:[%s3322_s3 + $0xa0] sm:$0xff]  ;;  %v2613_v49 = vld [vmem:[%s3322_s3 + $0x18] sm:$0xff] }
  0x1b   : > { %948 = vmatpush.bf16.msra.mxu3 %v2606_v15  ;;  %v2639_v47 = vld [vmem:[%s3322_s3 + $0xe8] sm:$0xff]  ;;  %v2621_v50 = vld [vmem:[%s3322_s3 + $0x58] sm:$0xff]  ;;  %v2638_v51 = vld [vmem:[%s3322_s3 + $0xe0] sm:$0xff] }
  0x1c   : > { %766 = vmatpush.bf16.msra.mxu0 %v2581_v16  ;;  %v2629_v52 = vld [vmem:[%s3322_s3 + $0x98] sm:$0xff]  ;;  %v2612_v53 = vld [vmem:[%s3322_s3 + $0x10] sm:$0xff]  ;;  %v2611_v57 = vld [vmem:[%s3322_s3 + $0x8] sm:$0xff] }
  0x1d   : > { %827 = vmatpush.bf16.msra.mxu1 %v2589_v17  ;;  %v2620_v54 = vld [vmem:[%s3322_s3 + $0x50] sm:$0xff]  ;;  %v2637_v55 = vld [vmem:[%s3322_s3 + $0xd8] sm:$0xff]  ;;  %v2619_v58 = vld [vmem:[%s3322_s3 + $0x48] sm:$0xff] }
  0x1e   : > { %888 = vmatpush.bf16.msra.mxu2 %v2597_v18  ;;  %v2628_v56 = vld [vmem:[%s3322_s3 + $0x90] sm:$0xff]  ;;  %v2627_v60 = vld [vmem:[%s3322_s3 + $0x88] sm:$0xff]  ;;  %v2610_v61 = vld [vmem:[%s3322_s3] sm:$0xff] }
  0x1f   : > { %949 = vmatpush.bf16.msra.mxu3 %v2605_v21  ;;  %v2636_v59 = vld [vmem:[%s3322_s3 + $0xd0] sm:$0xff]  ;;  %v2618_v62 = vld [vmem:[%s3322_s3 + $0x40] sm:$0xff]  ;;  %v2635_v63 = vld [vmem:[%s3322_s3 + $0xc8] sm:$0xff] }
  0x20   : > { %767 = vmatpush.bf16.msra.mxu0 %v2580_v19  ;;  %v2626_v0 = vld [vmem:[%s3322_s3 + $0x80] sm:$0xff]  ;;  %v2665_v1 = vld [vmem:[%s3324_s5 + $0xb8] sm:$0xff]  ;;  %v2664_v4 = vld [vmem:[%s3324_s5 + $0xb0] sm:$0xff] }
  0x21   : > { %828 = vmatpush.bf16.msra.mxu1 %v2588_v20  ;;  %v2634_v2 = vld [vmem:[%s3322_s3 + $0xc0] sm:$0xff]  ;;  %v2673_v3 = vld [vmem:[%s3324_s5 + $0xf8] sm:$0xff]  ;;  %v2672_v5 = vld [vmem:[%s3324_s5 + $0xf0] sm:$0xff] }
  0x22   : > { %889 = vmatpush.bf16.msra.mxu2 %v2596_v22  ;;  %v2663_v6 = vld [vmem:[%s3324_s5 + $0xa8] sm:$0xff]  ;;  %v2662_v8 = vld [vmem:[%s3324_s5 + $0xa0] sm:$0xff]  ;;  %v2661_v9 = vld [vmem:[%s3324_s5 + $0x98] sm:$0xff] }
  0x23   : > { %950 = vmatpush.bf16.msra.mxu3 %v2604_v25  ;;  %v2671_v7 = vld [vmem:[%s3324_s5 + $0xe8] sm:$0xff]  ;;  %v2670_v10 = vld [vmem:[%s3324_s5 + $0xe0] sm:$0xff]  ;;  %v2669_v11 = vld [vmem:[%s3324_s5 + $0xd8] sm:$0xff] }
  0x24   : > { %768 = vmatpush.bf16.msra.mxu0 %v2579_v23  ;;  %v2660_v12 = vld [vmem:[%s3324_s5 + $0x90] sm:$0xff]  ;;  %v2659_v13 = vld [vmem:[%s3324_s5 + $0x88] sm:$0xff]  ;;  %v2658_v15 = vld [vmem:[%s3324_s5 + $0x80] sm:$0xff] }
  0x25   : > { %829 = vmatpush.bf16.msra.mxu1 %v2587_v24  ;;  %v2668_v14 = vld [vmem:[%s3324_s5 + $0xd0] sm:$0xff]  ;;  %v2667_v16 = vld [vmem:[%s3324_s5 + $0xc8] sm:$0xff]  ;;  %v2666_v17 = vld [vmem:[%s3324_s5 + $0xc0] sm:$0xff] }
  0x26   : > { %890 = vmatpush.bf16.msra.mxu2 %v2595_v26  ;;  %v2702_v26 = vld [vmem:[%s3323_s4] ss:$0 sm:$0xff] }
  0x27   : > { %951 = vmatpush.bf16.msra.mxu3 %v2603_v27  ;;  %v2703_v27 = vld [vmem:[%s3323_s4 + $0x1] ss:$0 sm:$0xff] }
  0x28   : > { %769 = vmatpush.bf16.msra.mxu0 %v2578_v28 }
  0x29   : > { %830 = vmatpush.bf16.msra.mxu1 %v2586_v29 }
  0x2a   : > { %891 = vmatpush.bf16.msra.mxu2 %v2594_v33  ;;  %v2698_v33 = vld [vmem:[%s3321_s2] ss:$0 sm:$0xff] }
  0x2b   : > { %770 = vmatmul.bf16.vlgmr.msra.gmra.mxu0 %v2947_v35  ;;  %952 = vmatpush.bf16.msra.mxu3 %v2602_v36 }
  0x2c   : > { %1018 = vmatpush.bf16.msrb.mxu0 %v2617_v31  ;;  %831 = vmatmul.bf16.vlgmr.msra.gmra.mxu1 %v2947_v35 }
  0x2d   : > { %1079 = vmatpush.bf16.msrb.mxu1 %v2625_v32  ;;  %892 = vmatmul.bf16.vlgmr.msra.gmra.mxu2 %v2947_v35 }
  0x2e   : > { %1140 = vmatpush.bf16.msrb.mxu2 %v2633_v34  ;;  %953 = vmatmul.bf16.vlgmr.msra.gmra.mxu3 %v2947_v35  ;;  %v2699_v34 = vld [vmem:[%s3321_s2 + $0x1] ss:$0 sm:$0xff] }
  0x2f   : > { %1201 = vmatpush.bf16.msrb.mxu3 %v2641_v39 }
  0x30   : > { %1019 = vmatpush.bf16.msrb.mxu0 %v2616_v37 }
  0x31   : > { %1080 = vmatpush.bf16.msrb.mxu1 %v2624_v38 }
  0x32   : > { %1141 = vmatpush.bf16.msrb.mxu2 %v2632_v40  ;;  %v2704_v40 = vld [vmem:[%s3323_s4 + $0x2] ss:$0 sm:$0xff] }
  0x33   : > { %1202 = vmatpush.bf16.msrb.mxu3 %v2640_v43 }
  0x34   : > { %1020 = vmatpush.bf16.msrb.mxu0 %v2615_v41 }
  0x35   : > { %1081 = vmatpush.bf16.msrb.mxu1 %v2623_v42 }
  0x36   : > { %1142 = vmatpush.bf16.msrb.mxu2 %v2631_v44 }
  0x37   : > { %1203 = vmatpush.bf16.msrb.mxu3 %v2639_v47 }
  0x38   : > { %1021 = vmatpush.bf16.msrb.mxu0 %v2614_v45  ;;  %v2705_v45 = vld [vmem:[%s3323_s4 + $0x3] ss:$0 sm:$0xff] }
  0x39   : > { %1082 = vmatpush.bf16.msrb.mxu1 %v2622_v46 }
  0x3a   : > { %1143 = vmatpush.bf16.msrb.mxu2 %v2630_v48 }
  0x3b   : > { %1204 = vmatpush.bf16.msrb.mxu3 %v2638_v51 }
  0x3c   : > { %1022 = vmatpush.bf16.msrb.mxu0 %v2613_v49 }
  0x3d   : > { %1083 = vmatpush.bf16.msrb.mxu1 %v2621_v50 }
  0x3e   : > { %1144 = vmatpush.bf16.msrb.mxu2 %v2629_v52 }
  0x3f   : > { %1205 = vmatpush.bf16.msrb.mxu3 %v2637_v55 }
  0x40   : > { %1023 = vmatpush.bf16.msrb.mxu0 %v2612_v53 }
  0x41   : > { %1084 = vmatpush.bf16.msrb.mxu1 %v2620_v54 }
  0x42   : > { %1145 = vmatpush.bf16.msrb.mxu2 %v2628_v56 }
  0x43   : > { %1206 = vmatpush.bf16.msrb.mxu3 %v2636_v59 }
  0x44   : > { %1024 = vmatpush.bf16.msrb.mxu0 %v2611_v57  ;;  %v2700_v57 = vld [vmem:[%s3321_s2 + $0x2] ss:$0 sm:$0xff] }
  0x45   : > { %1085 = vmatpush.bf16.msrb.mxu1 %v2619_v58  ;;  %v2701_v58 = vld [vmem:[%s3321_s2 + $0x3] ss:$0 sm:$0xff] }
  0x46   : > { %1146 = vmatpush.bf16.msrb.mxu2 %v2627_v60 }
  0x47   : > { %1207 = vmatpush.bf16.msrb.mxu3 %v2635_v63 }
  0x48   : > { %1025 = vmatpush.bf16.msrb.mxu0 %v2610_v61 }
  0x49   : > { %1086 = vmatpush.bf16.msrb.mxu1 %v2618_v62 }
  0x4a   : > { %1147 = vmatpush.bf16.msrb.mxu2 %v2626_v0  ;;  %v2706_v0 = vld [vmem:[%s3325_s6 + $0x2] ss:$0 sm:$0xff] }
  0x4b   : > { %1026 = vmatmul.bf16.vlgmr.msrb.gmra.mxu0 %v2947_v35  ;;  %1208 = vmatpush.bf16.msrb.mxu3 %v2634_v2 }
  0x4c   : > { %1087 = vmatmul.bf16.vlgmr.msrb.gmra.mxu1 %v2947_v35 }
  0x4d   : > { %1148 = vmatmul.bf16.vlgmr.msrb.gmra.mxu2 %v2947_v35 }
  0x4e   : > { %1396 = vmatpush.bf16.msra.mxu2 %v2665_v1  ;;  %1209 = vmatmul.bf16.vlgmr.msrb.gmra.mxu3 %v2947_v35 }
  0x4f   : > { %1457 = vmatpush.bf16.msra.mxu3 %v2673_v3 }
  0x52   : > { %1397 = vmatpush.bf16.msra.mxu2 %v2664_v4  ;;  %v2707_v4 = vld [vmem:[%s3325_s6 + $0x3] ss:$0 sm:$0xff] }
  0x53   : > { %1458 = vmatpush.bf16.msra.mxu3 %v2672_v5 }
  0x56   : > { %1398 = vmatpush.bf16.msra.mxu2 %v2663_v6 }
  0x57   : > { %1459 = vmatpush.bf16.msra.mxu3 %v2671_v7 }
  0x5a   : > { %1399 = vmatpush.bf16.msra.mxu2 %v2662_v8 }
  0x5b   : > { %1460 = vmatpush.bf16.msra.mxu3 %v2670_v10 }
  0x5e   : > { %1400 = vmatpush.bf16.msra.mxu2 %v2661_v9 }
  0x5f   : > { %1461 = vmatpush.bf16.msra.mxu3 %v2669_v11 }
  0x62   : > { %1401 = vmatpush.bf16.msra.mxu2 %v2660_v12  ;;  %v2649_v12 = vld [vmem:[%s3324_s5 + $0x38] sm:$0xff] }
  0x63   : > { %1462 = vmatpush.bf16.msra.mxu3 %v2668_v14  ;;  %1274 = vmatpush.bf16.msra.mxu0 %v2649_v12  ;;  %v2648_v14 = vld [vmem:[%s3324_s5 + $0x30] sm:$0xff] }
  0x66   : > { %1402 = vmatpush.bf16.msra.mxu2 %v2659_v13  ;;  %v2657_v13 = vld [vmem:[%s3324_s5 + $0x78] sm:$0xff] }
  0x67   : > { %1463 = vmatpush.bf16.msra.mxu3 %v2667_v16  ;;  %1335 = vmatpush.bf16.msra.mxu1 %v2657_v13 }
  0x68   : > { %1275 = vmatpush.bf16.msra.mxu0 %v2648_v14 }
  0x6a   : > { %1403 = vmatpush.bf16.msra.mxu2 %v2658_v15  ;;  %v2656_v15 = vld [vmem:[%s3324_s5 + $0x70] sm:$0xff] }
  0x6b   : > { %1464 = vmatpush.bf16.msra.mxu3 %v2666_v17  ;;  %1336 = vmatpush.bf16.msra.mxu1 %v2656_v15 }
  0x6d   : > { %1404 = vmatmul.bf16.vlgmr.msra.gmra.mxu2 %v2947_v35 }
  0x6e   : > { %1465 = vmatmul.bf16.vlgmr.msra.gmra.mxu3 %v2947_v35 }
  0xa8   : > { %v771_v18 = vpop.f32.mrf.mxu0 }
  0xa9   : > { %v832_v19 = vpop.f32.mrf.mxu1  ;;  %v772_v41 = vadd.f32 %v2698_v33, %v771_v18  ;;  %v2647_v18 = vld [vmem:[%s3324_s5 + $0x28] sm:$0xff]  ;;  %v2644_v33 = vld [vmem:[%s3324_s5 + $0x10] sm:$0xff] }
  0xaa   : > { %v833_v42 = vadd.f32 %v2699_v34, %v832_v19  ;;  %1276 = vmatpush.bf16.msra.mxu0 %v2647_v18  ;;  %v2654_v34 = vld [vmem:[%s3324_s5 + $0x60] sm:$0xff] }
  0xab   : > { %v1470_v48 = vpack.c.bf16 %v772_v41, %v772_v41  ;;  %v2650_v41 = vld [vmem:[%s3324_s5 + $0x40] sm:$0xff] }
  0xac   : > { %v1471_v49 = vpack.c.bf16 %v833_v42, %v833_v42 }
  0xb0   : > { %v773_v20 = vpop.f32.mrf.mxu0  ;;  %v893_v22 = vpop.f32.mrf.mxu2 }
  0xb1   : > { %v834_v21 = vpop.f32.mrf.mxu1  ;;  %v954_v23 = vpop.f32.mrf.mxu3  ;;  %v894_v60 = vadd.f32 %v2700_v57, %v893_v22  ;;  %v2646_v20 = vld [vmem:[%s3324_s5 + $0x20] sm:$0xff] }
  0xb2   : > { %v955_v61 = vadd.f32 %v2701_v58, %v954_v23  ;;  %1277 = vmatpush.bf16.msra.mxu0 %v2646_v20 }
  0xb3   : > { %v1472_v62 = vpack.c.bf16 %v894_v60, %v894_v60 }
  0xb4   : > { %v1473_v63 = vpack.c.bf16 %v955_v61, %v955_v61  ;;  %v2708_v61 = vld [vmem:[%s3325_s6] ss:$0 sm:$0xff] }
  0xb8   : > { %v895_v24 = vpop.f32.mrf.mxu2 }
  0xb9   : > { %v956_v25 = vpop.f32.mrf.mxu3 }
  0xc8   : > { %v1027_v28 = vpop.f32.mrf.mxu0 }
  0xc9   : > { %v1088_v29 = vpop.f32.mrf.mxu1  ;;  %v1028_v31 = vadd.f32 %v2702_v26, %v1027_v28 }
  0xca   : > { %v1089_v32 = vadd.f32 %v2703_v27, %v1088_v29 }
  0xcb   : > { %v1474_v36 = vpack.c.bf16 %v1028_v31, %v1028_v31  ;;  %v2645_v31 = vld [vmem:[%s3324_s5 + $0x18] sm:$0xff] }
  0xcc   : > { %v1475_v37 = vpack.c.bf16 %v1089_v32, %v1089_v32  ;;  %v2655_v32 = vld [vmem:[%s3324_s5 + $0x68] sm:$0xff]  ;;  %1278 = vmatpush.bf16.msra.mxu0 %v2645_v31 }
  0xcd   : > { %v1483_v38 = vsel %vm1478_vm0, %v1474_v36, 0  ;;  %1337 = vmatpush.bf16.msra.mxu1 %v2655_v32  ;;  %v2643_v36 = vld [vmem:[%s3324_s5 + $0x8] sm:$0xff] }
  0xce   : > { %v1502_v39 = vsel %vm1478_vm0, %v1475_v37, 0  ;;  %1492 = vmatpush.bf16.xpose.msrb.mxu2 %v1483_v38  ;;  %v2653_v37 = vld [vmem:[%s3324_s5 + $0x58] sm:$0xff]  ;;  %v2642_v38 = vld [vmem:[%s3324_s5] sm:$0xff] }
  0xcf   : > { %1511 = vmatpush.bf16.xpose.msrb.mxu3 %v1502_v39  ;;  %v2652_v39 = vld [vmem:[%s3324_s5 + $0x50] sm:$0xff] }
  0xd0   : > { %v1029_v43 = vpop.f32.mrf.mxu0  ;;  %v1149_v46 = vpop.f32.mrf.mxu2  ;;  %1279 = vmatpush.bf16.msra.mxu0 %v2644_v33 }
  0xd1   : > { %v1090_v44 = vpop.f32.mrf.mxu1  ;;  %v1150_v47 = vadd.f32 %v2704_v40, %v1149_v46  ;;  %v1210_v50 = vpop.f32.mrf.mxu3  ;;  %1338 = vmatpush.bf16.msra.mxu1 %v2654_v34  ;;  %v2651_v40 = vld [vmem:[%s3324_s5 + $0x48] sm:$0xff] }
  0xd2   : > { %v1211_v52 = vadd.f32 %v2705_v45, %v1210_v50 }
  0xd3   : > { %v1476_v51 = vpack.c.bf16 %v1150_v47, %v1150_v47 }
  0xd4   : > { %v1477_v54 = vpack.c.bf16 %v1211_v52, %v1211_v52  ;;  %1280 = vmatpush.bf16.msra.mxu0 %v2643_v36 }
  0xd5   : > { %2500 = vmatmul.msk.bf16.vlgmr.msrb.gmra.mxu2 %vm1478_vm0, %v1470_v48  ;;  %v1521_v53 = vsel %vm1478_vm0, %v1476_v51, 0  ;;  %1339 = vmatpush.bf16.msra.mxu1 %v2653_v37 }
  0xd6   : > { %2501 = vmatmul.msk.bf16.vlgmr.msrb.gmra.mxu3 %vm1478_vm0, %v1471_v49  ;;  %1530 = vmatpush.bf16.xpose.msra.mxu2 %v1521_v53  ;;  %v1540_v55 = vsel %vm1478_vm0, %v1477_v54, 0 }
  0xd7   : > { %1549 = vmatpush.bf16.xpose.msra.mxu3 %v1540_v55 }
  0xd8   : > { %v1151_v56 = vpop.f32.mrf.mxu2  ;;  %1281 = vmatpush.bf16.msra.mxu0 %v2642_v38 }
  0xd9   : > { %v1212_v59 = vpop.f32.mrf.mxu3  ;;  %1340 = vmatpush.bf16.msra.mxu1 %v2652_v39 }
  0xdb   : > { %1282 = vmatmul.bf16.vlgmr.msra.gmra.mxu0 %v2947_v35 }
  0xdd   : > { %1341 = vmatpush.bf16.msra.mxu1 %v2651_v40 }
  0xe1   : > { %1342 = vmatpush.bf16.msra.mxu1 %v2650_v41 }
  0xe4   : > { %1343 = vmatmul.bf16.vlgmr.msra.gmra.mxu1 %v2947_v35 }
  0xe5   : > { %2502 = vmatmul.msk.bf16.vlgmr.msra.gmra.mxu2 %vm1478_vm0, %v1472_v62 }
  0xe6   : > { %2503 = vmatmul.msk.bf16.vlgmr.msra.gmra.mxu3 %vm1478_vm0, %v1473_v63 }
  0xf0   : > { %v1405_v1 = vpop.f32.mrf.mxu2 }
  0xf1   : > { %v1406_v2 = vadd.f32 %v2706_v0, %v1405_v1  ;;  %v1466_v6 = vpop.f32.mrf.mxu3 }
  0xf2   : > { %v1467_v7 = vadd.f32 %v2707_v4, %v1466_v6 }
  0xf3   : > { %v1658_v3 = vpack.c.bf16 %v1406_v2, %v1406_v2  ;;  %v2709_v2 = vld [vmem:[%s3325_s6 + $0x1] ss:$0 sm:$0xff] }
  0xf4   : > { %v1659_v9 = vpack.c.bf16 %v1467_v7, %v1467_v7 }
  0xf5   : > { %v1704_v5 = vsel %vm1664_vm1, %v1658_v3, 0 }
  0xf6   : > { %1713 = vmatpush.bf16.msrb.mxu2 %v1704_v5  ;;  %v1723_v10 = vsel %vm1664_vm1, %v1659_v9, 0 }
  0xf7   : > { %1732 = vmatpush.bf16.msrb.mxu3 %v1723_v10 }
  0xf8   : > { %v1407_v8 = vpop.f32.mrf.mxu2 }
  0xf9   : > { %v1468_v11 = vpop.f32.mrf.mxu3 }
 0x158   : > { %v1494_v16 = vpop.f32.mrf.mxu2  ;;  %v1283_v62 = vpop.f32.mrf.mxu0 }
 0x159   : > { %v1513_v17 = vpop.f32.mrf.mxu3  ;;  %v1556_v19 = vsel %vm1555_vm2, %v1494_v16, -inf  ;;  %v1284_v63 = vadd.f32 %v2708_v61, %v1283_v62 }
 0x15a   : > { %1557 = vmax.xlane.f32.xlu1 %v1556_v19  ;;  %v1559_v23 = vsel %vm1555_vm2, %v1513_v17, -inf }
 0x15b   : > { %v1656_v0 = vpack.c.bf16 %v1284_v63, %v1284_v63 }
 0x15d   : > { %v1666_v1 = vsel %vm1664_vm1, %v1656_v0, 0 }
 0x15e   : > { %1675 = vmatpush.bf16.msrb.mxu0 %v1666_v1  ;;  %v697_v1 = vld [vmem:[%s3326_s7 + $0x4] sm:$0xf] }
 0x160   : > { %v1496_v21 = vpop.f32.mrf.mxu2  ;;  %v1285_v4 = vpop.f32.mrf.mxu0 }
 0x161   : > { %v1515_v22 = vpop.f32.mrf.mxu3  ;;  %v1344_v3 = vpop.f32.mrf.mxu1  ;;  %v699_v4 = vld [vmem:[%s3326_s7 + $0xc] sm:$0xf] }
 0x162   : > { %1560 = vmax.xlane.f32.xlu1 %v1559_v23  ;;  %v1345_v5 = vadd.f32 %v2709_v2, %v1344_v3 }
 0x164   : > { %v1657_v6 = vpack.c.bf16 %v1345_v5, %v1345_v5 }
 0x166   : > { %v1685_v7 = vsel %vm1664_vm1, %v1657_v6, 0 }
 0x167   : > { %1694 = vmatpush.bf16.msrb.mxu1 %v1685_v7 }
 0x168   : > { %v1532_v24 = vpop.f32.mrf.mxu2 }
 0x169   : > { %v1551_v25 = vpop.f32.mrf.mxu3  ;;  %v1562_v26 = vsel %vm1555_vm2, %v1532_v24, -inf  ;;  %v1346_v8 = vpop.f32.mrf.mxu1 }
 0x16a   : > { %1563 = vmax.xlane.f32.xlu0 %v1562_v26  ;;  %v1565_v29 = vsel %vm1555_vm2, %v1551_v25, -inf }
 0x170   : > { %v1534_v27 = vpop.f32.mrf.mxu2 }
 0x171   : > { %v1553_v28 = vpop.f32.mrf.mxu3 }
 0x172   : > { %1566 = vmax.xlane.f32.xlu0 %v1565_v29 }
 0x1cd   : > { %v1558_v42 = vpop.xlane.xlu1 %1557 }
 0x1ce   : > { %v1568_v43 = vsub.f32 %v1494_v16, %v1558_v42 }
 0x1d0   : > { %v1572_v44 = vmul.f32 1.442695, %v1568_v43 }
 0x1d2   : > { %2713 = vpow2.f32 %v1572_v44 }
 0x1d5   : > { %v1561_v45 = vpop.xlane.xlu1 %1560 }
 0x1d6   : > { %v1569_v46 = vsub.f32 %v1513_v17, %v1561_v45 }
 0x1d8   : > { %v2714_v47 = vpop.eup %2713  ;;  %v1574_v48 = vmul.f32 1.442695, %v1569_v46 }
 0x1d9   : > { %v1580_v49 = vsel %vm1555_vm2, %v2714_v47, 0.0 }
 0x1da   : > { %2715 = vpow2.f32 %v1574_v48  ;;  %1581 = vadd.xlane.f32.xlu0 %v1580_v49 }
 0x1dd   : > { %v1564_v50 = vpop.xlane.xlu0 %1563 }
 0x1de   : > { %v1570_v51 = vsub.f32 %v1532_v24, %v1564_v50 }
 0x1e0   : > { %v3192_v52 = vpop.eup %2715  ;;  %v1576_v53 = vmul.f32 1.442695, %v1570_v51 }
 0x1e1   : > { %v1583_v35 = vsel %vm1555_vm2, %v3192_v52, 0.0 }
 0x1e2   : > { %2717 = vpow2.f32 %v1576_v53  ;;  %1584 = vadd.xlane.f32.xlu1 %v1583_v35 }
 0x1e5   : > { %v1567_v54 = vpop.xlane.xlu0 %1566 }
 0x1e6   : > { %v1571_v55 = vsub.f32 %v1551_v25, %v1567_v54 }
 0x1e8   : > { %v3196_v56 = vpop.eup %2717  ;;  %v1578_v57 = vmul.f32 1.442695, %v1571_v55 }
 0x1e9   : > { %v1586_v58 = vsel %vm1555_vm2, %v3196_v56, 0.0 }
 0x1ea   : > { %2719 = vpow2.f32 %v1578_v57  ;;  %1587 = vadd.xlane.f32.xlu2 %v1586_v58 }
 0x1f0   : > { %v3200_v59 = vpop.eup %2719 }
 0x1f1   : > { %v1589_v60 = vsel %vm1555_vm2, %v3200_v59, 0.0 }
 0x1f2   : > { %1590 = vadd.xlane.f32.xlu2 %v1589_v60 }
 0x24d   : > { %v1582_v9 = vpop.xlane.xlu0 %1581 }
 0x24e   : > { %2721 = vrcp.f32 %v1582_v9  ;;  %v1603_v14 = vand.u32 2147483648, %v1582_v9  ;;  %v1601_v16 = vand.u32 2147483647, %v1582_v9  ;;  %vm1597_vm4 = vweird.f32 %v1582_v9 }
 0x250   : > { %v1604_v19 = vor.u32 1.1754944e-38, %v1603_v14  ;;  %vm1602_vm6 = vcmp.eq.f32.partialorder %v1601_v16, 8.507059e+37 }
 0x254   : > { %v2722_v10 = vpop.eup %2721 }
 0x255   : > { %v1593_v11 = vmul.f32 %v2722_v10, %v1582_v9  ;;  %v1585_v12 = vpop.xlane.xlu1 %1584  ;;  %vm1598_vm3 = vweird.f32 %v2722_v10 }
 0x256   : > { %2723 = vrcp.f32 %v1585_v12  ;;  %vm1599_vm5 = vmor %vm1597_vm4, %vm1598_vm3  ;;  %v1618_v26 = vand.u32 2147483648, %v1585_v12  ;;  %v1616_v28 = vand.u32 2147483647, %v1585_v12  ;;  %vm1612_vm9 = vweird.f32 %v1585_v12 }
 0x257   : > { %v1594_v13 = vsub.f32 1.0, %v1593_v11 }
 0x258   : > { %v1619_v33 = vor.u32 1.1754944e-38, %v1618_v26  ;;  %vm1617_vm11 = vcmp.eq.f32.partialorder %v1616_v28, 8.507059e+37 }
 0x259   : > { %v1595_v15 = vmul.f32 %v2722_v10, %v1594_v13 }
 0x25b   : > { %v1596_v17 = vadd.f32 %v2722_v10, %v1595_v15 }
 0x25c   : > { %v2724_v18 = vpop.eup %2723 }
 0x25d   : > { %v1600_v20 = vsel %vm1599_vm5, %v2722_v10, %v1596_v17  ;;  %v1608_v21 = vmul.f32 %v2724_v18, %v1585_v12  ;;  %v1588_v22 = vpop.xlane.xlu2 %1587  ;;  %vm1613_vm8 = vweird.f32 %v2724_v18  ;;  %vm1745_vm5 = vcmask 1043456  }
 0x25e   : > { %v1605_v23 = vsel %vm1602_vm6, %v1604_v19, %v1600_v20  ;;  %2725 = vrcp.f32 %v1588_v22  ;;  %vm1614_vm10 = vmor %vm1612_vm9, %vm1613_vm8  ;;  %v1633_v41 = vand.u32 2147483648, %v1588_v22  ;;  %v1631_v43 = vand.u32 2147483647, %v1588_v22 }
 0x25f   : > { %v1606_v24 = vmul.f32 %v2714_v47, %v1605_v23  ;;  %v1609_v25 = vsub.f32 1.0, %v1608_v21  ;;  %vm1627_vm13 = vweird.f32 %v1588_v22  ;;  %v1766_v2 = vsel %vm1745_vm5, %v697_v1, 0 }
 0x260   : > { %v1634_v47 = vor.u32 1.1754944e-38, %v1633_v41  ;;  %vm1632_vm15 = vcmp.eq.f32.partialorder %v1631_v43, 8.507059e+37  ;;  %1775 = vmatpush.bf16.msra.mxu1 %v1766_v2  ;;  %v1804_v5 = vsel %vm1745_vm5, %v699_v4, 0  ;;  %v2681_v41 = vld [vmem:[%s3329_s10 + $0x38] sm:$0xff]  ;;  %v2678_v43 = vld [vmem:[%s3329_s10 + $0x20] sm:$0xff] }
 0x261   : > { %v1610_v27 = vmul.f32 %v2724_v18, %v1609_v25  ;;  %v1652_v29 = vpack.c.bf16 %v1606_v24, %v1606_v24  ;;  %1813 = vmatpush.bf16.msra.mxu3 %v1804_v5  ;;  %v1830_v2 = vld [vmem:[%s3328_s9] sm:$0x3] }
 0x262   : > { %v1856_v4 = vperm.slane %v1830_v2, 0 }
 0x263   : > { %v1611_v31 = vadd.f32 %v2724_v18, %v1610_v27  ;;  %2504 = vmatmul.msk.bf16.vlgmr.msrb.gmra.mxu0 %vm1660_vm7, %v1652_v29 }
 0x264   : > { %v2726_v32 = vpop.eup %2725 }
 0x265   : > { %v1615_v34 = vsel %vm1614_vm10, %v2724_v18, %v1611_v31  ;;  %v1623_v36 = vmul.f32 %v2726_v32, %v1588_v22  ;;  %v1591_v37 = vpop.xlane.xlu2 %1590  ;;  %vm1628_vm12 = vweird.f32 %v2726_v32  ;;  %v2710_v31 = vld [vmem:[%s3327_s8] ss:$0 sm:$0xff] }
 0x266   : > { %v1620_v38 = vsel %vm1617_vm11, %v1619_v33, %v1615_v34  ;;  %2727 = vrcp.f32 %v1591_v37  ;;  %vm1629_vm14 = vmor %vm1627_vm13, %vm1628_vm12  ;;  %v1648_v53 = vand.u32 2147483648, %v1591_v37  ;;  %v1646_v54 = vand.u32 2147483647, %v1591_v37 }
 0x267   : > { %v1621_v39 = vmul.f32 %v3192_v52, %v1620_v38  ;;  %v1624_v40 = vsub.f32 1.0, %v1623_v36  ;;  %vm1642_vm2 = vweird.f32 %v1591_v37 }
 0x268   : > { %v1649_v58 = vor.u32 1.1754944e-38, %v1648_v53  ;;  %vm1647_vm4 = vcmp.eq.f32.partialorder %v1646_v54, 8.507059e+37  ;;  %v2689_v53 = vld [vmem:[%s3331_s12 + $0x38] sm:$0xff]  ;;  %v2688_v54 = vld [vmem:[%s3331_s12 + $0x30] sm:$0xff] }
 0x269   : > { %v1625_v42 = vmul.f32 %v2726_v32, %v1624_v40  ;;  %v1653_v44 = vpack.c.bf16 %v1621_v39, %v1621_v39 }
 0x26b   : > { %v1626_v45 = vadd.f32 %v2726_v32, %v1625_v42  ;;  %2505 = vmatmul.msk.bf16.vlgmr.msrb.gmra.mxu1 %vm1660_vm7, %v1653_v44  ;;  %v2680_v42 = vld [vmem:[%s3329_s10 + $0x30] sm:$0xff]  ;;  %v2677_v44 = vld [vmem:[%s3329_s10 + $0x18] sm:$0xff] }
 0x26c   : > { %v2728_v46 = vpop.eup %2727  ;;  %2012 = vmatpush.bf16.msrb.mxu1 %v2689_v53 }
 0x26d   : > { %v1630_v48 = vsel %vm1629_vm14, %v2726_v32, %v1626_v45  ;;  %v1638_v49 = vmul.f32 %v2728_v46, %v1591_v37  ;;  %vm1643_vm1 = vweird.f32 %v2728_v46  ;;  %v2676_v45 = vld [vmem:[%s3329_s10 + $0x10] sm:$0xff] }
 0x26e   : > { %v1635_v50 = vsel %vm1632_vm15, %v1634_v47, %v1630_v48  ;;  %vm1644_vm3 = vmor %vm1642_vm2, %vm1643_vm1  ;;  %v2674_v47 = vld [vmem:[%s3329_s10] sm:$0xff] }
 0x26f   : > { %v1636_v51 = vmul.f32 %v3196_v56, %v1635_v50  ;;  %v1639_v52 = vsub.f32 1.0, %v1638_v49  ;;  %v696_v56 = vld [vmem:[%s3326_s7] sm:$0xf] }
 0x270   : > { %v1747_v0 = vsel %vm1745_vm5, %v696_v56, 0  ;;  %2013 = vmatpush.bf16.msrb.mxu1 %v2688_v54 }
 0x271   : > { %v1640_v35 = vmul.f32 %v2728_v46, %v1639_v52  ;;  %v1654_v55 = vpack.c.bf16 %v1636_v51, %v1636_v51  ;;  %1756 = vmatpush.bf16.msra.mxu0 %v1747_v0  ;;  %v2684_v0 = vld [vmem:[%s3331_s12 + $0x10] sm:$0xff] }
 0x273   : > { %v1641_v57 = vadd.f32 %v2728_v46, %v1640_v35  ;;  %2506 = vmatmul.msk.bf16.vlgmr.msrb.gmra.mxu2 %vm1660_vm7, %v1654_v55 }
 0x275   : > { %v1645_v60 = vsel %vm1644_vm3, %v2728_v46, %v1641_v57  ;;  %1946 = vmatpush.bf16.msrb.mxu0 %v2681_v41  ;;  %v2675_v46 = vld [vmem:[%s3329_s10 + $0x8] sm:$0xff] }
 0x276   : > { %v1650_v61 = vsel %vm1647_vm4, %v1649_v58, %v1645_v60  ;;  %v2687_v57 = vld [vmem:[%s3331_s12 + $0x28] sm:$0xff]  ;;  %v2686_v58 = vld [vmem:[%s3331_s12 + $0x20] sm:$0xff] }
 0x277   : > { %v1651_v62 = vmul.f32 %v3200_v59, %v1650_v61  ;;  %v698_v59 = vld [vmem:[%s3326_s7 + $0x8] sm:$0xf]  ;;  %2014 = vmatpush.bf16.msrb.mxu1 %v2687_v57 }
 0x278   : > { %v1785_v3 = vsel %vm1745_vm5, %v698_v59, 0 }
 0x279   : > { %v1655_v63 = vpack.c.bf16 %v1651_v62, %v1651_v62  ;;  %1794 = vmatpush.bf16.msra.mxu2 %v1785_v3  ;;  %1947 = vmatpush.bf16.msrb.mxu0 %v2680_v42  ;;  %v2685_v62 = vld [vmem:[%s3331_s12 + $0x18] sm:$0xff] }
 0x27b   : > { %2507 = vmatmul.msk.bf16.vlgmr.msrb.gmra.mxu3 %vm1660_vm7, %v1655_v63  ;;  %2015 = vmatpush.bf16.msrb.mxu1 %v2686_v58 }
 0x27f   : > { %2016 = vmatpush.bf16.msrb.mxu1 %v2685_v62 }
 0x283   : > { %2017 = vmatpush.bf16.msrb.mxu1 %v2684_v0 }
 0x2e0   : > { %v1677_v6 = vpop.f32.mrf.mxu0 }
 0x2e1   : > { %v1738_v7 = vpack.c.bf16 %v1677_v6, %v1677_v6 }
 0x2e3   : > { %2508 = vmatmul.msk.bf16.vlgmr.msra.gmra.mxu0 %vm1478_vm0, %v1738_v7  ;;  %v1858_v7 = vperm.slane %v1830_v2, 1 }
 0x2e8   : > { %v1679_v8 = vpop.f32.mrf.mxu0  ;;  %v1696_v9 = vpop.f32.mrf.mxu1 }
 0x2e9   : > { %v1739_v10 = vpack.c.bf16 %v1696_v9, %v1696_v9 }
 0x2eb   : > { %2509 = vmatmul.msk.bf16.vlgmr.msra.gmra.mxu1 %vm1478_vm0, %v1739_v10 }
 0x2f0   : > { %v1698_v11 = vpop.f32.mrf.mxu1 }
 0x2f1   : > { %v2683_v11 = vld [vmem:[%s3331_s12 + $0x8] sm:$0xff] }
 0x2f2   : > { %2018 = vmatpush.bf16.msrb.mxu1 %v2683_v11 }
 0x2f6   : > { %v1715_v12 = vpop.f32.mrf.mxu2 }
 0x2f7   : > { %v1740_v13 = vpack.c.bf16 %v1715_v12, %v1715_v12  ;;  %v2682_v12 = vld [vmem:[%s3331_s12] sm:$0xff] }
 0x2f8   : > { %2019 = vmatpush.bf16.msrb.mxu1 %v2682_v12 }
 0x2f9   : > { %2510 = vmatmul.msk.bf16.vlgmr.msra.gmra.mxu2 %vm1478_vm0, %v1740_v13  ;;  %v2711_v13 = vld [vmem:[%s3330_s11] ss:$0 sm:$0xff] }
 0x2fe   : > { %v1717_v14 = vpop.f32.mrf.mxu2  ;;  %v1734_v15 = vpop.f32.mrf.mxu3 }
 0x2ff   : > { %v1741_v16 = vpack.c.bf16 %v1734_v15, %v1734_v15 }
 0x301   : > { %2511 = vmatmul.msk.bf16.vlgmr.msra.gmra.mxu3 %vm1478_vm0, %v1741_v16 }
 0x306   : > { %v1736_v17 = vpop.f32.mrf.mxu3 }
 0x360   : > { %v1758_v18 = vpop.f32.mrf.mxu0 }
 0x361   : > { %v1819_v24 = vsel %vm1745_vm5, %v1758_v18, 0.0 }
 0x368   : > { %v1760_v19 = vpop.f32.mrf.mxu0  ;;  %v1777_v20 = vpop.f32.mrf.mxu1 }
 0x369   : > { %v1820_v23 = vsel %vm1745_vm5, %v1777_v20, 0.0  ;;  %v2712_v19 = vld [vmem:[%s3332_s13] ss:$0 sm:$0xff] }
 0x36a   : > { %v1821_v26 = vadd.f32 %v1820_v23, %v1819_v24 }
 0x370   : > { %v1779_v21 = vpop.f32.mrf.mxu1 }
 0x37c   : > { %v1796_v22 = vpop.f32.mrf.mxu2 }
 0x37d   : > { %v1822_v25 = vsel %vm1745_vm5, %v1796_v22, 0.0 }
 0x37e   : > { %v1823_v27 = vadd.f32 %v1822_v25, %v1821_v26 }
 0x384   : > { %v1798_v28 = vpop.f32.mrf.mxu2  ;;  %v1815_v29 = vpop.f32.mrf.mxu3 }
 0x385   : > { %v1824_v32 = vsel %vm1745_vm5, %v1815_v29, 0.0 }
 0x386   : > { %v1825_v33 = vadd.f32 %v1824_v32, %v1823_v27 }
 0x388   : > { %v1829_v34 = vadd.f32 %v2710_v31, %v1825_v33 }
 0x38a   : > { %v1831_v36 = vadd.f32 %v1829_v34, %v2931_v30  ;;  %v2679_v30 = vld [vmem:[%s3329_s10 + $0x28] sm:$0xff] }
 0x38b   : > { %1948 = vmatpush.bf16.msrb.mxu0 %v2679_v30 }
 0x38c   : > { %v1817_v37 = vpop.f32.mrf.mxu3  ;;  %v1832_v38 = vsel %vm1745_vm5, %v1831_v36, 0.0  ;;  %v1836_v39 = vmul.f32 %v1831_v36, %v1831_v36 }
 0x38d   : > { %1833 = vadd.xlane.f32.xlu2 %v1832_v38 }
 0x38e   : > { %v1837_v40 = vsel %vm1745_vm5, %v1836_v39, 0.0 }
 0x38f   : > { %1838 = vadd.xlane.f32.xlu0 %v1837_v40  ;;  %1949 = vmatpush.bf16.msrb.mxu0 %v2678_v43  ;;  %v2025_v40 = vld [vmem:[%s3333_s14] sm:$0x3] }
 0x390   : > { %v2051_v43 = vperm.slane %v2025_v40, 0 }
 0x393   : > { %1950 = vmatpush.bf16.msrb.mxu0 %v2677_v44 }
 0x397   : > { %1951 = vmatpush.bf16.msrb.mxu0 %v2676_v45  ;;  %v2053_v45 = vperm.slane %v2025_v40, 1 }
 0x39b   : > { %1952 = vmatpush.bf16.msrb.mxu0 %v2675_v46 }
 0x39f   : > { %1953 = vmatpush.bf16.msrb.mxu0 %v2674_v47 }
 0x400   : > { %v1834_v48 = vpop.xlane.xlu2 %1833 }
 0x401   : > { %v1835_v49 = vmul.f32 0.03125, %v1834_v48 }
 0x402   : > { %v1839_v50 = vpop.xlane.xlu0 %1838 }
 0x403   : > { %v1841_v51 = vmul.f32 %v1835_v49, %v1835_v49  ;;  %v1840_v52 = vmul.f32 0.03125, %v1839_v50  ;;  %v1843_v3 = vsub.f32 %v1831_v36, %v1835_v49 }
 0x405   : > { %v1842_v35 = vsub.f32 %v1840_v52, %v1841_v51 }
 0x407   : > { %v1844_v55 = vadd.f32 1e-05, %v1842_v35 }
 0x409   : > { %2729 = vrsqrt.f32 %v1844_v55  ;;  %vm1851_vm6 = vweird.f32 %v1844_v55 }
 0x40f   : > { %v2730_v60 = vpop.eup %2729 }
 0x410   : > { %v1846_v61 = vmul.f32 %v2730_v60, %v1844_v55  ;;  %vm1852_vm0 = vweird.f32 %v2730_v60 }
 0x411   : > { %vm1853_vm7 = vmor %vm1851_vm6, %vm1852_vm0 }
 0x412   : > { %v1847_v63 = vmul.f32 %v2730_v60, %v1846_v61 }
 0x414   : > { %v1848_v56 = vmul.f32 0.5, %v1847_v63 }
 0x416   : > { %v1849_v1 = vsub.f32 1.5, %v1848_v56 }
 0x418   : > { %v1850_v59 = vmul.f32 %v2730_v60, %v1849_v1 }
 0x41a   : > { %v1854_v5 = vsel %vm1853_vm7, %v2730_v60, %v1850_v59 }
 0x41b   : > { %v1855_v6 = vmul.f32 %v1854_v5, %v1843_v3 }
 0x41d   : > { %v1857_v8 = vmul.f32 %v1856_v4, %v1855_v6 }
 0x41f   : > { %v1859_v9 = vadd.f32 %v1858_v7, %v1857_v8 }
 0x421   : > { %v1894_v10 = vpack.c.bf16 %v1859_v9, %v1859_v9 }
 0x423   : > { %1954 = vmatmul.bf16.vlgmr.msrb.gmra.mxu0 %v1894_v10 }
 0x4a0   : > { %v1955_v14 = vpop.f32.mrf.mxu0 }
 0x4a1   : > { %v1956_v15 = vadd.f32 %v2711_v13, %v1955_v14 }
 0x4a3   : > { %v1959_v16 = vmax.f32 %v1956_v15, 0.0 }
 0x4a5   : > { %v1960_v17 = vpack.c.bf16 %v1959_v16, %v1959_v16 }
 0x4a7   : > { %2020 = vmatmul.bf16.vlgmr.msrb.gmra.mxu1 %v1960_v17 }
 0x4a8   : > { %v1957_v18 = vpop.f32.mrf.mxu0 }
 0x524   : > { %v2021_v20 = vpop.f32.mrf.mxu1 }
 0x525   : > { %v2022_v21 = vadd.f32 %v2712_v19, %v2021_v20 }
 0x527   : > { %v2026_v22 = vadd.f32 %v2022_v21, %v1859_v9 }
 0x529   : > { %v2027_v23 = vsel %vm1745_vm5, %v2026_v22, 0.0  ;;  %v2031_v24 = vmul.f32 %v2026_v22, %v2026_v22 }
 0x52a   : > { %2028 = vadd.xlane.f32.xlu1 %v2027_v23 }
 0x52b   : > { %v2032_v25 = vsel %vm1745_vm5, %v2031_v24, 0.0 }
 0x52c   : > { %v2023_v26 = vpop.f32.mrf.mxu1  ;;  %2033 = vadd.xlane.f32.xlu2 %v2032_v25 }
 0x59d   : > { %v2029_v27 = vpop.xlane.xlu1 %2028 }
 0x59e   : > { %v2030_v28 = vmul.f32 0.03125, %v2029_v27 }
 0x59f   : > { %v2034_v29 = vpop.xlane.xlu2 %2033 }
 0x5a0   : > { %v2036_v31 = vmul.f32 %v2030_v28, %v2030_v28  ;;  %v2035_v32 = vmul.f32 0.03125, %v2034_v29  ;;  %v2038_v30 = vsub.f32 %v2026_v22, %v2030_v28 }
 0x5a2   : > { %v2037_v33 = vsub.f32 %v2035_v32, %v2036_v31 }
 0x5a4   : > { %v2039_v34 = vadd.f32 1e-05, %v2037_v33 }
 0x5a6   : > { %2731 = vrsqrt.f32 %v2039_v34  ;;  %vm2046_vm9 = vweird.f32 %v2039_v34 }
 0x5ac   : > { %v2732_v36 = vpop.eup %2731 }
 0x5ad   : > { %v2041_v37 = vmul.f32 %v2732_v36, %v2039_v34  ;;  %vm2047_vm8 = vweird.f32 %v2732_v36 }
 0x5ae   : > { %vm2048_vm10 = vmor %vm2046_vm9, %vm2047_vm8 }
 0x5af   : > { %v2042_v38 = vmul.f32 %v2732_v36, %v2041_v37 }
 0x5b1   : > { %v2043_v39 = vmul.f32 0.5, %v2042_v38 }
 0x5b3   : > { %v2044_v41 = vsub.f32 1.5, %v2043_v39 }
 0x5b5   : > { %v2045_v42 = vmul.f32 %v2732_v36, %v2044_v41 }
 0x5b7   : > { %v2049_v44 = vsel %vm2048_vm10, %v2732_v36, %v2045_v42 }
 0x5b8   : > { %v2050_v46 = vmul.f32 %v2049_v44, %v2038_v30 }
 0x5ba   : > { %v2052_v47 = vmul.f32 %v2051_v43, %v2050_v46 }
 0x5bc   : > { %v2054_v48 = vadd.f32 %v2053_v45, %v2052_v47 }
 0x5be   : > { %2055 = vst [vmem:[%s489_s24] sm:$0xf] %v2054_v48 }
 0x5bf PF: > { %s25_s18 = sadd.s32 1, %s2739_s18  }
 0x5c0   : > { %p22_p4 = scmp.ge.s32.totalorder %s25_s18, 4  }
 0x5c2   :  { %24 = sbr.rel (!%p22_p4) target bundleno = 1 (0x1), region = 110 }

// kernel: _lambda_.9
= control target key start
LH: loop header
LB: loop body
LE: loop exit
PB: predicated region body
PF: predicated region fallthrough
CT: control target
= control target key end

     0   :  { %s5044_s29 = smov 0   ;;  %s5935_s0 = inlined_call_operand.vmem [shape: f32[2,8,128], index: 0, kind: input, shape index: {}]   ;;  %s5936_s1 = inlined_call_operand.vmem [shape: f32[2,4,128], index: 1, kind: input, shape index: {}]   ;;  %s5937_s2 = inlined_call_operand.vmem [shape: bf16[4,128,8], index: 2, kind: input, shape index: {}]   ;;  %s5938_s3 = inlined_call_operand.vmem [shape: f32[4,1,8], index: 3, kind: input, shape index: {}]   ;;  %s5939_s4 = inlined_call_operand.vmem [shape: bf16[4,128,8], index: 4, kind: input, shape index: {}]   ;;  %s5940_s5 = inlined_call_operand.vmem [shape: f32[4,1,8], index: 5, kind: input, shape index: {}]   ;;  %s5941_s6 = inlined_call_operand.vmem [shape: bf16[4,128,8], index: 6, kind: input, shape index: {}]   ;;  %s5942_s7 = inlined_call_operand.vmem [shape: f32[4,1,8], index: 7, kind: input, shape index: {}]   ;;  %s5943_s8 = inlined_call_operand.vmem [shape: bf16[4,8,128], index: 8, kind: input, shape index: {}]   ;;  %s5944_s9 = inlined_call_operand.vmem [shape: f32[1,128], index: 9, kind: input, shape index: {}]   ;;  %s5945_s10 = inlined_call_operand.vmem [shape: f32[2,128], index: 10, kind: input, shape index: {}]   ;;  %s5946_s11 = inlined_call_operand.vmem [shape: bf16[4,128,8], index: 11, kind: input, shape index: {}]   ;;  %s5947_s12 = inlined_call_operand.vmem [shape: f32[4,1,8], index: 12, kind: input, shape index: {}]   ;;  %s5948_s13 = inlined_call_operand.vmem [shape: bf16[4,128,8], index: 13, kind: input, shape index: {}]   ;;  %s5949_s14 = inlined_call_operand.vmem [shape: f32[4,1,8], index: 14, kind: input, shape index: {}]   ;;  %s5950_s15 = inlined_call_operand.vmem [shape: bf16[4,128,8], index: 15, kind: input, shape index: {}]   ;;  %s5951_s16 = inlined_call_operand.vmem [shape: f32[4,1,8], index: 16, kind: input, shape index: {}]   ;;  %s5952_s17 = inlined_call_operand.vmem [shape: bf16[4,8,128], index: 17, kind: input, shape index: {}]   ;;  %s5953_s18 = inlined_call_operand.vmem [shape: f32[1,128], index: 18, kind: input, shape index: {}]   ;;  %s5954_s19 = inlined_call_operand.vmem [shape: f32[2,128], index: 19, kind: input, shape index: {}]   ;;  %s5955_s20 = inlined_call_operand.vmem [shape: bf16[128,128], index: 20, kind: input, shape index: {}]   ;;  %s5956_s21 = inlined_call_operand.vmem [shape: f32[1,128], index: 21, kind: input, shape index: {}]   ;;  %s5957_s22 = inlined_call_operand.vmem [shape: bf16[128,128], index: 22, kind: input, shape index: {}]   ;;  %s5958_s23 = inlined_call_operand.vmem [shape: f32[1,128], index: 23, kind: input, shape index: {}]   ;;  %s5959_s24 = inlined_call_operand.vmem [shape: f32[2,128], index: 24, kind: input, shape index: {}]   ;;  %s5960_s25 = inlined_call_operand.vmem [shape: f32[2,8,128], index: 25, kind: output, shape index: {}]  }
   0x1   :  { %5974 = sst [smem:[#allocation3_spill]] %s5935_s0 }
   0x2   :  { %5975 = sst [smem:[#allocation4_spill]] %s5936_s1 }
   0x3   :  { %5976 = sst [smem:[#allocation5_spill]] %s5937_s2 }
   0x4   :  { %5977 = sst [smem:[#allocation6_spill]] %s5938_s3 }
   0x5   :  { %5978 = sst [smem:[#allocation7_spill]] %s5939_s4 }
   0x6   :  { %5979 = sst [smem:[#allocation8_spill]] %s5940_s5 }
   0x7   :  { %5980 = sst [smem:[#allocation9_spill]] %s5941_s6 }
   0x8   :  { %5981 = sst [smem:[#allocation10_spill]] %s5942_s7 }
   0x9   :  { %5982 = sst [smem:[#allocation11_spill]] %s5943_s8 }
   0xa   :  { %5983 = sst [smem:[#allocation12_spill]] %s5944_s9 }
   0xb   :  { %5984 = sst [smem:[#allocation13_spill]] %s5959_s24 }
   0xc   :  { %5985 = sst [smem:[#allocation14_spill]] %s5960_s25 }
   0xd LB: > { %5986 = sst [smem:[#allocation2_spill]] %s4912_s29  ;;  %s3758_s2 = sadd.s32 4294967295, %s4912_s29   ;;  %s4912_s29 = sphi %s5044_s29, %s35_s29  }
   0xe   : > { %p3762_p0 = scmp.ge.s32.totalorder %s4912_s29, 1  ;;  %p695_p1 = scmp.lt.s32.totalorder %s4912_s29, 3 }
  0x10   : > { %p696_p2 = pnand %p3762_p0, %p695_p1 }
  0x11   : > { %s5987_s7 = sld [smem:[#allocation5_spill]] (!%p696_p2)  ;;  %p765_p3 = scmp.lt.s32.totalorder (!%p696_p2), %s3758_s2, 1 }
  0x12   : > { %699 = sbr.rel (%p696_p2) target bundleno = 2464 (0x9a0), region = 120  ;;  %s5988_s4 = sld [smem:[#allocation3_spill]] (!%p696_p2) }
  0x13   : > { %s5989_s25 = sld [smem:[#allocation7_spill]] (!%p696_p2) }
  0x14   : > { %s5991_s8 = sld [smem:[#allocation8_spill]] (!%p696_p2) }
  0x15   : > { %s5992_s6 = sld [smem:[#allocation6_spill]] (!%p696_p2) }
  0x16   : > { %s5993_s30 = sld [smem:[#allocation10_spill]] (!%p696_p2) }
  0x17   : > { %v4631_v0 = vld [vmem:[%s5987_s7 + $0x38] sm:$0xff]  ;;  %v4630_v3 = vld [vmem:[%s5987_s7 + $0x30] sm:$0xff]  ;;  %v4629_v8 = vld [vmem:[%s5987_s7 + $0x28] sm:$0xff]  ;;  %s6002_s2 = smov (!%p765_p3, %s3758_s2), 1  ;;  %vm1766_vm0 = vcmask 64512   ;;  %vm1950_vm1 = vcmask 1043456  }
  0x18   : > { %v4639_v1 = vld [vmem:[%s5987_s7 + $0x78] sm:$0xff]  ;;  %1050 = vmatpush.bf16.msra.mxu0 %v4631_v0  ;;  %v4638_v4 = vld [vmem:[%s5987_s7 + $0x70] sm:$0xff]  ;;  %v4637_v9 = vld [vmem:[%s5987_s7 + $0x68] sm:$0xff]  ;;  %s5969_s5 = sshll.u32 %s6002_s2, 3  ;;  %s5994_s1 = sld [smem:[#allocation11_spill]] }
  0x19   : > { %v4647_v2 = vld [vmem:[%s5987_s7 + $0xb8] sm:$0xff]  ;;  %1111 = vmatpush.bf16.msra.mxu1 %v4639_v1  ;;  %v4646_v5 = vld [vmem:[%s5987_s7 + $0xb0] sm:$0xff]  ;;  %v4645_v10 = vld [vmem:[%s5987_s7 + $0xa8] sm:$0xff]  ;;  %s768_s28 = scalar_lea.vmem %s5988_s4, %s5969_s5  ;;  %s5990_s4 = sld [smem:[#allocation9_spill]] }
  0x1a   : > { %1172 = vmatpush.bf16.msra.mxu2 %v4647_v2  ;;  %v4655_v6 = vld [vmem:[%s5987_s7 + $0xf8] sm:$0xff]  ;;  %v4654_v7 = vld [vmem:[%s5987_s7 + $0xf0] sm:$0xff]  ;;  %v4653_v11 = vld [vmem:[%s5987_s7 + $0xe8] sm:$0xff]  ;;  %s5995_s9 = sld [smem:[#allocation12_spill]]  ;;  %s3764_s3 = sshll.u32 %s6002_s2, 2 }
  0x1b   : > { %1233 = vmatpush.bf16.msra.mxu3 %v4655_v6  ;;  %v4628_v12 = vld [vmem:[%s5987_s7 + $0x20] sm:$0xff]  ;;  %v4627_v16 = vld [vmem:[%s5987_s7 + $0x18] sm:$0xff]  ;;  %v4626_v19 = vld [vmem:[%s5987_s7 + $0x10] sm:$0xff]  ;;  %s5997_s27 = sld [smem:[#allocation13_spill]]  ;;  %s5998_s5 = sshll.u32 %s6002_s2, 3 }
  0x1c   : > { %1051 = vmatpush.bf16.msra.mxu0 %v4630_v3  ;;  %v4636_v13 = vld [vmem:[%s5987_s7 + $0x60] sm:$0xff]  ;;  %v4635_v17 = vld [vmem:[%s5987_s7 + $0x58] sm:$0xff]  ;;  %v4634_v20 = vld [vmem:[%s5987_s7 + $0x50] sm:$0xff] }
  0x1d   : > { %1112 = vmatpush.bf16.msra.mxu1 %v4638_v4  ;;  %v4644_v14 = vld [vmem:[%s5987_s7 + $0xa0] sm:$0xff]  ;;  %v4643_v18 = vld [vmem:[%s5987_s7 + $0x98] sm:$0xff]  ;;  %v4642_v22 = vld [vmem:[%s5987_s7 + $0x90] sm:$0xff] }
  0x1e   : > { %1173 = vmatpush.bf16.msra.mxu2 %v4646_v5  ;;  %v4652_v15 = vld [vmem:[%s5987_s7 + $0xe0] sm:$0xff]  ;;  %v4651_v21 = vld [vmem:[%s5987_s7 + $0xd8] sm:$0xff]  ;;  %v4625_v23 = vld [vmem:[%s5987_s7 + $0x8] sm:$0xff] }
  0x1f   : > { %1234 = vmatpush.bf16.msra.mxu3 %v4654_v7  ;;  %v4633_v24 = vld [vmem:[%s5987_s7 + $0x48] sm:$0xff]  ;;  %v4650_v25 = vld [vmem:[%s5987_s7 + $0xd0] sm:$0xff]  ;;  %v4624_v27 = vld [vmem:[%s5987_s7] sm:$0xff] }
  0x20   : > { %1052 = vmatpush.bf16.msra.mxu0 %v4629_v8  ;;  %v4641_v26 = vld [vmem:[%s5987_s7 + $0x88] sm:$0xff]  ;;  %v4632_v28 = vld [vmem:[%s5987_s7 + $0x40] sm:$0xff]  ;;  %v4663_v29 = vld [vmem:[%s5989_s25 + $0x38] sm:$0xff] }
  0x21   : > { %1113 = vmatpush.bf16.msra.mxu1 %v4637_v9  ;;  %v4671_v30 = vld [vmem:[%s5989_s25 + $0x78] sm:$0xff]  ;;  %v4649_v31 = vld [vmem:[%s5987_s7 + $0xc8] sm:$0xff]  ;;  %v5160_v32 = vld [vmem:[%s768_s28] sm:$0xff] }
  0x22   : > { %1174 = vmatpush.bf16.msra.mxu2 %v4645_v10  ;;  %v4640_v33 = vld [vmem:[%s5987_s7 + $0x80] sm:$0xff]  ;;  %v4679_v34 = vld [vmem:[%s5989_s25 + $0xb8] sm:$0xff]  ;;  %v5170_v35 = vpack.c.bf16 %v5160_v32, %v5160_v32  ;;  %v4662_v37 = vld [vmem:[%s5989_s25 + $0x30] sm:$0xff] }
  0x23   : > { %1235 = vmatpush.bf16.msra.mxu3 %v4653_v11  ;;  %v4648_v36 = vld [vmem:[%s5987_s7 + $0xc0] sm:$0xff]  ;;  %v4670_v38 = vld [vmem:[%s5989_s25 + $0x70] sm:$0xff]  ;;  %v4687_v39 = vld [vmem:[%s5989_s25 + $0xf8] sm:$0xff] }
  0x24   : > { %1053 = vmatpush.bf16.msra.mxu0 %v4628_v12  ;;  %v4678_v40 = vld [vmem:[%s5989_s25 + $0xb0] sm:$0xff]  ;;  %v4661_v41 = vld [vmem:[%s5989_s25 + $0x28] sm:$0xff]  ;;  %v4660_v45 = vld [vmem:[%s5989_s25 + $0x20] sm:$0xff] }
  0x25   : > { %1114 = vmatpush.bf16.msra.mxu1 %v4636_v13  ;;  %v4669_v42 = vld [vmem:[%s5989_s25 + $0x68] sm:$0xff]  ;;  %v4686_v43 = vld [vmem:[%s5989_s25 + $0xf0] sm:$0xff]  ;;  %v4668_v46 = vld [vmem:[%s5989_s25 + $0x60] sm:$0xff] }
  0x26   : > { %1175 = vmatpush.bf16.msra.mxu2 %v4644_v14  ;;  %v4677_v44 = vld [vmem:[%s5989_s25 + $0xa8] sm:$0xff]  ;;  %v4676_v48 = vld [vmem:[%s5989_s25 + $0xa0] sm:$0xff]  ;;  %v4659_v49 = vld [vmem:[%s5989_s25 + $0x18] sm:$0xff] }
  0x27   : > { %1236 = vmatpush.bf16.msra.mxu3 %v4652_v15  ;;  %v4685_v47 = vld [vmem:[%s5989_s25 + $0xe8] sm:$0xff]  ;;  %v4667_v50 = vld [vmem:[%s5989_s25 + $0x58] sm:$0xff]  ;;  %v4684_v51 = vld [vmem:[%s5989_s25 + $0xe0] sm:$0xff] }
  0x28   : > { %1054 = vmatpush.bf16.msra.mxu0 %v4627_v16  ;;  %v4675_v52 = vld [vmem:[%s5989_s25 + $0x98] sm:$0xff]  ;;  %v4658_v53 = vld [vmem:[%s5989_s25 + $0x10] sm:$0xff]  ;;  %v4657_v57 = vld [vmem:[%s5989_s25 + $0x8] sm:$0xff] }
  0x29   : > { %1115 = vmatpush.bf16.msra.mxu1 %v4635_v17  ;;  %v4666_v54 = vld [vmem:[%s5989_s25 + $0x50] sm:$0xff]  ;;  %v4683_v55 = vld [vmem:[%s5989_s25 + $0xd8] sm:$0xff]  ;;  %v4665_v58 = vld [vmem:[%s5989_s25 + $0x48] sm:$0xff] }
  0x2a   : > { %1176 = vmatpush.bf16.msra.mxu2 %v4643_v18  ;;  %v4674_v56 = vld [vmem:[%s5989_s25 + $0x90] sm:$0xff]  ;;  %v4673_v60 = vld [vmem:[%s5989_s25 + $0x88] sm:$0xff]  ;;  %v4656_v61 = vld [vmem:[%s5989_s25] sm:$0xff] }
  0x2b   : > { %1237 = vmatpush.bf16.msra.mxu3 %v4651_v21  ;;  %v4682_v59 = vld [vmem:[%s5989_s25 + $0xd0] sm:$0xff]  ;;  %v4664_v62 = vld [vmem:[%s5989_s25 + $0x40] sm:$0xff]  ;;  %v4681_v63 = vld [vmem:[%s5989_s25 + $0xc8] sm:$0xff] }
  0x2c   : > { %1055 = vmatpush.bf16.msra.mxu0 %v4626_v19  ;;  %v4672_v0 = vld [vmem:[%s5989_s25 + $0x80] sm:$0xff]  ;;  %v4711_v1 = vld [vmem:[%s5990_s4 + $0xb8] sm:$0xff]  ;;  %v4710_v4 = vld [vmem:[%s5990_s4 + $0xb0] sm:$0xff] }
  0x2d   : > { %1116 = vmatpush.bf16.msra.mxu1 %v4634_v20  ;;  %v4680_v2 = vld [vmem:[%s5989_s25 + $0xc0] sm:$0xff]  ;;  %v4719_v3 = vld [vmem:[%s5990_s4 + $0xf8] sm:$0xff]  ;;  %v4718_v5 = vld [vmem:[%s5990_s4 + $0xf0] sm:$0xff] }
  0x2e   : > { %1177 = vmatpush.bf16.msra.mxu2 %v4642_v22  ;;  %v4709_v6 = vld [vmem:[%s5990_s4 + $0xa8] sm:$0xff]  ;;  %v4708_v8 = vld [vmem:[%s5990_s4 + $0xa0] sm:$0xff]  ;;  %v4707_v9 = vld [vmem:[%s5990_s4 + $0x98] sm:$0xff] }
  0x2f   : > { %1238 = vmatpush.bf16.msra.mxu3 %v4650_v25  ;;  %v4717_v7 = vld [vmem:[%s5990_s4 + $0xe8] sm:$0xff]  ;;  %v4706_v10 = vld [vmem:[%s5990_s4 + $0x90] sm:$0xff]  ;;  %v4716_v11 = vld [vmem:[%s5990_s4 + $0xe0] sm:$0xff] }
  0x30   : > { %1056 = vmatpush.bf16.msra.mxu0 %v4625_v23  ;;  %v4705_v12 = vld [vmem:[%s5990_s4 + $0x88] sm:$0xff]  ;;  %v4715_v13 = vld [vmem:[%s5990_s4 + $0xd8] sm:$0xff]  ;;  %v4704_v14 = vld [vmem:[%s5990_s4 + $0x80] sm:$0xff] }
  0x31   : > { %1117 = vmatpush.bf16.msra.mxu1 %v4633_v24  ;;  %v4714_v15 = vld [vmem:[%s5990_s4 + $0xd0] sm:$0xff]  ;;  %v4713_v16 = vld [vmem:[%s5990_s4 + $0xc8] sm:$0xff]  ;;  %v4712_v17 = vld [vmem:[%s5990_s4 + $0xc0] sm:$0xff] }
  0x32   : > { %1178 = vmatpush.bf16.msra.mxu2 %v4641_v26  ;;  %v4844_v26 = vld [vmem:[%s5991_s8] ss:$0 sm:$0xff] }
  0x33   : > { %1239 = vmatpush.bf16.msra.mxu3 %v4649_v31 }
  0x34   : > { %1057 = vmatpush.bf16.msra.mxu0 %v4624_v27  ;;  %v4845_v27 = vld [vmem:[%s5991_s8 + $0x1] ss:$0 sm:$0xff] }
  0x35   : > { %1118 = vmatpush.bf16.msra.mxu1 %v4632_v28 }
  0x36   : > { %1179 = vmatpush.bf16.msra.mxu2 %v4640_v33  ;;  %v4840_v33 = vld [vmem:[%s5992_s6] ss:$0 sm:$0xff] }
  0x37   : > { %1058 = vmatmul.bf16.vlgmr.msra.gmra.mxu0 %v5170_v35  ;;  %1240 = vmatpush.bf16.msra.mxu3 %v4648_v36 }
  0x38   : > { %1306 = vmatpush.bf16.msrb.mxu0 %v4663_v29  ;;  %1119 = vmatmul.bf16.vlgmr.msra.gmra.mxu1 %v5170_v35 }
  0x39   : > { %1367 = vmatpush.bf16.msrb.mxu1 %v4671_v30  ;;  %1180 = vmatmul.bf16.vlgmr.msra.gmra.mxu2 %v5170_v35 }
  0x3a   : > { %1428 = vmatpush.bf16.msrb.mxu2 %v4679_v34  ;;  %1241 = vmatmul.bf16.vlgmr.msra.gmra.mxu3 %v5170_v35  ;;  %v4841_v34 = vld [vmem:[%s5992_s6 + $0x1] ss:$0 sm:$0xff] }
  0x3b   : > { %1489 = vmatpush.bf16.msrb.mxu3 %v4687_v39 }
  0x3c   : > { %1307 = vmatpush.bf16.msrb.mxu0 %v4662_v37 }
  0x3d   : > { %1368 = vmatpush.bf16.msrb.mxu1 %v4670_v38 }
  0x3e   : > { %1429 = vmatpush.bf16.msrb.mxu2 %v4678_v40  ;;  %v4846_v40 = vld [vmem:[%s5991_s8 + $0x2] ss:$0 sm:$0xff] }
  0x3f   : > { %1490 = vmatpush.bf16.msrb.mxu3 %v4686_v43 }
  0x40   : > { %1308 = vmatpush.bf16.msrb.mxu0 %v4661_v41 }
  0x41   : > { %1369 = vmatpush.bf16.msrb.mxu1 %v4669_v42 }
  0x42   : > { %1430 = vmatpush.bf16.msrb.mxu2 %v4677_v44 }
  0x43   : > { %1491 = vmatpush.bf16.msrb.mxu3 %v4685_v47 }
  0x44   : > { %1309 = vmatpush.bf16.msrb.mxu0 %v4660_v45  ;;  %v4847_v45 = vld [vmem:[%s5991_s8 + $0x3] ss:$0 sm:$0xff] }
  0x45   : > { %1370 = vmatpush.bf16.msrb.mxu1 %v4668_v46 }
  0x46   : > { %1431 = vmatpush.bf16.msrb.mxu2 %v4676_v48 }
  0x47   : > { %1492 = vmatpush.bf16.msrb.mxu3 %v4684_v51 }
  0x48   : > { %1310 = vmatpush.bf16.msrb.mxu0 %v4659_v49 }
  0x49   : > { %1371 = vmatpush.bf16.msrb.mxu1 %v4667_v50 }
  0x4a   : > { %1432 = vmatpush.bf16.msrb.mxu2 %v4675_v52 }
  0x4b   : > { %1493 = vmatpush.bf16.msrb.mxu3 %v4683_v55 }
  0x4c   : > { %1311 = vmatpush.bf16.msrb.mxu0 %v4658_v53 }
  0x4d   : > { %1372 = vmatpush.bf16.msrb.mxu1 %v4666_v54 }
  0x4e   : > { %1433 = vmatpush.bf16.msrb.mxu2 %v4674_v56 }
  0x4f   : > { %1494 = vmatpush.bf16.msrb.mxu3 %v4682_v59 }
  0x50   : > { %1312 = vmatpush.bf16.msrb.mxu0 %v4657_v57  ;;  %v4842_v57 = vld [vmem:[%s5992_s6 + $0x2] ss:$0 sm:$0xff] }
  0x51   : > { %1373 = vmatpush.bf16.msrb.mxu1 %v4665_v58  ;;  %v4843_v58 = vld [vmem:[%s5992_s6 + $0x3] ss:$0 sm:$0xff]  ;;  %s5999_s6 = sld [smem:[#allocation14_spill]] }
  0x52   : > { %1434 = vmatpush.bf16.msrb.mxu2 %v4673_v60 }
  0x53   : > { %1495 = vmatpush.bf16.msrb.mxu3 %v4681_v63 }
  0x54   : > { %1313 = vmatpush.bf16.msrb.mxu0 %v4656_v61 }
  0x55   : > { %1374 = vmatpush.bf16.msrb.mxu1 %v4664_v62 }
  0x56   : > { %1435 = vmatpush.bf16.msrb.mxu2 %v4672_v0  ;;  %v4848_v0 = vld [vmem:[%s5993_s30 + $0x2] ss:$0 sm:$0xff] }
  0x57   : > { %1314 = vmatmul.bf16.vlgmr.msrb.gmra.mxu0 %v5170_v35  ;;  %1496 = vmatpush.bf16.msrb.mxu3 %v4680_v2  ;;  %s776_s29 = scalar_lea.vmem %s5999_s6, %s5998_s5 }
  0x58   : > { %1375 = vmatmul.bf16.vlgmr.msrb.gmra.mxu1 %v5170_v35 }
  0x59   : > { %1436 = vmatmul.bf16.vlgmr.msrb.gmra.mxu2 %v5170_v35 }
  0x5a   : > { %1684 = vmatpush.bf16.msra.mxu2 %v4711_v1  ;;  %1497 = vmatmul.bf16.vlgmr.msrb.gmra.mxu3 %v5170_v35 }
  0x5b   : > { %1745 = vmatpush.bf16.msra.mxu3 %v4719_v3 }
  0x5e   : > { %1685 = vmatpush.bf16.msra.mxu2 %v4710_v4 }
  0x5f   : > { %1746 = vmatpush.bf16.msra.mxu3 %v4718_v5  ;;  %v4849_v5 = vld [vmem:[%s5993_s30 + $0x3] ss:$0 sm:$0xff] }
  0x62   : > { %1686 = vmatpush.bf16.msra.mxu2 %v4709_v6 }
  0x63   : > { %1747 = vmatpush.bf16.msra.mxu3 %v4717_v7 }
  0x66   : > { %1687 = vmatpush.bf16.msra.mxu2 %v4708_v8 }
  0x67   : > { %1748 = vmatpush.bf16.msra.mxu3 %v4716_v11 }
  0x6a   : > { %1688 = vmatpush.bf16.msra.mxu2 %v4707_v9 }
  0x6b   : > { %1749 = vmatpush.bf16.msra.mxu3 %v4715_v13  ;;  %v4703_v13 = vld [vmem:[%s5990_s4 + $0x78] sm:$0xff] }
  0x6c   : > { %1623 = vmatpush.bf16.msra.mxu1 %v4703_v13 }
  0x6e   : > { %1689 = vmatpush.bf16.msra.mxu2 %v4706_v10 }
  0x6f   : > { %1750 = vmatpush.bf16.msra.mxu3 %v4714_v15  ;;  %v4702_v15 = vld [vmem:[%s5990_s4 + $0x70] sm:$0xff] }
  0x70   : > { %1624 = vmatpush.bf16.msra.mxu1 %v4702_v15 }
  0x72   : > { %1690 = vmatpush.bf16.msra.mxu2 %v4705_v12  ;;  %v4695_v12 = vld [vmem:[%s5990_s4 + $0x38] sm:$0xff] }
  0x73   : > { %1751 = vmatpush.bf16.msra.mxu3 %v4713_v16  ;;  %1562 = vmatpush.bf16.msra.mxu0 %v4695_v12 }
  0x76   : > { %1691 = vmatpush.bf16.msra.mxu2 %v4704_v14  ;;  %v4694_v14 = vld [vmem:[%s5990_s4 + $0x30] sm:$0xff] }
  0x77   : > { %1752 = vmatpush.bf16.msra.mxu3 %v4712_v17  ;;  %1563 = vmatpush.bf16.msra.mxu0 %v4694_v14 }
  0x79   : > { %1692 = vmatmul.bf16.vlgmr.msra.gmra.mxu2 %v5170_v35 }
  0x7a   : > { %1753 = vmatmul.bf16.vlgmr.msra.gmra.mxu3 %v5170_v35 }
  0xb4   : > { %v1059_v18 = vpop.f32.mrf.mxu0 }
  0xb5   : > { %v1120_v19 = vpop.f32.mrf.mxu1  ;;  %v1060_v41 = vadd.f32 %v4840_v33, %v1059_v18  ;;  %v4693_v18 = vld [vmem:[%s5990_s4 + $0x28] sm:$0xff]  ;;  %v4690_v33 = vld [vmem:[%s5990_s4 + $0x10] sm:$0xff] }
  0xb6   : > { %v1121_v42 = vadd.f32 %v4841_v34, %v1120_v19  ;;  %1564 = vmatpush.bf16.msra.mxu0 %v4693_v18  ;;  %v4700_v34 = vld [vmem:[%s5990_s4 + $0x60] sm:$0xff] }
  0xb7   : > { %v1758_v48 = vpack.c.bf16 %v1060_v41, %v1060_v41  ;;  %v4696_v41 = vld [vmem:[%s5990_s4 + $0x40] sm:$0xff] }
  0xb8   : > { %v1759_v49 = vpack.c.bf16 %v1121_v42, %v1121_v42 }
  0xbc   : > { %v1061_v20 = vpop.f32.mrf.mxu0  ;;  %v1181_v22 = vpop.f32.mrf.mxu2 }
  0xbd   : > { %v1122_v21 = vpop.f32.mrf.mxu1  ;;  %v1242_v23 = vpop.f32.mrf.mxu3  ;;  %v1182_v60 = vadd.f32 %v4842_v57, %v1181_v22  ;;  %v4692_v20 = vld [vmem:[%s5990_s4 + $0x20] sm:$0xff] }
  0xbe   : > { %v1243_v61 = vadd.f32 %v4843_v58, %v1242_v23  ;;  %1565 = vmatpush.bf16.msra.mxu0 %v4692_v20 }
  0xbf   : > { %v1760_v62 = vpack.c.bf16 %v1182_v60, %v1182_v60 }
  0xc0   : > { %v1761_v63 = vpack.c.bf16 %v1243_v61, %v1243_v61  ;;  %v4850_v61 = vld [vmem:[%s5993_s30] ss:$0 sm:$0xff] }
  0xc4   : > { %v1183_v24 = vpop.f32.mrf.mxu2 }
  0xc5   : > { %v1244_v25 = vpop.f32.mrf.mxu3 }
  0xd4   : > { %v1315_v28 = vpop.f32.mrf.mxu0 }
  0xd5   : > { %v1376_v29 = vpop.f32.mrf.mxu1  ;;  %v1316_v30 = vadd.f32 %v4844_v26, %v1315_v28 }
  0xd6   : > { %v1377_v31 = vadd.f32 %v4845_v27, %v1376_v29 }
  0xd7   : > { %v1762_v36 = vpack.c.bf16 %v1316_v30, %v1316_v30  ;;  %v4691_v30 = vld [vmem:[%s5990_s4 + $0x18] sm:$0xff] }
  0xd8   : > { %v1763_v37 = vpack.c.bf16 %v1377_v31, %v1377_v31  ;;  %v4701_v31 = vld [vmem:[%s5990_s4 + $0x68] sm:$0xff]  ;;  %1566 = vmatpush.bf16.msra.mxu0 %v4691_v30 }
  0xd9   : > { %v1771_v38 = vsel %vm1766_vm0, %v1762_v36, 0  ;;  %1625 = vmatpush.bf16.msra.mxu1 %v4701_v31  ;;  %v4689_v36 = vld [vmem:[%s5990_s4 + $0x8] sm:$0xff] }
  0xda   : > { %v1790_v39 = vsel %vm1766_vm0, %v1763_v37, 0  ;;  %1780 = vmatpush.bf16.xpose.msrb.mxu2 %v1771_v38  ;;  %v4699_v37 = vld [vmem:[%s5990_s4 + $0x58] sm:$0xff]  ;;  %v4688_v38 = vld [vmem:[%s5990_s4] sm:$0xff] }
  0xdb   : > { %1799 = vmatpush.bf16.xpose.msrb.mxu3 %v1790_v39  ;;  %v4698_v39 = vld [vmem:[%s5990_s4 + $0x50] sm:$0xff] }
  0xdc   : > { %v1317_v43 = vpop.f32.mrf.mxu0  ;;  %v1437_v46 = vpop.f32.mrf.mxu2  ;;  %1567 = vmatpush.bf16.msra.mxu0 %v4690_v33 }
  0xdd   : > { %v1378_v44 = vpop.f32.mrf.mxu1  ;;  %v1438_v47 = vadd.f32 %v4846_v40, %v1437_v46  ;;  %v1498_v50 = vpop.f32.mrf.mxu3  ;;  %1626 = vmatpush.bf16.msra.mxu1 %v4700_v34  ;;  %v4697_v40 = vld [vmem:[%s5990_s4 + $0x48] sm:$0xff] }
  0xde   : > { %v1499_v52 = vadd.f32 %v4847_v45, %v1498_v50 }
  0xdf   : > { %v1764_v51 = vpack.c.bf16 %v1438_v47, %v1438_v47 }
  0xe0   : > { %v1765_v54 = vpack.c.bf16 %v1499_v52, %v1499_v52  ;;  %1568 = vmatpush.bf16.msra.mxu0 %v4689_v36 }
  0xe1   : > { %4150 = vmatmul.msk.bf16.vlgmr.msrb.gmra.mxu2 %vm1766_vm0, %v1758_v48  ;;  %v1809_v53 = vsel %vm1766_vm0, %v1764_v51, 0  ;;  %1627 = vmatpush.bf16.msra.mxu1 %v4699_v37 }
  0xe2   : > { %4151 = vmatmul.msk.bf16.vlgmr.msrb.gmra.mxu3 %vm1766_vm0, %v1759_v49  ;;  %1818 = vmatpush.bf16.xpose.msra.mxu2 %v1809_v53  ;;  %v1828_v55 = vsel %vm1766_vm0, %v1765_v54, 0 }
  0xe3   : > { %1837 = vmatpush.bf16.xpose.msra.mxu3 %v1828_v55 }
  0xe4   : > { %v1439_v56 = vpop.f32.mrf.mxu2  ;;  %1569 = vmatpush.bf16.msra.mxu0 %v4688_v38 }
  0xe5   : > { %v1500_v59 = vpop.f32.mrf.mxu3  ;;  %1628 = vmatpush.bf16.msra.mxu1 %v4698_v39 }
  0xe7   : > { %1570 = vmatmul.bf16.vlgmr.msra.gmra.mxu0 %v5170_v35 }
  0xe9   : > { %1629 = vmatpush.bf16.msra.mxu1 %v4697_v40 }
  0xed   : > { %1630 = vmatpush.bf16.msra.mxu1 %v4696_v41 }
  0xf0   : > { %1631 = vmatmul.bf16.vlgmr.msra.gmra.mxu1 %v5170_v35 }
  0xf1   : > { %4152 = vmatmul.msk.bf16.vlgmr.msra.gmra.mxu2 %vm1766_vm0, %v1760_v62 }
  0xf2   : > { %4153 = vmatmul.msk.bf16.vlgmr.msra.gmra.mxu3 %vm1766_vm0, %v1761_v63 }
  0xfc   : > { %v1693_v1 = vpop.f32.mrf.mxu2 }
  0xfd   : > { %v1694_v2 = vadd.f32 %v4848_v0, %v1693_v1  ;;  %v1754_v7 = vpop.f32.mrf.mxu3 }
  0xfe   : > { %v1755_v8 = vadd.f32 %v4849_v5, %v1754_v7 }
  0xff   : > { %v1945_v3 = vpack.c.bf16 %v1694_v2, %v1694_v2  ;;  %v4851_v2 = vld [vmem:[%s5993_s30 + $0x1] ss:$0 sm:$0xff] }
 0x100   : > { %v1946_v9 = vpack.c.bf16 %v1755_v8, %v1755_v8 }
 0x101   : > { %v1990_v4 = vsel %vm1950_vm1, %v1945_v3, 0 }
 0x102   : > { %1999 = vmatpush.bf16.msrb.mxu2 %v1990_v4  ;;  %v2009_v10 = vsel %vm1950_vm1, %v1946_v9, 0 }
 0x103   : > { %2018 = vmatpush.bf16.msrb.mxu3 %v2009_v10 }
 0x104   : > { %v1695_v6 = vpop.f32.mrf.mxu2 }
 0x105   : > { %v1756_v11 = vpop.f32.mrf.mxu3 }
 0x164   : > { %v1782_v16 = vpop.f32.mrf.mxu2  ;;  %v1571_v62 = vpop.f32.mrf.mxu0 }
 0x165   : > { %v1801_v17 = vpop.f32.mrf.mxu3  ;;  %v1843_v19 = vsel %vm1766_vm0, %v1782_v16, -inf  ;;  %v1572_v63 = vadd.f32 %v4850_v61, %v1571_v62 }
 0x166   : > { %1844 = vmax.xlane.f32.xlu1 %v1843_v19  ;;  %v1846_v23 = vsel %vm1766_vm0, %v1801_v17, -inf }
 0x167   : > { %v1943_v0 = vpack.c.bf16 %v1572_v63, %v1572_v63 }
 0x169   : > { %v1952_v1 = vsel %vm1950_vm1, %v1943_v0, 0 }
 0x16a   : > { %1961 = vmatpush.bf16.msrb.mxu0 %v1952_v1  ;;  %v985_v1 = vld [vmem:[%s5994_s1 + $0x4] sm:$0xf] }
 0x16c   : > { %v1784_v21 = vpop.f32.mrf.mxu2  ;;  %v1573_v4 = vpop.f32.mrf.mxu0 }
 0x16d   : > { %v1803_v22 = vpop.f32.mrf.mxu3  ;;  %v1632_v3 = vpop.f32.mrf.mxu1  ;;  %v987_v4 = vld [vmem:[%s5994_s1 + $0xc] sm:$0xf] }
 0x16e   : > { %1847 = vmax.xlane.f32.xlu1 %v1846_v23  ;;  %v1633_v5 = vadd.f32 %v4851_v2, %v1632_v3  ;;  %v2051_v2 = vsel %vm1950_vm1, %v985_v1, 0  ;;  %v4744_v1 = vld [vmem:[%s5946_s11 + $0xc0] sm:$0xff] }
 0x170   : > { %v1944_v6 = vpack.c.bf16 %v1633_v5, %v1633_v5  ;;  %v2089_v5 = vsel %vm1950_vm1, %v987_v4, 0  ;;  %v4783_v4 = vld [vmem:[%s5948_s13 + $0xf8] sm:$0xff] }
 0x171   : > { %2098 = vmatpush.bf16.msra.mxu3 %v2089_v5  ;;  %v4758_v5 = vld [vmem:[%s5948_s13 + $0x30] sm:$0xff] }
 0x172   : > { %v1971_v7 = vsel %vm1950_vm1, %v1944_v6, 0 }
 0x173   : > { %1980 = vmatpush.bf16.msrb.mxu1 %v1971_v7 }
 0x174   : > { %v1820_v24 = vpop.f32.mrf.mxu2 }
 0x175   : > { %v1839_v25 = vpop.f32.mrf.mxu3  ;;  %v1849_v26 = vsel %vm1766_vm0, %v1820_v24, -inf  ;;  %v1634_v8 = vpop.f32.mrf.mxu1 }
 0x176   : > { %1850 = vmax.xlane.f32.xlu0 %v1849_v26  ;;  %v1852_v29 = vsel %vm1766_vm0, %v1839_v25, -inf }
 0x177   : > { %2060 = vmatpush.bf16.msra.mxu1 %v2051_v2  ;;  %v4759_v2 = vld [vmem:[%s5948_s13 + $0x38] sm:$0xff] }
 0x17c   : > { %v1822_v27 = vpop.f32.mrf.mxu2 }
 0x17d   : > { %v1841_v28 = vpop.f32.mrf.mxu3 }
 0x17e   : > { %1853 = vmax.xlane.f32.xlu0 %v1852_v29 }
 0x1d9   : > { %v1845_v42 = vpop.xlane.xlu1 %1844 }
 0x1da   : > { %v1855_v43 = vsub.f32 %v1782_v16, %v1845_v42 }
 0x1dc   : > { %v1859_v44 = vmul.f32 1.442695, %v1855_v43 }
 0x1de   : > { %4868 = vpow2.f32 %v1859_v44 }
 0x1e1   : > { %v1848_v45 = vpop.xlane.xlu1 %1847 }
 0x1e2   : > { %v1856_v46 = vsub.f32 %v1801_v17, %v1848_v45 }
 0x1e4   : > { %v4869_v47 = vpop.eup %4868  ;;  %v1861_v48 = vmul.f32 1.442695, %v1856_v46 }
 0x1e5   : > { %v1867_v49 = vsel %vm1766_vm0, %v4869_v47, 0.0 }
 0x1e6   : > { %4870 = vpow2.f32 %v1861_v48  ;;  %1868 = vadd.xlane.f32.xlu0 %v1867_v49 }
 0x1e9   : > { %v1851_v50 = vpop.xlane.xlu0 %1850 }
 0x1ea   : > { %v1857_v51 = vsub.f32 %v1820_v24, %v1851_v50 }
 0x1ec   : > { %v5415_v52 = vpop.eup %4870  ;;  %v1863_v53 = vmul.f32 1.442695, %v1857_v51 }
 0x1ed   : > { %v1870_v35 = vsel %vm1766_vm0, %v5415_v52, 0.0 }
 0x1ee   : > { %4872 = vpow2.f32 %v1863_v53  ;;  %1871 = vadd.xlane.f32.xlu1 %v1870_v35 }
 0x1f1   : > { %v1854_v54 = vpop.xlane.xlu0 %1853 }
 0x1f2   : > { %v1858_v55 = vsub.f32 %v1839_v25, %v1854_v54 }
 0x1f4   : > { %v5419_v56 = vpop.eup %4872  ;;  %v1865_v57 = vmul.f32 1.442695, %v1858_v55 }
 0x1f5   : > { %v1873_v58 = vsel %vm1766_vm0, %v5419_v56, 0.0 }
 0x1f6   : > { %4874 = vpow2.f32 %v1865_v57  ;;  %1874 = vadd.xlane.f32.xlu2 %v1873_v58 }
 0x1fc   : > { %v5423_v59 = vpop.eup %4874 }
 0x1fd   : > { %v1876_v60 = vsel %vm1766_vm0, %v5423_v59, 0.0 }
 0x1fe   : > { %1877 = vadd.xlane.f32.xlu2 %v1876_v60 }
 0x259   : > { %v1869_v9 = vpop.xlane.xlu0 %1868 }
 0x25a   : > { %4876 = vrcp.f32 %v1869_v9  ;;  %v1890_v14 = vand.u32 2147483648, %v1869_v9  ;;  %v1888_v16 = vand.u32 2147483647, %v1869_v9  ;;  %vm1884_vm3 = vweird.f32 %v1869_v9 }
 0x25c   : > { %v1891_v19 = vor.u32 1.1754944e-38, %v1890_v14  ;;  %vm1889_vm5 = vcmp.eq.f32.partialorder %v1888_v16, 8.507059e+37 }
 0x260   : > { %v4877_v10 = vpop.eup %4876 }
 0x261   : > { %v1880_v11 = vmul.f32 %v4877_v10, %v1869_v9  ;;  %v1872_v12 = vpop.xlane.xlu1 %1871  ;;  %vm1885_vm2 = vweird.f32 %v4877_v10 }
 0x262   : > { %4878 = vrcp.f32 %v1872_v12  ;;  %vm1886_vm4 = vmor %vm1884_vm3, %vm1885_vm2  ;;  %v1905_v26 = vand.u32 2147483648, %v1872_v12  ;;  %v1903_v28 = vand.u32 2147483647, %v1872_v12  ;;  %vm1899_vm7 = vweird.f32 %v1872_v12 }
 0x263   : > { %v1881_v13 = vsub.f32 1.0, %v1880_v11 }
 0x264   : > { %v1906_v33 = vor.u32 1.1754944e-38, %v1905_v26  ;;  %vm1904_vm9 = vcmp.eq.f32.partialorder %v1903_v28, 8.507059e+37  ;;  %v4734_v26 = vld [vmem:[%s5946_s11 + $0x70] sm:$0xff] }
 0x265   : > { %v1882_v15 = vmul.f32 %v4877_v10, %v1881_v13  ;;  %v4742_v28 = vld [vmem:[%s5946_s11 + $0xb0] sm:$0xff] }
 0x267   : > { %v1883_v17 = vadd.f32 %v4877_v10, %v1882_v15 }
 0x268   : > { %v4879_v18 = vpop.eup %4878 }
 0x269   : > { %v1887_v20 = vsel %vm1886_vm4, %v4877_v10, %v1883_v17  ;;  %v1895_v21 = vmul.f32 %v4879_v18, %v1872_v12  ;;  %v1875_v22 = vpop.xlane.xlu2 %1874  ;;  %vm1900_vm6 = vweird.f32 %v4879_v18 }
 0x26a   : > { %v1892_v23 = vsel %vm1889_vm5, %v1891_v19, %v1887_v20  ;;  %4880 = vrcp.f32 %v1875_v22  ;;  %vm1901_vm8 = vmor %vm1899_vm7, %vm1900_vm6  ;;  %v1920_v41 = vand.u32 2147483648, %v1875_v22  ;;  %v1918_v43 = vand.u32 2147483647, %v1875_v22 }
 0x26b   : > { %v1893_v24 = vmul.f32 %v4869_v47, %v1892_v23  ;;  %v1896_v25 = vsub.f32 1.0, %v1895_v21  ;;  %vm1914_vm11 = vweird.f32 %v1875_v22  ;;  %v4727_v21 = vld [vmem:[%s5946_s11 + $0x38] sm:$0xff]  ;;  %vm3310_vm7 = vcmask 1041408  }
 0x26c   : > { %v1921_v47 = vor.u32 1.1754944e-38, %v1920_v41  ;;  %vm1919_vm13 = vcmp.eq.f32.partialorder %v1918_v43, 8.507059e+37  ;;  %v4743_v23 = vld [vmem:[%s5946_s11 + $0xb8] sm:$0xff] }
 0x26d   : > { %v1897_v27 = vmul.f32 %v4879_v18, %v1896_v25  ;;  %v1939_v29 = vpack.c.bf16 %v1893_v24, %v1893_v24  ;;  %v4751_v24 = vld [vmem:[%s5946_s11 + $0xf8] sm:$0xff]  ;;  %v4726_v25 = vld [vmem:[%s5946_s11 + $0x30] sm:$0xff] }
 0x26f   : > { %v1898_v30 = vadd.f32 %v4879_v18, %v1897_v27  ;;  %4154 = vmatmul.msk.bf16.vlgmr.msrb.gmra.mxu0 %vm1766_vm0, %v1939_v29  ;;  %v4750_v29 = vld [vmem:[%s5946_s11 + $0xf0] sm:$0xff] }
 0x270   : > { %v4881_v31 = vpop.eup %4880 }
 0x271   : > { %v1902_v34 = vsel %vm1901_vm8, %v4879_v18, %v1898_v30  ;;  %v1910_v36 = vmul.f32 %v4881_v31, %v1875_v22  ;;  %v1878_v37 = vpop.xlane.xlu2 %1877  ;;  %vm1915_vm10 = vweird.f32 %v4881_v31  ;;  %v4735_v22 = vld [vmem:[%s5946_s11 + $0x78] sm:$0xff]  ;;  %v4725_v30 = vld [vmem:[%s5946_s11 + $0x28] sm:$0xff]  ;;  %vm3202_vm8 = vcmask 31744  }
 0x272   : > { %v1907_v38 = vsel %vm1904_vm9, %v1906_v33, %v1902_v34  ;;  %4882 = vrcp.f32 %v1878_v37  ;;  %vm1916_vm12 = vmor %vm1914_vm11, %vm1915_vm10  ;;  %v1935_v53 = vand.u32 2147483648, %v1878_v37  ;;  %v1933_v54 = vand.u32 2147483647, %v1878_v37  ;;  %v4741_v33 = vld [vmem:[%s5946_s11 + $0xa8] sm:$0xff] }
 0x273   : > { %v1908_v39 = vmul.f32 %v5415_v52, %v1907_v38  ;;  %v1911_v40 = vsub.f32 1.0, %v1910_v36  ;;  %vm1929_vm15 = vweird.f32 %v1878_v37  ;;  %v4749_v34 = vld [vmem:[%s5946_s11 + $0xe8] sm:$0xff] }
 0x274   : > { %v1936_v58 = vor.u32 1.1754944e-38, %v1935_v53  ;;  %vm1934_vm3 = vcmp.eq.f32.partialorder %v1933_v54, 8.507059e+37  ;;  %v4747_v53 = vld [vmem:[%s5946_s11 + $0xd8] sm:$0xff]  ;;  %v4730_v54 = vld [vmem:[%s5946_s11 + $0x50] sm:$0xff] }
 0x275   : > { %v1912_v42 = vmul.f32 %v4881_v31, %v1911_v40  ;;  %v1940_v44 = vpack.c.bf16 %v1908_v39, %v1908_v39  ;;  %v4852_v39 = vld [vmem:[%s5995_s9] ss:$0 sm:$0xff]  ;;  %s5996_s9 = sld [smem:[#allocation4_spill]] }
 0x277   : > { %v1913_v45 = vadd.f32 %v4881_v31, %v1912_v42  ;;  %4155 = vmatmul.msk.bf16.vlgmr.msrb.gmra.mxu1 %vm1766_vm0, %v1940_v44 }
 0x278   : > { %v4883_v46 = vpop.eup %4882  ;;  %2471 = vmatpush.bf16.msrb.mxu1 %v4735_v22  ;;  %v4755_v22 = vld [vmem:[%s5948_s13 + $0x18] sm:$0xff] }
 0x279   : > { %v1917_v48 = vsel %vm1916_vm12, %v4881_v31, %v1913_v45  ;;  %v1925_v49 = vmul.f32 %v4883_v46, %v1878_v37  ;;  %vm1930_vm14 = vweird.f32 %v4883_v46  ;;  %v4733_v31 = vld [vmem:[%s5946_s11 + $0x68] sm:$0xff] }
 0x27a   : > { %v1922_v50 = vsel %vm1919_vm13, %v1921_v47, %v1917_v48  ;;  %vm1931_vm2 = vmor %vm1929_vm15, %vm1930_vm14  ;;  %v4724_v47 = vld [vmem:[%s5946_s11 + $0x20] sm:$0xff] }
 0x27b   : > { %v1923_v51 = vmul.f32 %v5419_v56, %v1922_v50  ;;  %v1926_v52 = vsub.f32 1.0, %v1925_v49  ;;  %v984_v56 = vld [vmem:[%s5994_s1] sm:$0xf]  ;;  %v4723_v50 = vld [vmem:[%s5946_s11 + $0x18] sm:$0xff] }
 0x27c   : > { %v2032_v0 = vsel %vm1950_vm1, %v984_v56, 0  ;;  %2472 = vmatpush.bf16.msrb.mxu1 %v4734_v26  ;;  %v4732_v48 = vld [vmem:[%s5946_s11 + $0x60] sm:$0xff] }
 0x27d   : > { %v1927_v35 = vmul.f32 %v4883_v46, %v1926_v52  ;;  %v1941_v55 = vpack.c.bf16 %v1923_v51, %v1923_v51  ;;  %2041 = vmatpush.bf16.msra.mxu0 %v2032_v0  ;;  %v4748_v49 = vld [vmem:[%s5946_s11 + $0xe0] sm:$0xff]  ;;  %v4731_v51 = vld [vmem:[%s5946_s11 + $0x58] sm:$0xff] }
 0x27e   : > { %v4739_v52 = vld [vmem:[%s5946_s11 + $0x98] sm:$0xff]  ;;  %v4728_v56 = vld [vmem:[%s5946_s11 + $0x40] sm:$0xff] }
 0x27f   : > { %v1928_v57 = vadd.f32 %v4883_v46, %v1927_v35  ;;  %4156 = vmatmul.msk.bf16.vlgmr.msrb.gmra.mxu2 %vm1766_vm0, %v1941_v55  ;;  %v4722_v35 = vld [vmem:[%s5946_s11 + $0x10] sm:$0xff]  ;;  %v4736_v0 = vld [vmem:[%s5946_s11 + $0x80] sm:$0xff] }
 0x280   : > { %2473 = vmatpush.bf16.msrb.mxu1 %v4733_v31  ;;  %v4738_v55 = vld [vmem:[%s5946_s11 + $0x90] sm:$0xff] }
 0x281   : > { %v1932_v60 = vsel %vm1931_vm2, %v4883_v46, %v1928_v57  ;;  %2410 = vmatpush.bf16.msrb.mxu0 %v4727_v21  ;;  %v4746_v57 = vld [vmem:[%s5946_s11 + $0xd0] sm:$0xff] }
 0x282   : > { %v1937_v61 = vsel %vm1934_vm3, %v1936_v58, %v1932_v60  ;;  %v4721_v58 = vld [vmem:[%s5946_s11 + $0x8] sm:$0xff]  ;;  %v4778_v31 = vld [vmem:[%s5948_s13 + $0xd0] sm:$0xff] }
 0x283   : > { %v1938_v62 = vmul.f32 %v5423_v59, %v1937_v61  ;;  %v986_v59 = vld [vmem:[%s5994_s1 + $0x8] sm:$0xf]  ;;  %s772_s1 = scalar_lea.vmem %s5996_s9, %s3764_s3 }
 0x284   : > { %v2070_v3 = vsel %vm1950_vm1, %v986_v59, 0  ;;  %2474 = vmatpush.bf16.msrb.mxu1 %v4732_v48  ;;  %v4729_v60 = vld [vmem:[%s5946_s11 + $0x48] sm:$0xff]  ;;  %v4767_v59 = vld [vmem:[%s5948_s13 + $0x78] sm:$0xff]  ;;  %v2111_v48 = vld [vmem:[%s5945_s10] sm:$0x3] }
 0x285   : > { %v1942_v63 = vpack.c.bf16 %v1938_v62, %v1938_v62  ;;  %2079 = vmatpush.bf16.msra.mxu2 %v2070_v3  ;;  %2411 = vmatpush.bf16.msrb.mxu0 %v4726_v25  ;;  %v4737_v61 = vld [vmem:[%s5946_s11 + $0x88] sm:$0xff]  ;;  %v4775_v3 = vld [vmem:[%s5948_s13 + $0xb8] sm:$0xff] }
 0x286   : > { %v4745_v62 = vld [vmem:[%s5946_s11 + $0xc8] sm:$0xff]  ;;  %v4779_v25 = vld [vmem:[%s5948_s13 + $0xd8] sm:$0xff] }
 0x287   : > { %4157 = vmatmul.msk.bf16.vlgmr.msrb.gmra.mxu3 %vm1766_vm0, %v1942_v63  ;;  %v4720_v63 = vld [vmem:[%s5946_s11] sm:$0xff] }
 0x288   : > { %2593 = vmatpush.bf16.msrb.mxu3 %v4751_v24  ;;  %2475 = vmatpush.bf16.msrb.mxu1 %v4731_v51  ;;  %v4771_v24 = vld [vmem:[%s5948_s13 + $0x98] sm:$0xff] }
 0x289   : > { %2532 = vmatpush.bf16.msrb.mxu2 %v4743_v23  ;;  %2412 = vmatpush.bf16.msrb.mxu0 %v4725_v30  ;;  %v4763_v23 = vld [vmem:[%s5948_s13 + $0x58] sm:$0xff]  ;;  %v4770_v30 = vld [vmem:[%s5948_s13 + $0x90] sm:$0xff] }
 0x28c   : > { %2594 = vmatpush.bf16.msrb.mxu3 %v4750_v29  ;;  %2476 = vmatpush.bf16.msrb.mxu1 %v4730_v54 }
 0x28d   : > { %2533 = vmatpush.bf16.msrb.mxu2 %v4742_v28  ;;  %2413 = vmatpush.bf16.msrb.mxu0 %v4724_v47  ;;  %v4762_v28 = vld [vmem:[%s5948_s13 + $0x50] sm:$0xff] }
 0x290   : > { %2595 = vmatpush.bf16.msrb.mxu3 %v4749_v34  ;;  %2477 = vmatpush.bf16.msrb.mxu1 %v4729_v60  ;;  %v4761_v34 = vld [vmem:[%s5948_s13 + $0x48] sm:$0xff]  ;;  %v4815_v60 = vld [vmem:[%s5950_s15 + $0xf8] sm:$0xff] }
 0x291   : > { %2534 = vmatpush.bf16.msrb.mxu2 %v4741_v33  ;;  %2414 = vmatpush.bf16.msrb.mxu0 %v4723_v50  ;;  %v4753_v33 = vld [vmem:[%s5948_s13 + $0x8] sm:$0xff]  ;;  %v2135_v50 = vperm.slane %v2111_v48, 0 }
 0x294   : > { %2596 = vmatpush.bf16.msrb.mxu3 %v4748_v49  ;;  %2478 = vmatpush.bf16.msrb.mxu1 %v4728_v56  ;;  %v4814_v56 = vld [vmem:[%s5950_s15 + $0xf0] sm:$0xff] }
 0x295   : > { %2415 = vmatpush.bf16.msrb.mxu0 %v4722_v35 }
 0x298   : > { %2597 = vmatpush.bf16.msrb.mxu3 %v4747_v53  ;;  %v2137_v53 = vperm.slane %v2111_v48, 1 }
 0x299   : > { %2416 = vmatpush.bf16.msrb.mxu0 %v4721_v58  ;;  %v4807_v58 = vld [vmem:[%s5950_s15 + $0xb8] sm:$0xff] }
 0x29c   : > { %2598 = vmatpush.bf16.msrb.mxu3 %v4746_v57  ;;  %v4791_v57 = vld [vmem:[%s5950_s15 + $0x38] sm:$0xff] }
 0x29d   : > { %2417 = vmatpush.bf16.msrb.mxu0 %v4720_v63  ;;  %v4806_v63 = vld [vmem:[%s5950_s15 + $0xb0] sm:$0xff] }
 0x2a0   : > { %2599 = vmatpush.bf16.msrb.mxu3 %v4745_v62  ;;  %v4798_v62 = vld [vmem:[%s5950_s15 + $0x70] sm:$0xff] }
 0x2a4   : > { %2600 = vmatpush.bf16.msrb.mxu3 %v4744_v1  ;;  %v4797_v1 = vld [vmem:[%s5950_s15 + $0x68] sm:$0xff] }
 0x2ec   : > { %v1963_v6 = vpop.f32.mrf.mxu0 }
 0x2ed   : > { %v2024_v7 = vpack.c.bf16 %v1963_v6, %v1963_v6  ;;  %v4766_v6 = vld [vmem:[%s5948_s13 + $0x70] sm:$0xff] }
 0x2ef   : > { %4158 = vmatmul.msk.bf16.vlgmr.msra.gmra.mxu0 %vm1766_vm0, %v2024_v7  ;;  %v4774_v7 = vld [vmem:[%s5948_s13 + $0xb0] sm:$0xff] }
 0x2f0   : > { %2666 = vmatpush.bf16.msra.mxu0 %v4759_v2  ;;  %v4805_v2 = vld [vmem:[%s5950_s15 + $0xa8] sm:$0xff] }
 0x2f4   : > { %v1965_v8 = vpop.f32.mrf.mxu0  ;;  %v1982_v9 = vpop.f32.mrf.mxu1  ;;  %2667 = vmatpush.bf16.msra.mxu0 %v4758_v5  ;;  %v4796_v5 = vld [vmem:[%s5950_s15 + $0x60] sm:$0xff] }
 0x2f5   : > { %v2025_v10 = vpack.c.bf16 %v1982_v9, %v1982_v9  ;;  %v4782_v8 = vld [vmem:[%s5948_s13 + $0xf0] sm:$0xff]  ;;  %v4757_v9 = vld [vmem:[%s5948_s13 + $0x28] sm:$0xff] }
 0x2f7   : > { %4159 = vmatmul.msk.bf16.vlgmr.msra.gmra.mxu1 %vm1766_vm0, %v2025_v10  ;;  %v4765_v10 = vld [vmem:[%s5948_s13 + $0x68] sm:$0xff] }
 0x2f8   : > { %2727 = vmatpush.bf16.msra.mxu1 %v4767_v59  ;;  %2668 = vmatpush.bf16.msra.mxu0 %v4757_v9  ;;  %v4813_v59 = vld [vmem:[%s5950_s15 + $0xe8] sm:$0xff]  ;;  %v4804_v9 = vld [vmem:[%s5950_s15 + $0xa0] sm:$0xff] }
 0x2fc   : > { %v1984_v11 = vpop.f32.mrf.mxu1  ;;  %2728 = vmatpush.bf16.msra.mxu1 %v4766_v6 }
 0x2fd   : > { %v4773_v11 = vld [vmem:[%s5948_s13 + $0xa8] sm:$0xff] }
 0x300   : > { %2729 = vmatpush.bf16.msra.mxu1 %v4765_v10  ;;  %v4812_v10 = vld [vmem:[%s5950_s15 + $0xe0] sm:$0xff] }
 0x302   : > { %v2001_v12 = vpop.f32.mrf.mxu2 }
 0x303   : > { %v2026_v13 = vpack.c.bf16 %v2001_v12, %v2001_v12  ;;  %v4781_v12 = vld [vmem:[%s5948_s13 + $0xe8] sm:$0xff] }
 0x305   : > { %4160 = vmatmul.msk.bf16.vlgmr.msra.gmra.mxu2 %vm1766_vm0, %v2026_v13  ;;  %v4756_v13 = vld [vmem:[%s5948_s13 + $0x20] sm:$0xff] }
 0x306   : > { %2669 = vmatpush.bf16.msra.mxu0 %v4756_v13  ;;  %v4802_v13 = vld [vmem:[%s5950_s15 + $0x90] sm:$0xff] }
 0x30a   : > { %v2003_v14 = vpop.f32.mrf.mxu2  ;;  %v2020_v15 = vpop.f32.mrf.mxu3  ;;  %2670 = vmatpush.bf16.msra.mxu0 %v4755_v22  ;;  %v4784_v22 = vld [vmem:[%s5950_s15] sm:$0xff] }
 0x30b   : > { %v2027_v16 = vpack.c.bf16 %v2020_v15, %v2020_v15  ;;  %v4764_v14 = vld [vmem:[%s5948_s13 + $0x60] sm:$0xff] }
 0x30c   : > { %v4772_v15 = vld [vmem:[%s5948_s13 + $0xa0] sm:$0xff]  ;;  %2730 = vmatpush.bf16.msra.mxu1 %v4764_v14  ;;  %v4786_v14 = vld [vmem:[%s5950_s15 + $0x10] sm:$0xff] }
 0x30d   : > { %4161 = vmatmul.msk.bf16.vlgmr.msra.gmra.mxu3 %vm1766_vm0, %v2027_v16  ;;  %v4780_v16 = vld [vmem:[%s5948_s13 + $0xe0] sm:$0xff] }
 0x30e   : > { %2849 = vmatpush.bf16.msra.mxu3 %v4783_v4  ;;  %v4788_v4 = vld [vmem:[%s5950_s15 + $0x20] sm:$0xff] }
 0x310   : > { %2731 = vmatpush.bf16.msra.mxu1 %v4763_v23  ;;  %v4792_v23 = vld [vmem:[%s5950_s15 + $0x40] sm:$0xff] }
 0x312   : > { %v2022_v17 = vpop.f32.mrf.mxu3  ;;  %2850 = vmatpush.bf16.msra.mxu3 %v4782_v8  ;;  %v4795_v8 = vld [vmem:[%s5950_s15 + $0x58] sm:$0xff] }
 0x314   : > { %2732 = vmatpush.bf16.msra.mxu1 %v4762_v28 }
 0x316   : > { %2851 = vmatpush.bf16.msra.mxu3 %v4781_v12  ;;  %v4811_v12 = vld [vmem:[%s5950_s15 + $0xd8] sm:$0xff] }
 0x318   : > { %2733 = vmatpush.bf16.msra.mxu1 %v4761_v34 }
 0x31a   : > { %2852 = vmatpush.bf16.msra.mxu3 %v4780_v16  ;;  %v4810_v16 = vld [vmem:[%s5950_s15 + $0xd0] sm:$0xff] }
 0x31e   : > { %2853 = vmatpush.bf16.msra.mxu3 %v4779_v25 }
 0x322   : > { %2854 = vmatpush.bf16.msra.mxu3 %v4778_v31  ;;  %v4857_v31 = vld [vmem:[%s5949_s14] ss:$0 sm:$0xff] }
 0x36c   : > { %v2043_v18 = vpop.f32.mrf.mxu0 }
 0x374   : > { %v2045_v19 = vpop.f32.mrf.mxu0  ;;  %v2062_v20 = vpop.f32.mrf.mxu1 }
 0x375   : > { %v2104_v37 = vadd.f32 %v2062_v20, %v2043_v18 }
 0x37c   : > { %v2064_v27 = vpop.f32.mrf.mxu1 }
 0x37d   : > { %v4754_v27 = vld [vmem:[%s5948_s13 + $0x10] sm:$0xff] }
 0x37e   : > { %2671 = vmatpush.bf16.msra.mxu0 %v4754_v27 }
 0x382   : > { %2672 = vmatpush.bf16.msra.mxu0 %v4753_v33  ;;  %v4858_v33 = vld [vmem:[%s5949_s14 + $0x1] ss:$0 sm:$0xff] }
 0x388   : > { %v2081_v36 = vpop.f32.mrf.mxu2 }
 0x389   : > { %v2105_v38 = vadd.f32 %v2104_v37, %v2081_v36  ;;  %v4769_v36 = vld [vmem:[%s5948_s13 + $0x88] sm:$0xff] }
 0x38a   : > { %v4777_v37 = vld [vmem:[%s5948_s13 + $0xc8] sm:$0xff] }
 0x38b   : > { %2855 = vmatpush.bf16.msra.mxu3 %v4777_v37 }
 0x390   : > { %v2083_v40 = vpop.f32.mrf.mxu2  ;;  %v2100_v41 = vpop.f32.mrf.mxu3 }
 0x391   : > { %v2106_v42 = vadd.f32 %v2105_v38, %v2100_v41  ;;  %v4752_v38 = vld [vmem:[%s5948_s13] sm:$0xff] }
 0x392   : > { %v4768_v41 = vld [vmem:[%s5948_s13 + $0x80] sm:$0xff]  ;;  %2673 = vmatpush.bf16.msra.mxu0 %v4752_v38 }
 0x393   : > { %v2110_v43 = vadd.f32 %v4852_v39, %v2106_v42  ;;  %v4760_v39 = vld [vmem:[%s5948_s13 + $0x40] sm:$0xff] }
 0x394   : > { %v4776_v42 = vld [vmem:[%s5948_s13 + $0xc0] sm:$0xff]  ;;  %2734 = vmatpush.bf16.msra.mxu1 %v4760_v39 }
 0x395   : > { %v5502_v44 = vadd.f32 %v2110_v43, %v5160_v32  ;;  %v4740_v32 = vld [vmem:[%s5946_s11 + $0xa0] sm:$0xff]  ;;  %2856 = vmatpush.bf16.msra.mxu3 %v4776_v42 }
 0x396   : > { %2535 = vmatpush.bf16.msrb.mxu2 %v4740_v32 }
 0x397   : > { %2113 = vadd.xlane.f32.xlu2 %v5502_v44  ;;  %v2116_v45 = vmul.f32 %v5502_v44, %v5502_v44 }
 0x398   : > { %v2102_v46 = vpop.f32.mrf.mxu3 }
 0x399   : > { %2117 = vadd.xlane.f32.xlu0 %v2116_v45 }
 0x39a   : > { %2536 = vmatpush.bf16.msrb.mxu2 %v4739_v52 }
 0x39e   : > { %2537 = vmatpush.bf16.msrb.mxu2 %v4738_v55 }
 0x3a2   : > { %2538 = vmatpush.bf16.msrb.mxu2 %v4737_v61  ;;  %v4790_v61 = vld [vmem:[%s5950_s15 + $0x30] sm:$0xff] }
 0x3a6   : > { %2539 = vmatpush.bf16.msrb.mxu2 %v4736_v0  ;;  %v4789_v0 = vld [vmem:[%s5950_s15 + $0x28] sm:$0xff] }
 0x3aa   : > { %2788 = vmatpush.bf16.msra.mxu2 %v4775_v3  ;;  %v779_v3 = vld [vmem:[%s772_s1] sm:$0xf] }
 0x3ab   : > { %v2349_v6 = vpack.c.bf16 %v779_v3, %v779_v3 }
 0x3ae   : > { %2789 = vmatpush.bf16.msra.mxu2 %v4774_v7  ;;  %v4787_v7 = vld [vmem:[%s5950_s15 + $0x18] sm:$0xff] }
 0x3b2   : > { %2790 = vmatpush.bf16.msra.mxu2 %v4773_v11  ;;  %v4803_v11 = vld [vmem:[%s5950_s15 + $0x98] sm:$0xff] }
 0x3b6   : > { %2791 = vmatpush.bf16.msra.mxu2 %v4772_v15  ;;  %v4794_v15 = vld [vmem:[%s5950_s15 + $0x50] sm:$0xff] }
 0x3ba   : > { %2792 = vmatpush.bf16.msra.mxu2 %v4771_v24  ;;  %v4808_v24 = vld [vmem:[%s5950_s15 + $0xc0] sm:$0xff] }
 0x3be   : > { %2793 = vmatpush.bf16.msra.mxu2 %v4770_v30 }
 0x3c2   : > { %2794 = vmatpush.bf16.msra.mxu2 %v4769_v36 }
 0x3c6   : > { %2795 = vmatpush.bf16.msra.mxu2 %v4768_v41  ;;  %v4853_v41 = vld [vmem:[%s5947_s12] ss:$0 sm:$0xff] }
 0x40a   : > { %v2114_v17 = vpop.xlane.xlu2 %2113 }
 0x40b   : > { %v2115_v18 = vmul.f32 0.03125, %v2114_v17  ;;  %v4801_v17 = vld [vmem:[%s5950_s15 + $0x88] sm:$0xff] }
 0x40c   : > { %v2118_v19 = vpop.xlane.xlu0 %2117 }
 0x40d   : > { %v2120_v20 = vmul.f32 %v2115_v18, %v2115_v18  ;;  %v2119_v21 = vmul.f32 0.03125, %v2118_v19  ;;  %v2122_v49 = vsub.f32 %v5502_v44, %v2115_v18  ;;  %v4799_v44 = vld [vmem:[%s5950_s15 + $0x78] sm:$0xff]  ;;  %v4785_v18 = vld [vmem:[%s5950_s15 + $0x8] sm:$0xff] }
 0x40e   : > { %v4793_v19 = vld [vmem:[%s5950_s15 + $0x48] sm:$0xff] }
 0x40f   : > { %v2121_v26 = vsub.f32 %v2119_v21, %v2120_v20  ;;  %v4809_v20 = vld [vmem:[%s5950_s15 + $0xc8] sm:$0xff]  ;;  %v4800_v21 = vld [vmem:[%s5950_s15 + $0x80] sm:$0xff] }
 0x411   : > { %v2123_v29 = vadd.f32 1e-05, %v2121_v26 }
 0x413   : > { %4884 = vrsqrt.f32 %v2123_v29  ;;  %vm2130_vm5 = vweird.f32 %v2123_v29 }
 0x419   : > { %v4885_v40 = vpop.eup %4884 }
 0x41a   : > { %v2125_v43 = vmul.f32 %v4885_v40, %v2123_v29  ;;  %vm2131_vm4 = vweird.f32 %v4885_v40 }
 0x41b   : > { %vm2132_vm6 = vmor %vm2130_vm5, %vm2131_vm4 }
 0x41c   : > { %v2126_v45 = vmul.f32 %v4885_v40, %v2125_v43 }
 0x41e   : > { %v2127_v46 = vmul.f32 0.5, %v2126_v45  ;;  %v4854_v45 = vld [vmem:[%s5947_s12 + $0x1] ss:$0 sm:$0xff] }
 0x420   : > { %v2128_v47 = vsub.f32 1.5, %v2127_v46  ;;  %v4859_v46 = vld [vmem:[%s5949_s14 + $0x2] ss:$0 sm:$0xff] }
 0x422   : > { %v2129_v32 = vmul.f32 %v4885_v40, %v2128_v47  ;;  %v4860_v47 = vld [vmem:[%s5949_s14 + $0x3] ss:$0 sm:$0xff] }
 0x424   : > { %v2133_v51 = vsel %vm2132_vm6, %v4885_v40, %v2129_v32 }
 0x425   : > { %v2134_v52 = vmul.f32 %v2133_v51, %v2122_v49 }
 0x427   : > { %v2136_v35 = vmul.f32 %v2135_v50, %v2134_v52 }
 0x429   : > { %v5667_v54 = vadd.f32 %v2137_v53, %v2136_v35 }
 0x42b   : > { %v2348_v55 = vpack.c.bf16 %v5667_v54, %v5667_v54 }
 0x42d   : > { %2418 = vmatmul.bf16.vlgmr.msrb.gmra.mxu0 %v2348_v55  ;;  %2479 = vmatmul.bf16.vlgmr.msrb.gmra.mxu1 %v2348_v55 }
 0x42e   : > { %2540 = vmatmul.bf16.vlgmr.msrb.gmra.mxu2 %v2348_v55  ;;  %2601 = vmatmul.bf16.vlgmr.msrb.gmra.mxu3 %v2348_v55 }
 0x42f   : > { %2922 = vmatpush.bf16.msrb.mxu0 %v4791_v57  ;;  %2983 = vmatpush.bf16.msrb.mxu1 %v4799_v44  ;;  %v4855_v44 = vld [vmem:[%s5947_s12 + $0x2] ss:$0 sm:$0xff] }
 0x430   : > { %3044 = vmatpush.bf16.msrb.mxu2 %v4807_v58  ;;  %3105 = vmatpush.bf16.msrb.mxu3 %v4815_v60  ;;  %v4856_v58 = vld [vmem:[%s5947_s12 + $0x3] ss:$0 sm:$0xff] }
 0x433   : > { %2923 = vmatpush.bf16.msrb.mxu0 %v4790_v61  ;;  %2984 = vmatpush.bf16.msrb.mxu1 %v4798_v62 }
 0x434   : > { %3045 = vmatpush.bf16.msrb.mxu2 %v4806_v63  ;;  %3106 = vmatpush.bf16.msrb.mxu3 %v4814_v56 }
 0x437   : > { %2924 = vmatpush.bf16.msrb.mxu0 %v4789_v0  ;;  %2985 = vmatpush.bf16.msrb.mxu1 %v4797_v1 }
 0x438   : > { %3046 = vmatpush.bf16.msrb.mxu2 %v4805_v2  ;;  %3107 = vmatpush.bf16.msrb.mxu3 %v4813_v59 }
 0x43b   : > { %2925 = vmatpush.bf16.msrb.mxu0 %v4788_v4  ;;  %2986 = vmatpush.bf16.msrb.mxu1 %v4796_v5 }
 0x43c   : > { %3047 = vmatpush.bf16.msrb.mxu2 %v4804_v9  ;;  %3108 = vmatpush.bf16.msrb.mxu3 %v4812_v10 }
 0x43d   : > { %2674 = vmatmul.bf16.vlgmr.msra.gmra.mxu0 %v2349_v6  ;;  %2735 = vmatmul.bf16.vlgmr.msra.gmra.mxu1 %v2349_v6 }
 0x43e   : > { %2796 = vmatmul.bf16.vlgmr.msra.gmra.mxu2 %v2349_v6  ;;  %2857 = vmatmul.bf16.vlgmr.msra.gmra.mxu3 %v2349_v6 }
 0x43f   : > { %2926 = vmatpush.bf16.msrb.mxu0 %v4787_v7  ;;  %2987 = vmatpush.bf16.msrb.mxu1 %v4795_v8  ;;  %v4862_v7 = vld [vmem:[%s5951_s16 + $0x1] ss:$0 sm:$0xff] }
 0x440   : > { %3048 = vmatpush.bf16.msrb.mxu2 %v4803_v11  ;;  %3109 = vmatpush.bf16.msrb.mxu3 %v4811_v12  ;;  %v4863_v12 = vld [vmem:[%s5951_s16 + $0x2] ss:$0 sm:$0xff] }
 0x443   : > { %2927 = vmatpush.bf16.msrb.mxu0 %v4786_v14  ;;  %2988 = vmatpush.bf16.msrb.mxu1 %v4794_v15 }
 0x444   : > { %3049 = vmatpush.bf16.msrb.mxu2 %v4802_v13  ;;  %3110 = vmatpush.bf16.msrb.mxu3 %v4810_v16  ;;  %v4864_v16 = vld [vmem:[%s5951_s16 + $0x3] ss:$0 sm:$0xff] }
 0x447   : > { %2928 = vmatpush.bf16.msrb.mxu0 %v4785_v18  ;;  %2989 = vmatpush.bf16.msrb.mxu1 %v4793_v19 }
 0x448   : > { %3050 = vmatpush.bf16.msrb.mxu2 %v4801_v17  ;;  %3111 = vmatpush.bf16.msrb.mxu3 %v4809_v20 }
 0x44b   : > { %2929 = vmatpush.bf16.msrb.mxu0 %v4784_v22  ;;  %2990 = vmatpush.bf16.msrb.mxu1 %v4792_v23 }
 0x44c   : > { %3051 = vmatpush.bf16.msrb.mxu2 %v4800_v21  ;;  %3112 = vmatpush.bf16.msrb.mxu3 %v4808_v24 }
 0x44e   : > { %2930 = vmatmul.bf16.vlgmr.msrb.gmra.mxu0 %v2349_v6  ;;  %2991 = vmatmul.bf16.vlgmr.msrb.gmra.mxu1 %v2349_v6 }
 0x44f   : > { %3052 = vmatmul.bf16.vlgmr.msrb.gmra.mxu2 %v2349_v6  ;;  %3113 = vmatmul.bf16.vlgmr.msrb.gmra.mxu3 %v2349_v6  ;;  %v4861_v6 = vld [vmem:[%s5951_s16] ss:$0 sm:$0xff] }
 0x4aa   : > { %v2419_v25 = vpop.f32.mrf.mxu0  ;;  %v2480_v26 = vpop.f32.mrf.mxu1 }
 0x4ab   : > { %v2420_v51 = vadd.f32 %v4853_v41, %v2419_v25  ;;  %v2481_v52 = vadd.f32 %v4854_v45, %v2480_v26 }
 0x4ad   : > { %v3118_v62 = vpack.c.bf16 %v2420_v51, %v2420_v51  ;;  %v3119_v63 = vpack.c.bf16 %v2481_v52, %v2481_v52 }
 0x4b1   : > { %v2541_v27 = vpop.f32.mrf.mxu2  ;;  %v2602_v28 = vpop.f32.mrf.mxu3 }
 0x4b2   : > { %v2421_v29 = vpop.f32.mrf.mxu0  ;;  %v2482_v30 = vpop.f32.mrf.mxu1  ;;  %v2542_v1 = vadd.f32 %v4855_v44, %v2541_v27  ;;  %v2603_v2 = vadd.f32 %v4856_v58, %v2602_v28 }
 0x4b4   : > { %v3120_v4 = vpack.c.bf16 %v2542_v1, %v2542_v1  ;;  %v3121_v5 = vpack.c.bf16 %v2603_v2, %v2603_v2 }
 0x4b9   : > { %v2543_v34 = vpop.f32.mrf.mxu2  ;;  %v2604_v36 = vpop.f32.mrf.mxu3 }
 0x4ba   : > { %v2675_v37 = vpop.f32.mrf.mxu0  ;;  %v2736_v38 = vpop.f32.mrf.mxu1 }
 0x4bb   : > { %v2676_v39 = vadd.f32 %v4857_v31, %v2675_v37  ;;  %v2737_v40 = vadd.f32 %v4858_v33, %v2736_v38 }
 0x4bd   : > { %v3122_v42 = vpack.c.bf16 %v2676_v39, %v2676_v39  ;;  %v3123_v43 = vpack.c.bf16 %v2737_v40, %v2737_v40 }
 0x4bf   : > { %v3130_v48 = vsel %vm1766_vm0, %v3122_v42, 0  ;;  %v3149_v32 = vsel %vm1766_vm0, %v3123_v43, 0 }
 0x4c0   : > { %3139 = vmatpush.bf16.xpose.msra.mxu0 %v3130_v48  ;;  %3158 = vmatpush.bf16.xpose.msra.mxu1 %v3149_v32 }
 0x4c1   : > { %v2797_v49 = vpop.f32.mrf.mxu2  ;;  %v2858_v50 = vpop.f32.mrf.mxu3 }
 0x4c2   : > { %v2798_v53 = vadd.f32 %v4859_v46, %v2797_v49  ;;  %v2859_v35 = vadd.f32 %v4860_v47, %v2858_v50  ;;  %v2677_v55 = vpop.f32.mrf.mxu0  ;;  %v2738_v57 = vpop.f32.mrf.mxu1 }
 0x4c4   : > { %v3124_v60 = vpack.c.bf16 %v2798_v53, %v2798_v53  ;;  %v3125_v61 = vpack.c.bf16 %v2859_v35, %v2859_v35 }
 0x4c6   : > { %v3168_v56 = vsel %vm1766_vm0, %v3124_v60, 0  ;;  %v3187_v0 = vsel %vm1766_vm0, %v3125_v61, 0 }
 0x4c7   : > { %3177 = vmatpush.bf16.xpose.msra.mxu2 %v3168_v56  ;;  %3196 = vmatpush.bf16.xpose.msra.mxu3 %v3187_v0 }
 0x4c8   : > { %4546 = vmatmul.msk.bf16.vlgmr.msra.gmra.mxu0 %vm1766_vm0, %v3118_v62  ;;  %4547 = vmatmul.msk.bf16.vlgmr.msra.gmra.mxu1 %vm1766_vm0, %v3119_v63 }
 0x4c9   : > { %v2799_v59 = vpop.f32.mrf.mxu2  ;;  %v2860_v3 = vpop.f32.mrf.mxu3 }
 0x4cb   : > { %v2931_v8 = vpop.f32.mrf.mxu0  ;;  %v2992_v9 = vpop.f32.mrf.mxu1 }
 0x4cc   : > { %v2932_v10 = vadd.f32 %v4861_v6, %v2931_v8  ;;  %v2993_v11 = vadd.f32 %v4862_v7, %v2992_v9 }
 0x4ce   : > { %4548 = vmatmul.msk.bf16.vlgmr.msra.gmra.mxu2 %vm1766_vm0, %v3120_v4  ;;  %4549 = vmatmul.msk.bf16.vlgmr.msra.gmra.mxu3 %vm1766_vm0, %v3121_v5  ;;  %v3303_v13 = vpack.c.bf16 %v2932_v10, %v2932_v10  ;;  %v3304_v14 = vpack.c.bf16 %v2993_v11, %v2993_v11 }
 0x4d0   : > { %v3312_v17 = vsel %vm3310_vm7, %v3303_v13, 0  ;;  %v3331_v18 = vsel %vm3310_vm7, %v3304_v14, 0 }
 0x4d1   : > { %3321 = vmatpush.bf16.msrb.mxu0 %v3312_v17  ;;  %3340 = vmatpush.bf16.msrb.mxu1 %v3331_v18 }
 0x4d2   : > { %v3053_v15 = vpop.f32.mrf.mxu2  ;;  %v3114_v21 = vpop.f32.mrf.mxu3 }
 0x4d3   : > { %v3054_v19 = vadd.f32 %v4863_v12, %v3053_v15  ;;  %v2933_v22 = vpop.f32.mrf.mxu0  ;;  %v2994_v23 = vpop.f32.mrf.mxu1  ;;  %v3115_v24 = vadd.f32 %v4864_v16, %v3114_v21 }
 0x4d5   : > { %v3305_v20 = vpack.c.bf16 %v3054_v19, %v3054_v19  ;;  %v3306_v26 = vpack.c.bf16 %v3115_v24, %v3115_v24 }
 0x4d7   : > { %v3350_v25 = vsel %vm3310_vm7, %v3305_v20, 0  ;;  %v3369_v27 = vsel %vm3310_vm7, %v3306_v26, 0 }
 0x4d8   : > { %3359 = vmatpush.bf16.msrb.mxu2 %v3350_v25  ;;  %3378 = vmatpush.bf16.msrb.mxu3 %v3369_v27 }
 0x4da   : > { %v3055_v28 = vpop.f32.mrf.mxu2  ;;  %v3116_v29 = vpop.f32.mrf.mxu3 }
 0x545   : > { %v3141_v30 = vpop.f32.mrf.mxu0  ;;  %v3160_v31 = vpop.f32.mrf.mxu1 }
 0x546   : > { %v3203_v33 = vsel %vm3202_vm8, %v3141_v30, -inf  ;;  %v3206_v43 = vsel %vm3202_vm8, %v3160_v31, -inf }
 0x547   : > { %3204 = vmax.xlane.f32.xlu0 %v3203_v33 }
 0x54d   : > { %v3143_v34 = vpop.f32.mrf.mxu0  ;;  %v3162_v36 = vpop.f32.mrf.mxu1 }
 0x551   : > { %v3179_v37 = vpop.f32.mrf.mxu2  ;;  %v3198_v38 = vpop.f32.mrf.mxu3 }
 0x552   : > { %v3212_v39 = vsel %vm3202_vm8, %v3198_v38, -inf  ;;  %v3209_v40 = vsel %vm3202_vm8, %v3179_v37, -inf }
 0x553   : > { %3213 = vmax.xlane.f32.xlu2 %v3212_v39  ;;  %3210 = vmax.xlane.f32.xlu1 %v3209_v40 }
 0x559   : > { %v3181_v41 = vpop.f32.mrf.mxu2  ;;  %v3200_v42 = vpop.f32.mrf.mxu3 }
 0x55b   : > { %3207 = vmax.xlane.f32.xlu1 %v3206_v43 }
 0x5ba   : > { %v3205_v45 = vpop.xlane.xlu0 %3204 }
 0x5bb   : > { %v3215_v46 = vsub.f32 %v3141_v30, %v3205_v45 }
 0x5bd   : > { %v3219_v47 = vmul.f32 1.442695, %v3215_v46 }
 0x5bf   : > { %4886 = vpow2.f32 %v3219_v47 }
 0x5c5   : > { %v4887_v48 = vpop.eup %4886 }
 0x5c6   : > { %v3214_v32 = vpop.xlane.xlu2 %3213  ;;  %v3211_v49 = vpop.xlane.xlu1 %3210  ;;  %v3227_v50 = vsel %vm3202_vm8, %v4887_v48, 0.0 }
 0x5c7   : > { %v3218_v51 = vsub.f32 %v3198_v38, %v3214_v32  ;;  %v3217_v52 = vsub.f32 %v3179_v37, %v3211_v49  ;;  %3228 = vadd.xlane.f32.xlu1 %v3227_v50 }
 0x5c9   : > { %v3225_v53 = vmul.f32 1.442695, %v3218_v51  ;;  %v3223_v35 = vmul.f32 1.442695, %v3217_v52 }
 0x5cb   : > { %4888 = vpow2.f32 %v3225_v53  ;;  %v2343_v53 = vld [vmem:[%s5952_s17] sm:$0xf] }
 0x5cc   : > { %4890 = vpow2.f32 %v3223_v35  ;;  %v3392_v35 = vsel %vm1950_vm1, %v2343_v53, 0 }
 0x5cd   : > { %3401 = vmatpush.bf16.msra.mxu0 %v3392_v35 }
 0x5ce   : > { %v3208_v55 = vpop.xlane.xlu1 %3207 }
 0x5cf   : > { %v3216_v57 = vsub.f32 %v3160_v31, %v3208_v55  ;;  %v2345_v55 = vld [vmem:[%s5952_s17 + $0x8] sm:$0xf] }
 0x5d1   : > { %v5824_v44 = vpop.eup %4888  ;;  %v3221_v58 = vmul.f32 1.442695, %v3216_v57  ;;  %v2346_v57 = vld [vmem:[%s5952_s17 + $0xc] sm:$0xf] }
 0x5d2   : > { %v5826_v60 = vpop.eup %4890  ;;  %v3236_v61 = vsel %vm3202_vm8, %v5824_v44, 0.0 }
 0x5d3   : > { %4892 = vpow2.f32 %v3221_v58  ;;  %3237 = vadd.xlane.f32.xlu0 %v3236_v61  ;;  %v3233_v62 = vsel %vm3202_vm8, %v5826_v60, 0.0  ;;  %v3449_v58 = vsel %vm1950_vm1, %v2346_v57, 0 }
 0x5d4   : > { %3234 = vadd.xlane.f32.xlu2 %v3233_v62  ;;  %3458 = vmatpush.bf16.msra.mxu3 %v3449_v58 }
 0x5d9   : > { %v5832_v63 = vpop.eup %4892 }
 0x5da   : > { %v3230_v56 = vsel %vm3202_vm8, %v5832_v63, 0.0 }
 0x5dc   : > { %3231 = vadd.xlane.f32.xlu2 %v3230_v56 }
 0x63a   : > { %v3229_v0 = vpop.xlane.xlu1 %3228 }
 0x63b   : > { %4894 = vrcp.f32 %v3229_v0  ;;  %v3250_v3 = vand.u32 2147483648, %v3229_v0  ;;  %v3248_v5 = vand.u32 2147483647, %v3229_v0  ;;  %vm3244_vm10 = vweird.f32 %v3229_v0 }
 0x63d   : > { %v3251_v9 = vor.u32 1.1754944e-38, %v3250_v3  ;;  %vm3249_vm12 = vcmp.eq.f32.partialorder %v3248_v5, 8.507059e+37 }
 0x641   : > { %v4895_v1 = vpop.eup %4894 }
 0x642   : > { %v3240_v2 = vmul.f32 %v4895_v1, %v3229_v0  ;;  %vm3245_vm9 = vweird.f32 %v4895_v1 }
 0x643   : > { %vm3246_vm11 = vmor %vm3244_vm10, %vm3245_vm9 }
 0x644   : > { %v3241_v59 = vsub.f32 1.0, %v3240_v2 }
 0x646   : > { %v3242_v4 = vmul.f32 %v4895_v1, %v3241_v59  ;;  %v3238_v6 = vpop.xlane.xlu0 %3237 }
 0x647   : > { %4896 = vrcp.f32 %v3238_v6  ;;  %v3235_v7 = vpop.xlane.xlu2 %3234  ;;  %v3295_v20 = vand.u32 2147483648, %v3238_v6  ;;  %v3293_v23 = vand.u32 2147483647, %v3238_v6  ;;  %vm3289_vm15 = vweird.f32 %v3238_v6 }
 0x648   : > { %v3243_v8 = vadd.f32 %v4895_v1, %v3242_v4  ;;  %4898 = vrcp.f32 %v3235_v7  ;;  %v3280_v24 = vand.u32 2147483648, %v3235_v7  ;;  %v3278_v26 = vand.u32 2147483647, %v3235_v7 }
 0x649   : > { %v3296_v28 = vor.u32 1.1754944e-38, %v3295_v20  ;;  %vm3274_vm3 = vweird.f32 %v3235_v7  ;;  %vm3294_vm4 = vcmp.eq.f32.partialorder %v3293_v23, 8.507059e+37  ;;  %v4823_v23 = vld [vmem:[%s5955_s20 + $0x38] sm:$0xff] }
 0x64a   : > { %v3247_v10 = vsel %vm3246_vm11, %v4895_v1, %v3243_v8  ;;  %v3281_v33 = vor.u32 1.1754944e-38, %v3280_v24  ;;  %vm3279_vm6 = vcmp.eq.f32.partialorder %v3278_v26, 8.507059e+37  ;;  %v4822_v24 = vld [vmem:[%s5955_s20 + $0x30] sm:$0xff]  ;;  %v4819_v26 = vld [vmem:[%s5955_s20 + $0x18] sm:$0xff] }
 0x64b   : > { %v3252_v11 = vsel %vm3249_vm12, %v3251_v9, %v3247_v10 }
 0x64c   : > { %v3253_v12 = vmul.f32 %v4887_v48, %v3252_v11 }
 0x64d   : > { %v4897_v13 = vpop.eup %4896 }
 0x64e   : > { %v4899_v14 = vpop.eup %4898  ;;  %v3285_v15 = vmul.f32 %v4897_v13, %v3238_v6  ;;  %v3299_v16 = vpack.c.bf16 %v3253_v12, %v3253_v12  ;;  %vm3290_vm13 = vweird.f32 %v4897_v13 }
 0x64f   : > { %v3270_v17 = vmul.f32 %v4899_v14, %v3235_v7  ;;  %v3232_v18 = vpop.xlane.xlu2 %3231  ;;  %vm3275_vm14 = vweird.f32 %v4899_v14  ;;  %vm3291_vm2 = vmor %vm3289_vm15, %vm3290_vm13 }
 0x650   : > { %v3286_v19 = vsub.f32 1.0, %v3285_v15  ;;  %4900 = vrcp.f32 %v3232_v18  ;;  %4550 = vmatmul.msk.bf16.vlgmr.msrb.gmra.mxu0 %vm3202_vm8, %v3299_v16  ;;  %vm3276_vm5 = vmor %vm3274_vm3, %vm3275_vm14  ;;  %v3265_v42 = vand.u32 2147483648, %v3232_v18  ;;  %v3263_v46 = vand.u32 2147483647, %v3232_v18  ;;  %v4865_v15 = vld [vmem:[%s5953_s18] ss:$0 sm:$0xff] }
 0x651   : > { %v3271_v21 = vsub.f32 1.0, %v3270_v17  ;;  %vm3259_vm9 = vweird.f32 %v3232_v18  ;;  %3585 = vmatpush.bf16.msrb.mxu0 %v4823_v23 }
 0x652   : > { %v3287_v22 = vmul.f32 %v4897_v13, %v3286_v19  ;;  %v3266_v32 = vor.u32 1.1754944e-38, %v3265_v42  ;;  %vm3264_vm11 = vcmp.eq.f32.partialorder %v3263_v46, 8.507059e+37  ;;  %v4828_v42 = vld [vmem:[%s5957_s22 + $0x20] sm:$0xff]  ;;  %v4827_v46 = vld [vmem:[%s5957_s22 + $0x18] sm:$0xff] }
 0x653   : > { %v3272_v25 = vmul.f32 %v4899_v14, %v3271_v21 }
 0x654   : > { %v3288_v27 = vadd.f32 %v4897_v13, %v3287_v22 }
 0x655   : > { %v3273_v29 = vadd.f32 %v4899_v14, %v3272_v25  ;;  %3586 = vmatpush.bf16.msrb.mxu0 %v4822_v24  ;;  %v4821_v25 = vld [vmem:[%s5955_s20 + $0x28] sm:$0xff] }
 0x656   : > { %v4901_v30 = vpop.eup %4900  ;;  %v3292_v31 = vsel %vm3291_vm2, %v4897_v13, %v3288_v27  ;;  %v4818_v27 = vld [vmem:[%s5955_s20 + $0x10] sm:$0xff] }
 0x657   : > { %v3297_v34 = vsel %vm3294_vm4, %v3296_v28, %v3292_v31  ;;  %v3277_v36 = vsel %vm3276_vm5, %v4899_v14, %v3273_v29  ;;  %v3255_v37 = vmul.f32 %v4901_v30, %v3232_v18  ;;  %vm3260_vm7 = vweird.f32 %v4901_v30  ;;  %v4817_v28 = vld [vmem:[%s5955_s20 + $0x8] sm:$0xff]  ;;  %v4816_v29 = vld [vmem:[%s5955_s20] sm:$0xff] }
 0x658   : > { %v3298_v38 = vmul.f32 %v5824_v44, %v3297_v34  ;;  %v3282_v39 = vsel %vm3279_vm6, %v3281_v33, %v3277_v36  ;;  %vm3261_vm10 = vmor %vm3259_vm9, %vm3260_vm7  ;;  %v3430_v44 = vsel %vm1950_vm1, %v2345_v55, 0 }
 0x659   : > { %v3283_v40 = vmul.f32 %v5826_v60, %v3282_v39  ;;  %v3256_v41 = vsub.f32 1.0, %v3255_v37  ;;  %3439 = vmatpush.bf16.msra.mxu2 %v3430_v44  ;;  %v2344_v60 = vld [vmem:[%s5952_s17 + $0x4] sm:$0xf]  ;;  %3587 = vmatpush.bf16.msrb.mxu0 %v4821_v25  ;;  %v4831_v37 = vld [vmem:[%s5957_s22 + $0x38] sm:$0xff]  ;;  %v4830_v39 = vld [vmem:[%s5957_s22 + $0x30] sm:$0xff] }
 0x65a   : > { %v3302_v43 = vpack.c.bf16 %v3298_v38, %v3298_v38  ;;  %v3411_v61 = vsel %vm1950_vm1, %v2344_v60, 0 }
 0x65b   : > { %v3257_v45 = vmul.f32 %v4901_v30, %v3256_v41  ;;  %v3301_v47 = vpack.c.bf16 %v3283_v40, %v3283_v40  ;;  %3420 = vmatpush.bf16.msra.mxu1 %v3411_v61  ;;  %v4829_v41 = vld [vmem:[%s5957_s22 + $0x28] sm:$0xff] }
 0x65c   : > { %4553 = vmatmul.msk.bf16.vlgmr.msrb.gmra.mxu3 %vm3202_vm8, %v3302_v43  ;;  %v4825_v61 = vld [vmem:[%s5957_s22 + $0x8] sm:$0xff] }
 0x65d   : > { %v3258_v48 = vadd.f32 %v4901_v30, %v3257_v45  ;;  %4552 = vmatmul.msk.bf16.vlgmr.msrb.gmra.mxu2 %vm3202_vm8, %v3301_v47 }
 0x65f   : > { %v3262_v49 = vsel %vm3261_vm10, %v4901_v30, %v3258_v48 }
 0x660   : > { %v3267_v50 = vsel %vm3264_vm11, %v3266_v32, %v3262_v49  ;;  %v4826_v32 = vld [vmem:[%s5957_s22 + $0x10] sm:$0xff] }
 0x661   : > { %v3268_v51 = vmul.f32 %v5832_v63, %v3267_v50  ;;  %v3471_v50 = vld [vmem:[%s5954_s19] sm:$0x3] }
 0x662   : > { %v3495_v53 = vperm.slane %v3471_v50, 0  ;;  %v3497_v57 = vperm.slane %v3471_v50, 1 }
 0x663   : > { %v3300_v52 = vpack.c.bf16 %v3268_v51, %v3268_v51 }
 0x665   : > { %4551 = vmatmul.msk.bf16.vlgmr.msrb.gmra.mxu1 %vm3202_vm8, %v3300_v52 }
 0x666   : > { %3651 = vmatpush.bf16.msrb.mxu1 %v4831_v37 }
 0x66a   : > { %3652 = vmatpush.bf16.msrb.mxu1 %v4830_v39 }
 0x66e   : > { %3653 = vmatpush.bf16.msrb.mxu1 %v4829_v41 }
 0x672   : > { %3654 = vmatpush.bf16.msrb.mxu1 %v4828_v42 }
 0x676   : > { %3655 = vmatpush.bf16.msrb.mxu1 %v4827_v46 }
 0x67a   : > { %3656 = vmatpush.bf16.msrb.mxu1 %v4826_v32 }
 0x67e   : > { %3657 = vmatpush.bf16.msrb.mxu1 %v4825_v61 }
 0x6cd   : > { %v3323_v62 = vpop.f32.mrf.mxu0 }
 0x6ce   : > { %v3384_v63 = vpack.c.bf16 %v3323_v62, %v3323_v62  ;;  %v4824_v62 = vld [vmem:[%s5957_s22] sm:$0xff] }
 0x6cf   : > { %3658 = vmatpush.bf16.msrb.mxu1 %v4824_v62 }
 0x6d0   : > { %4554 = vmatmul.msk.bf16.vlgmr.msra.gmra.mxu0 %vm1766_vm0, %v3384_v63  ;;  %v4866_v63 = vld [vmem:[%s5956_s21] ss:$0 sm:$0xff] }
 0x6d5   : > { %v3325_v56 = vpop.f32.mrf.mxu0 }
 0x6df   : > { %v3380_v0 = vpop.f32.mrf.mxu3 }
 0x6e0   : > { %v3361_v1 = vpop.f32.mrf.mxu2  ;;  %v3387_v2 = vpack.c.bf16 %v3380_v0, %v3380_v0 }
 0x6e1   : > { %v3386_v59 = vpack.c.bf16 %v3361_v1, %v3361_v1 }
 0x6e2   : > { %v3342_v3 = vpop.f32.mrf.mxu1  ;;  %4557 = vmatmul.msk.bf16.vlgmr.msra.gmra.mxu3 %vm1766_vm0, %v3387_v2 }
 0x6e3   : > { %v3385_v4 = vpack.c.bf16 %v3342_v3, %v3342_v3  ;;  %4556 = vmatmul.msk.bf16.vlgmr.msra.gmra.mxu2 %vm1766_vm0, %v3386_v59  ;;  %v4867_v3 = vld [vmem:[%s5958_s23] ss:$0 sm:$0xff] }
 0x6e5   : > { %4555 = vmatmul.msk.bf16.vlgmr.msra.gmra.mxu1 %vm1766_vm0, %v3385_v4 }
 0x6e7   : > { %v3382_v5 = vpop.f32.mrf.mxu3 }
 0x6e8   : > { %v3363_v6 = vpop.f32.mrf.mxu2 }
 0x6ea   : > { %v3344_v7 = vpop.f32.mrf.mxu1 }
 0x74d   : > { %v3403_v8 = vpop.f32.mrf.mxu0 }
 0x755   : > { %v3405_v9 = vpop.f32.mrf.mxu0 }
 0x762   : > { %v3422_v10 = vpop.f32.mrf.mxu1 }
 0x763   : > { %v3464_v11 = vadd.f32 %v3422_v10, %v3403_v8 }
 0x765   : > { %v3460_v12 = vpop.f32.mrf.mxu3 }
 0x766   : > { %v3441_v13 = vpop.f32.mrf.mxu2 }
 0x767   : > { %v3465_v14 = vadd.f32 %v3464_v11, %v3441_v13 }
 0x769   : > { %v3466_v16 = vadd.f32 %v3465_v14, %v3460_v12 }
 0x76a   : > { %v3424_v17 = vpop.f32.mrf.mxu1 }
 0x76b   : > { %v3470_v18 = vadd.f32 %v4865_v15, %v3466_v16 }
 0x76d   : > { %v3462_v19 = vpop.f32.mrf.mxu3  ;;  %v3472_v20 = vadd.f32 %v3470_v18, %v5667_v54  ;;  %v4820_v54 = vld [vmem:[%s5955_s20 + $0x20] sm:$0xff] }
 0x76e   : > { %v3443_v21 = vpop.f32.mrf.mxu2  ;;  %3588 = vmatpush.bf16.msrb.mxu0 %v4820_v54 }
 0x76f   : > { %3473 = vadd.xlane.f32.xlu0 %v3472_v20  ;;  %v3476_v22 = vmul.f32 %v3472_v20, %v3472_v20 }
 0x771   : > { %3477 = vadd.xlane.f32.xlu1 %v3476_v22 }
 0x772   : > { %3589 = vmatpush.bf16.msrb.mxu0 %v4819_v26 }
 0x776   : > { %3590 = vmatpush.bf16.msrb.mxu0 %v4818_v27 }
 0x77a   : > { %3591 = vmatpush.bf16.msrb.mxu0 %v4817_v28 }
 0x77e   : > { %3592 = vmatpush.bf16.msrb.mxu0 %v4816_v29 }
 0x7e2   : > { %v3474_v30 = vpop.xlane.xlu0 %3473 }
 0x7e3   : > { %v3475_v31 = vmul.f32 0.03125, %v3474_v30 }
 0x7e4   : > { %v3478_v33 = vpop.xlane.xlu1 %3477 }
 0x7e5   : > { %v3480_v34 = vmul.f32 %v3475_v31, %v3475_v31  ;;  %v3479_v36 = vmul.f32 0.03125, %v3478_v33  ;;  %v3482_v52 = vsub.f32 %v3472_v20, %v3475_v31  ;;  %v3664_v20 = vld [vmem:[%s5997_s27] sm:$0x3] }
 0x7e6   : > { %v3688_v24 = vperm.slane %v3664_v20, 0  ;;  %v3690_v54 = vperm.slane %v3664_v20, 1 }
 0x7e7   : > { %v3481_v38 = vsub.f32 %v3479_v36, %v3480_v34 }
 0x7e9   : > { %v3483_v40 = vadd.f32 1e-05, %v3481_v38 }
 0x7eb   : > { %4902 = vrsqrt.f32 %v3483_v40  ;;  %vm3490_vm1 = vweird.f32 %v3483_v40 }
 0x7f1   : > { %v4903_v43 = vpop.eup %4902 }
 0x7f2   : > { %v3485_v45 = vmul.f32 %v4903_v43, %v3483_v40  ;;  %vm3491_vm0 = vweird.f32 %v4903_v43 }
 0x7f3   : > { %vm3492_vm8 = vmor %vm3490_vm1, %vm3491_vm0 }
 0x7f4   : > { %v3486_v47 = vmul.f32 %v4903_v43, %v3485_v45 }
 0x7f6   : > { %v3487_v48 = vmul.f32 0.5, %v3486_v47 }
 0x7f8   : > { %v3488_v49 = vsub.f32 1.5, %v3487_v48 }
 0x7fa   : > { %v3489_v51 = vmul.f32 %v4903_v43, %v3488_v49 }
 0x7fc   : > { %v3493_v35 = vsel %vm3492_vm8, %v4903_v43, %v3489_v51 }
 0x7fd   : > { %v3494_v55 = vmul.f32 %v3493_v35, %v3482_v52 }
 0x7ff   : > { %v3496_v44 = vmul.f32 %v3495_v53, %v3494_v55 }
 0x801   : > { %v3498_v58 = vadd.f32 %v3497_v57, %v3496_v44 }
 0x803   : > { %v3533_v60 = vpack.c.bf16 %v3498_v58, %v3498_v58 }
 0x805   : > { %3593 = vmatmul.bf16.vlgmr.msrb.gmra.mxu0 %v3533_v60 }
 0x882   : > { %v3594_v56 = vpop.f32.mrf.mxu0 }
 0x883   : > { %v3595_v0 = vadd.f32 %v4866_v63, %v3594_v56 }
 0x885   : > { %v3598_v1 = vmax.f32 %v3595_v0, 0.0 }
 0x887   : > { %v3599_v2 = vpack.c.bf16 %v3598_v1, %v3598_v1 }
 0x889   : > { %3659 = vmatmul.bf16.vlgmr.msrb.gmra.mxu1 %v3599_v2 }
 0x88a   : > { %v3596_v59 = vpop.f32.mrf.mxu0 }
 0x906   : > { %v3660_v4 = vpop.f32.mrf.mxu1 }
 0x907   : > { %v3661_v5 = vadd.f32 %v4867_v3, %v3660_v4 }
 0x909   : > { %v3665_v6 = vadd.f32 %v3661_v5, %v3498_v58 }
 0x90b   : > { %3666 = vadd.xlane.f32.xlu2 %v3665_v6  ;;  %v3669_v7 = vmul.f32 %v3665_v6, %v3665_v6 }
 0x90d   : > { %3670 = vadd.xlane.f32.xlu0 %v3669_v7 }
 0x90e   : > { %v3662_v8 = vpop.f32.mrf.mxu1 }
 0x97e   : > { %v3667_v9 = vpop.xlane.xlu2 %3666 }
 0x97f   : > { %v3668_v10 = vmul.f32 0.03125, %v3667_v9 }
 0x980   : > { %v3671_v11 = vpop.xlane.xlu0 %3670 }
 0x981   : > { %v3673_v12 = vmul.f32 %v3668_v10, %v3668_v10  ;;  %v3672_v13 = vmul.f32 0.03125, %v3671_v11  ;;  %v3675_v23 = vsub.f32 %v3665_v6, %v3668_v10 }
 0x983   : > { %v3674_v14 = vsub.f32 %v3672_v13, %v3673_v12 }
 0x985   : > { %v3676_v15 = vadd.f32 1e-05, %v3674_v14 }
 0x987   : > { %4904 = vrsqrt.f32 %v3676_v15  ;;  %vm3683_vm13 = vweird.f32 %v3676_v15 }
 0x98d   : > { %v4905_v16 = vpop.eup %4904 }
 0x98e   : > { %v3678_v17 = vmul.f32 %v4905_v16, %v3676_v15  ;;  %vm3684_vm12 = vweird.f32 %v4905_v16 }
 0x98f   : > { %vm3685_vm14 = vmor %vm3683_vm13, %vm3684_vm12 }
 0x990   : > { %v3679_v18 = vmul.f32 %v4905_v16, %v3678_v17 }
 0x992   : > { %v3680_v19 = vmul.f32 0.5, %v3679_v18 }
 0x994   : > { %v3681_v21 = vsub.f32 1.5, %v3680_v19 }
 0x996   : > { %v3682_v22 = vmul.f32 %v4905_v16, %v3681_v21 }
 0x998   : > { %v3686_v25 = vsel %vm3685_vm14, %v4905_v16, %v3682_v22 }
 0x999   : > { %v3687_v26 = vmul.f32 %v3686_v25, %v3675_v23 }
 0x99b   : > { %v3689_v27 = vmul.f32 %v3688_v24, %v3687_v26 }
 0x99d   : > { %v3691_v28 = vadd.f32 %v3690_v54, %v3689_v27 }
 0x99f   : > { %3692 = vst [vmem:[%s776_s29] sm:$0xff] %v3691_v28 }
 0x9a0 PF: > { %s6000_s7 = sld [smem:[#allocation2_spill]] }
 0x9a6   : > { %s35_s29 = sadd.s32 1, %s6000_s7  }
 0x9a7   : > { %p32_p4 = scmp.ge.s32.totalorder %s35_s29, 4  }
 0x9a9   :  { %34 = sbr.rel (!%p32_p4) target bundleno = 13 (0xd), region = 153 }

</bundles_post_ra>
